<compile_context>
chip_gen: v5e
topology: v5e:2x2
jax: 0.10.0
libtpu: 0.0.40
codegen_flags: <defaults>
</compile_context>

<pallas_src>
import functools

import jax
import jax.numpy as jnp
from jax import lax
from jax.experimental import pallas as pl
from jax.experimental.pallas import tpu as pltpu


C_HID, Z_DIMS, Y_DIM, X_H, X_W = 16, 16, 2, 28, 28
_VMEM_LIMIT = 32 * 1024 * 1024


def _round_up(x, m):
    return ((x + m - 1) // m) * m


def _pick_bm(M, block_m):
    """Row-block size: big tiles for big M, ~2 blocks for medium M (v7x TCs),
    one full block for tiny M."""
    if M > block_m:
        return block_m
    if M <= 256:
        return M
    return min(block_m, _round_up((M + 1) // 2, 8))


# ----------------------------------------------------------------------------
# Pallas kernels
# ----------------------------------------------------------------------------
def _apply_act(x, act):
    if act == "relu":
        return jnp.maximum(x, 0.0)
    return x


def _linear_kernel(a_ref, w_ref, b_ref, o_ref, *, act):
    a = a_ref[...]
    if a.dtype != jnp.bfloat16:
        a = a.astype(jnp.bfloat16)
    out = jnp.dot(a, w_ref[...], preferred_element_type=jnp.float32) + b_ref[...]
    o_ref[...] = _apply_act(out, act).astype(o_ref.dtype)


def _linear_rowbias_kernel(a_ref, w_ref, b_ref, rb_ref, o_ref, *, act):
    a = a_ref[...]
    if a.dtype != jnp.bfloat16:
        a = a.astype(jnp.bfloat16)
    out = jnp.dot(a, w_ref[...], preferred_element_type=jnp.float32)
    out = out + b_ref[...] + rb_ref[...]
    o_ref[...] = _apply_act(out, act).astype(o_ref.dtype)


def pallas_linear(a, w, b, act="none", row_bias=None,
                  out_dtype=jnp.float32, block_m=2048):
    """act(a @ w + b [+ row_bias]);  a:(M,K) bf16, w:(K,N) bf16, b:(N,) f32."""
    M, K = a.shape
    N = w.shape[1]
    bias = b.reshape(1, N).astype(jnp.float32)
    bm = _pick_bm(M, block_m)
    grid = (pl.cdiv(M, bm),)
    row = lambda i: (i, 0)
    const = lambda i: (0, 0)
    a_spec = pl.BlockSpec((bm, K), row)
    o_spec = pl.BlockSpec((bm, N), row)
    w_spec = pl.BlockSpec((K, N), const)
    b_spec = pl.BlockSpec((1, N), const)
    if row_bias is None:
        kern = functools.partial(_linear_kernel, act=act)
        in_specs = [a_spec, w_spec, b_spec]
        args = (a, w, bias)
    else:
        kern = functools.partial(_linear_rowbias_kernel, act=act)
        in_specs = [a_spec, w_spec, b_spec, pl.BlockSpec((bm, N), row)]
        args = (a, w, bias, row_bias.astype(jnp.float32))
    return pl.pallas_call(
        kern,
        grid=grid,
        in_specs=in_specs,
        out_specs=o_spec,
        out_shape=jax.ShapeDtypeStruct((M, N), out_dtype),
        compiler_params=pltpu.CompilerParams(
            dimension_semantics=("parallel",),
            vmem_limit_bytes=_VMEM_LIMIT),
    )(*args)


def _qz_kernel(h_ref, wmu_ref, bmu_ref, wsp_ref, bsp_ref, eps_ref,
               wpx_ref, bpx_ref, mu_ref, std_ref, hdec_ref):
    """Fused qz_mu / qz_pre_sp linears + softplus + reparameterize + px_l1."""
    h = h_ref[...]
    mu = jnp.dot(h, wmu_ref[...], preferred_element_type=jnp.float32) + bmu_ref[...]
    pre = jnp.dot(h, wsp_ref[...], preferred_element_type=jnp.float32) + bsp_ref[...]
    std = jnp.maximum(pre, 0.0) + jnp.log(1.0 + jnp.exp(-jnp.abs(pre)))   # softplus
    z = mu + eps_ref[...] * std
    hdec = jnp.dot(z.astype(jnp.bfloat16), wpx_ref[...],
                   preferred_element_type=jnp.float32) + bpx_ref[...]
    mu_ref[...] = mu
    std_ref[...] = std
    hdec_ref[...] = hdec.astype(hdec_ref.dtype)


def pallas_qz_reparam_px(h, w_mu, b_mu, w_sp, b_sp, eps, w_px, b_px, block_m=512):
    B, K = h.shape
    Z = w_mu.shape[1]
    N = w_px.shape[1]
    bm = _pick_bm(B, block_m)
    grid = (pl.cdiv(B, bm),)
    row = lambda i: (i, 0)
    const = lambda i: (0, 0)
    mu, std, hdec = pl.pallas_call(
        _qz_kernel,
        grid=grid,
        in_specs=[pl.BlockSpec((bm, K), row),
                  pl.BlockSpec((K, Z), const), pl.BlockSpec((1, Z), const),
                  pl.BlockSpec((K, Z), const), pl.BlockSpec((1, Z), const),
                  pl.BlockSpec((bm, Z), row),
                  pl.BlockSpec((Z, N), const), pl.BlockSpec((1, N), const)],
        out_specs=[pl.BlockSpec((bm, Z), row),
                   pl.BlockSpec((bm, Z), row),
                   pl.BlockSpec((bm, N), row)],
        out_shape=[jax.ShapeDtypeStruct((B, Z), jnp.float32),
                   jax.ShapeDtypeStruct((B, Z), jnp.float32),
                   jax.ShapeDtypeStruct((B, N), jnp.bfloat16)],
        compiler_params=pltpu.CompilerParams(
            dimension_semantics=("parallel",),
            vmem_limit_bytes=_VMEM_LIMIT),
    )(h, w_mu, b_mu.reshape(1, Z).astype(jnp.float32),
      w_sp, b_sp.reshape(1, Z).astype(jnp.float32),
      eps, w_px, b_px.reshape(1, N).astype(jnp.float32))
    return mu, std, hdec


def _heads_elbo_kernel(pat_ref, wb_ref, bb_ref, seg_ref, h_ref, wy_ref, by_ref,
                       x_ref, yoh_ref, mu_ref, std_ref, elbo_ref):
    """Fused Bernoulli head + p_y head + ELBO for one batch chunk."""
    # --- Bernoulli head (sub-pixel transposed conv as one matmul) -> logits ---
    logits = jnp.dot(pat_ref[...], wb_ref[...],
                     preferred_element_type=jnp.float32) + bb_ref[...]       # (R,4)
    x = x_ref[...].astype(jnp.float32)
    sp = jnp.maximum(logits, 0.0) + jnp.log(1.0 + jnp.exp(-jnp.abs(logits)))  # softplus
    ll = x * logits - sp                                                      # (R,4)
    # Per-example reduction via the precomputed {0,1} segment matrix.
    recon = jnp.sum(jnp.dot(seg_ref[...], ll, preferred_element_type=jnp.float32),
                    axis=-1, keepdims=True)                                   # (bc,1)
    # --- p_y head + categorical log-prob of argmax(y) ---
    y_logit = jnp.dot(h_ref[...], wy_ref[...],
                      preferred_element_type=jnp.float32) + by_ref[...]       # (bc,2)
    m = jnp.max(y_logit, axis=-1, keepdims=True)
    lse = m + jnp.log(jnp.sum(jnp.exp(y_logit - m), axis=-1, keepdims=True))
    cat_lp = jnp.sum(yoh_ref[...] * (y_logit - lse), axis=-1, keepdims=True)
    # --- analytic KL( N(mu,std) || N(0,1) ), summed over latent dims ---
    mu = mu_ref[...]
    std = std_ref[...]
    kl = jnp.sum(-jnp.log(std) + 0.5 * (std * std + mu * mu) - 0.5,
                 axis=-1, keepdims=True)
    elbo_ref[...] = recon + cat_lp - kl


def _pick_bc(B):
    """Batch-chunk size (<=32, v7x-VMEM safe) and padded batch size."""
    for cand in (32, 16, 8):
        if B % cand == 0:
            return cand, B
    if B <= 32:
        return B, B
    return 8, _round_up(B, 8)


def pallas_heads_elbo(pat, w_pxb, b_pxb, h_flat, w_py, b_py,
                      x_p, y_onehot, qz_mu, qz_std, rows_per_ex):
    B, Dh = h_flat.shape
    Kp = pat.shape[1]
    Nc = w_pxb.shape[1]
    Ny = y_onehot.shape[1]
    Z = qz_mu.shape[1]
    bc, Bp = _pick_bc(B)
    if Bp != B:                      # padded / masked last chunk (robust large B)
        dp = Bp - B
        pat = jnp.pad(pat, ((0, dp * rows_per_ex), (0, 0)))
        x_p = jnp.pad(x_p, ((0, dp * rows_per_ex), (0, 0)))
        h_flat = jnp.pad(h_flat, ((0, dp), (0, 0)))
        y_onehot = jnp.pad(y_onehot, ((0, dp), (0, 0)))
        qz_mu = jnp.pad(qz_mu, ((0, dp), (0, 0)))
        qz_std = jnp.pad(qz_std, ((0, dp), (0, 0)), constant_values=1.0)
    grid = (Bp // bc,)
    R = bc * rows_per_ex
    # Precomputed {0,1} segment matrix (constant index_map -> DMA'd once, resident).
    seg = (jnp.arange(R)[None, :] // rows_per_ex ==
           jnp.arange(bc)[:, None]).astype(jnp.float32)
    bb = b_pxb.reshape(1, Nc).astype(jnp.float32)
    by = b_py.reshape(1, Ny).astype(jnp.float32)
    row = lambda i: (i, 0)
    const = lambda i: (0, 0)
    elbo = pl.pallas_call(
        _heads_elbo_kernel,
        grid=grid,
        in_specs=[
            pl.BlockSpec((R, Kp), row),
            pl.BlockSpec((Kp, Nc), const),
            pl.BlockSpec((1, Nc), const),
            pl.BlockSpec((bc, R), const),
            pl.BlockSpec((bc, Dh), row),
            pl.BlockSpec((Dh, Ny), const),
            pl.BlockSpec((1, Ny), const),
            pl.BlockSpec((R, Nc), row),
            pl.BlockSpec((bc, Ny), row),
            pl.BlockSpec((bc, Z), row),
            pl.BlockSpec((bc, Z), row),
        ],
        out_specs=pl.BlockSpec((bc, 1), row),
        out_shape=jax.ShapeDtypeStruct((Bp, 1), jnp.float32),
        compiler_params=pltpu.CompilerParams(
            dimension_semantics=("parallel",),
            vmem_limit_bytes=_VMEM_LIMIT),
    )(pat, w_pxb, bb, seg, h_flat, w_py, by, x_p, y_onehot, qz_mu, qz_std)
    return elbo[:B, 0]


# ----------------------------------------------------------------------------
# Conv / ConvTranspose helpers: patch extraction (XLA) + Pallas matmul
# ----------------------------------------------------------------------------
def _patches_nhwc(x_nhwc, k, stride, pad):
    """(B,H,W,C) -> (B,Ho,Wo,C*k*k); feature order c*k*k + ki*k + kj."""
    return lax.conv_general_dilated_patches(
        x_nhwc, (k, k), (stride, stride), [(pad, pad), (pad, pad)],
        dimension_numbers=("NHWC", "HWIO", "NHWC"))


def conv_transpose2d_nhwc(x_nhwc, w_sub, b_sub, cout, act):
    """Stride-2, k=4, pad=1 transposed conv via sub-pixel decomposition:
    one 3x3 stride-1 patch extraction + one matmul producing all four output
    sub-grids (column = (2*rh + rw)*Cout + co), then interleaving."""
    B, H, W, _ = x_nhwc.shape
    pat = _patches_nhwc(x_nhwc, 3, 1, 1)                       # bf16 (B,H,W,Cin*9)
    out = pallas_linear(pat.reshape(B * H * W, pat.shape[3]), w_sub, b_sub, act,
                        out_dtype=jnp.bfloat16)
    out = out.reshape(B, H, W, 2, 2, cout).transpose(0, 1, 3, 2, 4, 5)
    return out.reshape(B, 2 * H, 2 * W, cout)                  # NHWC, bf16


# ----------------------------------------------------------------------------
# Parameters (PyTorch layout) + one-time repacking for the kernels
# ----------------------------------------------------------------------------
def init_params(key):
    keys = jax.random.split(key, 16)

    def u(k, shape, fan_in):
        bound = 1.0 / jnp.sqrt(float(fan_in))
        return jax.random.uniform(k, shape, jnp.float32, -bound, bound)

    c, z = C_HID, Z_DIMS
    p = {}
    p["conv1_w"] = u(keys[0], (c, 1 + Y_DIM, 4, 4), (1 + Y_DIM) * 16)
    p["conv1_b"] = u(keys[1], (c,), (1 + Y_DIM) * 16)
    p["conv2_w"] = u(keys[2], (2 * c, c, 4, 4), c * 16)
    p["conv2_b"] = u(keys[3], (2 * c,), c * 16)
    p["qz_mu_w"] = u(keys[4], (z, 2 * c * 49), 2 * c * 49)      # (out, in)
    p["qz_mu_b"] = u(keys[5], (z,), 2 * c * 49)
    p["qz_sp_w"] = u(keys[6], (z, 2 * c * 49), 2 * c * 49)
    p["qz_sp_b"] = u(keys[7], (z,), 2 * c * 49)
    p["px_l1_w"] = u(keys[8], (2 * c * 49, z), z)
    p["px_l1_b"] = u(keys[9], (2 * c * 49,), z)
    p["pxc1_w"] = u(keys[10], (2 * c, c, 4, 4), 2 * c * 16)     # ConvT: (Cin,Cout,k,k)
    p["pxc1_b"] = u(keys[11], (c,), 2 * c * 16)
    p["pxb_w"] = u(keys[12], (c, 1, 4, 4), c * 16)
    p["pxb_b"] = u(keys[13], (1,), c * 16)
    p["py_w"] = u(keys[14], (Y_DIM, 3136), 3136)
    p["py_b"] = u(keys[15], (Y_DIM,), 3136)
    return p


def _subpixel_weight(wt):
    """ConvTranspose2d weight (Cin,Cout,4,4) (stride 2, pad 1) ->
    (Cin*9, 4*Cout) matrix acting on 3x3 stride-1 patches of the pad-1 input.
    Output column index = (2*rh + rw)*Cout + co."""
    cin, cout = wt.shape[0], wt.shape[1]
    wc = jnp.zeros((cin, 3, 3, 2, 2, cout), jnp.float32)
    for rh in range(2):
        for rw in range(2):
            for di in range(2):
                for dj in range(2):
                    wc = wc.at[:, rh + di, rw + dj, rh, rw, :].set(
                        wt[:, :, 3 - rh - 2 * di, 3 - rw - 2 * dj])
    return wc.reshape(cin * 9, 4 * cout)


def _nhwc_to_nchw_perm(h, w, c):
    """perm[n_nhwc_flat] = flat NCHW index of the same (c,h,w) feature."""
    n = jnp.arange(h * w * c)
    ci = n % c
    wj = (n // c) % w
    hi = n // (c * w)
    return ci * (h * w) + hi * w + wj


def preprocess_params(p):
    """One-time conversion of PyTorch-layout weights into the matrices the
    Pallas kernels consume (hoisted out of the per-step forward)."""
    c = C_HID
    q = {}
    # conv1: x-channel weights -> (16,16); spatially-constant y channels are
    # folded into a per-output-position linear map of y (handles the zero pad).
    w1 = p["conv1_w"]                                             # (16, 3, 4, 4)
    q["conv1_wx"] = w1[:, :1].reshape(c, 16).T.astype(jnp.bfloat16)   # (16, 16)
    q["conv1_b"] = p["conv1_b"]
    ones_img = jnp.ones((1, X_H, X_W, 1), jnp.float32)
    ymaps = []
    for yc in range(Y_DIM):
        kern = w1[:, 1 + yc].transpose(1, 2, 0)[:, :, None, :]    # (4,4,1,16) HWIO
        m = lax.conv_general_dilated(
            ones_img, kern, (2, 2), [(1, 1), (1, 1)],
            dimension_numbers=("NHWC", "HWIO", "NHWC"))           # (1,14,14,16)
        ymaps.append(m.reshape(14 * 14 * c))
    q["conv1_ymap"] = jnp.stack(ymaps, axis=0)                    # (2, 3136)
    # conv2: (Cout,Cin,k,k) -> (Cin*k*k, Cout), bf16 MXU operand.
    q["conv2_w"] = p["conv2_w"].reshape(2 * c, -1).T.astype(jnp.bfloat16)
    q["conv2_b"] = p["conv2_b"]
    # qz heads: rows permuted NCHW-flatten -> NHWC-flatten.
    perm77 = _nhwc_to_nchw_perm(7, 7, 2 * c)
    q["qz_mu_w"] = p["qz_mu_w"].T[perm77].astype(jnp.bfloat16)    # (1568, 16)
    q["qz_mu_b"] = p["qz_mu_b"]
    q["qz_sp_w"] = p["qz_sp_w"].T[perm77].astype(jnp.bfloat16)
    q["qz_sp_b"] = p["qz_sp_b"]
    # px_l1: columns permuted so its output flattens directly as NHWC (7,7,2c).
    q["px_l1_w"] = p["px_l1_w"].T[:, perm77].astype(jnp.bfloat16)  # (16, 1568)
    q["px_l1_b"] = p["px_l1_b"][perm77]
    # transposed convs -> sub-pixel matmul weights.
    q["pxc1_w"] = _subpixel_weight(p["pxc1_w"]).astype(jnp.bfloat16)  # (288, 64)
    q["pxc1_b"] = jnp.tile(p["pxc1_b"], 4)                            # (64,)
    q["pxb_w"] = _subpixel_weight(p["pxb_w"]).astype(jnp.bfloat16)    # (144, 4)
    q["pxb_b"] = jnp.tile(p["pxb_b"], 4)                              # (4,)
    # py head: rows permuted NCHW-flatten (16,14,14) -> NHWC-flatten.
    perm1414 = _nhwc_to_nchw_perm(14, 14, c)
    q["py_w"] = p["py_w"].T[perm1414].astype(jnp.bfloat16)            # (3136, 2)
    q["py_b"] = p["py_b"]
    return q


# ----------------------------------------------------------------------------
# VAE_bMNIST forward
# ----------------------------------------------------------------------------
def vae_forward(params, x, y, eps_key):
    """x: (B,1,28,28) f32 in {0,1}; y: (B,2).  Returns (loss, elbo) like the
    PyTorch module's forward (-elbo.mean(), elbo)."""
    B = x.shape[0]
    c = C_HID

    # ---- q_z(x, y) ----  (NHWC activations, bf16 MXU operands)
    x_nhwc = x.reshape(B, X_H, X_W, 1).astype(jnp.bfloat16)        # exact for {0,1}
    pat1 = _patches_nhwc(x_nhwc, 4, 2, 1).reshape(B * 196, 16)     # (B*196, 16) bf16
    ybias = jnp.dot(y, params["conv1_ymap"]).reshape(B * 196, c)   # folded y channels
    h = pallas_linear(pat1, params["conv1_wx"], params["conv1_b"], "relu",
                      row_bias=ybias, out_dtype=jnp.bfloat16)
    h = h.reshape(B, 14, 14, c)
    pat2 = _patches_nhwc(h, 4, 2, 1).reshape(B * 49, 16 * c)       # (B*49, 256) bf16
    h = pallas_linear(pat2, params["conv2_w"], params["conv2_b"], "relu",
                      out_dtype=jnp.bfloat16)
    h = h.reshape(B, 7 * 7 * 2 * c)                                # (B,1568) NHWC, bf16

    # ---- fused qz heads + softplus + reparameterize + px_l1 ----
    eps = jax.random.normal(eps_key, (B, Z_DIMS), jnp.float32)
    qz_mu, qz_std, hdec = pallas_qz_reparam_px(
        h, params["qz_mu_w"], params["qz_mu_b"],
        params["qz_sp_w"], params["qz_sp_b"],
        eps, params["px_l1_w"], params["px_l1_b"])

    # ---- p_xy(z) ----
    hdec = hdec.reshape(B, 7, 7, 2 * c)                            # bf16
    h = conv_transpose2d_nhwc(hdec, params["pxc1_w"], params["pxc1_b"], c, "relu")
    # h: (B,14,14,16) bf16

    # ---- decoder heads (py logits + Bernoulli) fused with the ELBO ----
    h_flat = h.reshape(B, 14 * 14 * c)                             # (B,3136) bf16
    pat = _patches_nhwc(h, 3, 1, 1).reshape(B * 196, c * 9)        # (B*196,144) bf16
    # x rearranged to match the sub-pixel output layout:
    #   row = b*196 + a*14 + b',  col = 2*rh + rw  <->  pixel (2a+rh, 2b'+rw)
    x_p = x.reshape(B, 14, 2, 14, 2).transpose(0, 1, 3, 2, 4)
    x_p = x_p.reshape(B * 196, 4).astype(jnp.bfloat16)             # exact for {0,1}
    y_onehot = jax.nn.one_hot(jnp.argmax(y, axis=1), Y_DIM, dtype=jnp.float32)
    elbo = pallas_heads_elbo(pat, params["pxb_w"], params["pxb_b"],
                             h_flat, params["py_w"], params["py_b"],
                             x_p, y_onehot, qz_mu, qz_std, rows_per_ex=196)
    loss = -jnp.mean(elbo)
    return loss, elbo


# ----------------------------------------------------------------------------
if __name__ == "__main__":
    key = jax.random.PRNGKey(0)
    kp, kx, ky, ke = jax.random.split(key, 4)
    raw_params = init_params(kp)
    params = preprocess_params(raw_params)      # one-time weight repacking

    B = 2
    x = (jax.random.uniform(kx, (B, 1, X_H, X_W)) > 0.5).astype(jnp.float32)
    labels = jax.random.randint(ky, (B,), 0, Y_DIM)
    y = jax.nn.one_hot(labels, Y_DIM, dtype=jnp.float32)

    loss, elbo = jax.jit(vae_forward)(params, x, y, ke)
    jax.block_until_ready((loss, elbo))
    assert loss.shape == () and elbo.shape == (B,)
    print("KERNEL_OK")
</pallas_src>

<mosaic_0001>
module attributes {stable_mosaic.version = 11 : i64} {
  func.func @_linear_rowbias_kernel(%arg0: i32, %arg1: memref<200x16xbf16, #tpu.memory_space<vmem>>, %arg2: memref<16x16xbf16, #tpu.memory_space<vmem>>, %arg3: memref<1x16xf32, #tpu.memory_space<vmem>>, %arg4: memref<200x16xf32, #tpu.memory_space<vmem>>, %arg5: memref<200x16xbf16, #tpu.memory_space<vmem>>) attributes {dimension_semantics = [#tpu.dimension_semantics<parallel>], iteration_bounds = array<i64: 2>, scalar_prefetch = 0 : i64, scratch_operands = 0 : i64, tpu.core_type = #tpu.core_type<tc>, window_params = [{transform_indices = @transform_0, window_bounds = array<i64: 200, 16>}, {pipeline_mode = #tpu.pipeline_mode<synchronous>, transform_indices = @transform_1, window_bounds = array<i64: 16, 16>}, {pipeline_mode = #tpu.pipeline_mode<synchronous>, transform_indices = @transform_2, window_bounds = array<i64: 1, 16>}, {transform_indices = @transform_3, window_bounds = array<i64: 200, 16>}, {transform_indices = @transform_4, window_bounds = array<i64: 200, 16>}]} {
    %c0 = arith.constant 0 : index
    %c0_0 = arith.constant 0 : index
    %0 = vector.load %arg1[%c0, %c0_0] : memref<200x16xbf16, #tpu.memory_space<vmem>>, vector<200x16xbf16>
    %c0_1 = arith.constant 0 : index
    %c0_2 = arith.constant 0 : index
    %1 = vector.load %arg2[%c0_1, %c0_2] : memref<16x16xbf16, #tpu.memory_space<vmem>>, vector<16x16xbf16>
    %cst = arith.constant dense<0.000000e+00> : vector<200x16xf32>
    %2 = tpu.matmul %0, %1, %cst {dimension_numbers = #tpu.dot_dimension_numbers<[1], [0], [0], [1], [0, 0, 1, 1], [], []>} : vector<200x16xbf16>, vector<16x16xbf16>, vector<200x16xf32> -> vector<200x16xf32>
    %c0_3 = arith.constant 0 : index
    %c0_4 = arith.constant 0 : index
    %3 = vector.load %arg3[%c0_3, %c0_4] : memref<1x16xf32, #tpu.memory_space<vmem>>, vector<1x16xf32>
    %4 = vector.broadcast %3 : vector<1x16xf32> to vector<200x16xf32>
    %5 = arith.addf %2, %4 : vector<200x16xf32>
    %c0_5 = arith.constant 0 : index
    %c0_6 = arith.constant 0 : index
    %6 = vector.load %arg4[%c0_5, %c0_6] : memref<200x16xf32, #tpu.memory_space<vmem>>, vector<200x16xf32>
    %7 = arith.addf %5, %6 : vector<200x16xf32>
    %cst_7 = arith.constant 0.000000e+00 : f32
    %8 = vector.broadcast %cst_7 : f32 to vector<200x16xf32>
    %9 = arith.maximumf %7, %8 : vector<200x16xf32>
    %10 = arith.truncf %9 : vector<200x16xf32> to vector<200x16xbf16>
    %c0_8 = arith.constant 0 : index
    %c0_9 = arith.constant 0 : index
    %11 = vector.load %arg5[%c0_8, %c0_9] : memref<200x16xbf16, #tpu.memory_space<vmem>>, vector<200x16xbf16>
    tpu.vector_store %arg5[%c0_8, %c0_9], %10 {strides = array<i32>} : memref<200x16xbf16, #tpu.memory_space<vmem>>, vector<200x16xbf16>,
    return
  }
  func.func @transform_0(%arg0: i32) -> (i32, i32) {
    %c0_i32 = arith.constant 0 : i32
    %c0_i32_0 = arith.constant 0 : i32
    return %arg0, %c0_i32 : i32, i32
  }
  func.func @transform_1(%arg0: i32) -> (i32, i32) {
    %c0_i32 = arith.constant 0 : i32
    %c0_i32_0 = arith.constant 0 : i32
    %c0_i32_1 = arith.constant 0 : i32
    return %c0_i32, %c0_i32_0 : i32, i32
  }
  func.func @transform_2(%arg0: i32) -> (i32, i32) {
    %c0_i32 = arith.constant 0 : i32
    %c0_i32_0 = arith.constant 0 : i32
    %c0_i32_1 = arith.constant 0 : i32
    return %c0_i32, %c0_i32_0 : i32, i32
  }
  func.func @transform_3(%arg0: i32) -> (i32, i32) {
    %c0_i32 = arith.constant 0 : i32
    %c0_i32_0 = arith.constant 0 : i32
    return %arg0, %c0_i32 : i32, i32
  }
  func.func @transform_4(%arg0: i32) -> (i32, i32) {
    %c0_i32 = arith.constant 0 : i32
    %c0_i32_0 = arith.constant 0 : i32
    return %arg0, %c0_i32 : i32, i32
  }
}

module attributes {stable_mosaic.version = 11 : i64} {
  func.func @_linear_kernel(%arg0: i32, %arg1: memref<98x256xbf16, #tpu.memory_space<vmem>>, %arg2: memref<256x32xbf16, #tpu.memory_space<vmem>>, %arg3: memref<1x32xf32, #tpu.memory_space<vmem>>, %arg4: memref<98x32xbf16, #tpu.memory_space<vmem>>) attributes {dimension_semantics = [#tpu.dimension_semantics<parallel>], iteration_bounds = array<i64: 1>, scalar_prefetch = 0 : i64, scratch_operands = 0 : i64, tpu.core_type = #tpu.core_type<tc>, window_params = [{transform_indices = @transform_0, window_bounds = array<i64: 98, 256>}, {pipeline_mode = #tpu.pipeline_mode<synchronous>, transform_indices = @transform_1, window_bounds = array<i64: 256, 32>}, {pipeline_mode = #tpu.pipeline_mode<synchronous>, transform_indices = @transform_2, window_bounds = array<i64: 1, 32>}, {transform_indices = @transform_3, window_bounds = array<i64: 98, 32>}]} {
    %c0 = arith.constant 0 : index
    %c0_0 = arith.constant 0 : index
    %0 = vector.load %arg1[%c0, %c0_0] : memref<98x256xbf16, #tpu.memory_space<vmem>>, vector<98x256xbf16>
    %c0_1 = arith.constant 0 : index
    %c0_2 = arith.constant 0 : index
    %1 = vector.load %arg2[%c0_1, %c0_2] : memref<256x32xbf16, #tpu.memory_space<vmem>>, vector<256x32xbf16>
    %cst = arith.constant dense<0.000000e+00> : vector<98x32xf32>
    %2 = tpu.matmul %0, %1, %cst {dimension_numbers = #tpu.dot_dimension_numbers<[1], [0], [0], [1], [0, 0, 1, 1], [], []>} : vector<98x256xbf16>, vector<256x32xbf16>, vector<98x32xf32> -> vector<98x32xf32>
    %c0_3 = arith.constant 0 : index
    %c0_4 = arith.constant 0 : index
    %3 = vector.load %arg3[%c0_3, %c0_4] : memref<1x32xf32, #tpu.memory_space<vmem>>, vector<1x32xf32>
    %4 = vector.broadcast %3 : vector<1x32xf32> to vector<98x32xf32>
    %5 = arith.addf %2, %4 : vector<98x32xf32>
    %cst_5 = arith.constant 0.000000e+00 : f32
    %6 = vector.broadcast %cst_5 : f32 to vector<98x32xf32>
    %7 = arith.maximumf %5, %6 : vector<98x32xf32>
    %8 = arith.truncf %7 : vector<98x32xf32> to vector<98x32xbf16>
    %c0_6 = arith.constant 0 : index
    %c0_7 = arith.constant 0 : index
    %9 = vector.load %arg4[%c0_6, %c0_7] : memref<98x32xbf16, #tpu.memory_space<vmem>>, vector<98x32xbf16>
    tpu.vector_store %arg4[%c0_6, %c0_7], %8 {strides = array<i32>} : memref<98x32xbf16, #tpu.memory_space<vmem>>, vector<98x32xbf16>,
    return
  }
  func.func @transform_0(%arg0: i32) -> (i32, i32) {
    %c0_i32 = arith.constant 0 : i32
    %c0_i32_0 = arith.constant 0 : i32
    return %arg0, %c0_i32 : i32, i32
  }
  func.func @transform_1(%arg0: i32) -> (i32, i32) {
    %c0_i32 = arith.constant 0 : i32
    %c0_i32_0 = arith.constant 0 : i32
    %c0_i32_1 = arith.constant 0 : i32
    return %c0_i32, %c0_i32_0 : i32, i32
  }
  func.func @transform_2(%arg0: i32) -> (i32, i32) {
    %c0_i32 = arith.constant 0 : i32
    %c0_i32_0 = arith.constant 0 : i32
    %c0_i32_1 = arith.constant 0 : i32
    return %c0_i32, %c0_i32_0 : i32, i32
  }
  func.func @transform_3(%arg0: i32) -> (i32, i32) {
    %c0_i32 = arith.constant 0 : i32
    %c0_i32_0 = arith.constant 0 : i32
    return %arg0, %c0_i32 : i32, i32
  }
}

module attributes {stable_mosaic.version = 11 : i64} {
  func.func @_qz_kernel(%arg0: i32, %arg1: memref<2x1568xbf16, #tpu.memory_space<vmem>>, %arg2: memref<1568x16xbf16, #tpu.memory_space<vmem>>, %arg3: memref<1x16xf32, #tpu.memory_space<vmem>>, %arg4: memref<1568x16xbf16, #tpu.memory_space<vmem>>, %arg5: memref<1x16xf32, #tpu.memory_space<vmem>>, %arg6: memref<2x16xf32, #tpu.memory_space<vmem>>, %arg7: memref<16x1568xbf16, #tpu.memory_space<vmem>>, %arg8: memref<1x1568xf32, #tpu.memory_space<vmem>>, %arg9: memref<2x16xf32, #tpu.memory_space<vmem>>, %arg10: memref<2x16xf32, #tpu.memory_space<vmem>>, %arg11: memref<2x1568xbf16, #tpu.memory_space<vmem>>) attributes {dimension_semantics = [#tpu.dimension_semantics<parallel>], iteration_bounds = array<i64: 1>, scalar_prefetch = 0 : i64, scratch_operands = 0 : i64, tpu.core_type = #tpu.core_type<tc>, window_params = [{transform_indices = @transform_0, window_bounds = array<i64: 2, 1568>}, {pipeline_mode = #tpu.pipeline_mode<synchronous>, transform_indices = @transform_1, window_bounds = array<i64: 1568, 16>}, {pipeline_mode = #tpu.pipeline_mode<synchronous>, transform_indices = @transform_2, window_bounds = array<i64: 1, 16>}, {pipeline_mode = #tpu.pipeline_mode<synchronous>, transform_indices = @transform_3, window_bounds = array<i64: 1568, 16>}, {pipeline_mode = #tpu.pipeline_mode<synchronous>, transform_indices = @transform_4, window_bounds = array<i64: 1, 16>}, {transform_indices = @transform_5, window_bounds = array<i64: 2, 16>}, {pipeline_mode = #tpu.pipeline_mode<synchronous>, transform_indices = @transform_6, window_bounds = array<i64: 16, 1568>}, {pipeline_mode = #tpu.pipeline_mode<synchronous>, transform_indices = @transform_7, window_bounds = array<i64: 1, 1568>}, {transform_indices = @transform_8, window_bounds = array<i64: 2, 16>}, {transform_indices = @transform_9, window_bounds = array<i64: 2, 16>}, {transform_indices = @transform_10, window_bounds = array<i64: 2, 1568>}]} {
    %c0 = arith.constant 0 : index
    %c0_0 = arith.constant 0 : index
    %0 = vector.load %arg1[%c0, %c0_0] : memref<2x1568xbf16, #tpu.memory_space<vmem>>, vector<2x1568xbf16>
    %c0_1 = arith.constant 0 : index
    %c0_2 = arith.constant 0 : index
    %1 = vector.load %arg2[%c0_1, %c0_2] : memref<1568x16xbf16, #tpu.memory_space<vmem>>, vector<1568x16xbf16>
    %cst = arith.constant dense<0.000000e+00> : vector<2x16xf32>
    %2 = tpu.matmul %0, %1, %cst {dimension_numbers = #tpu.dot_dimension_numbers<[1], [0], [0], [1], [0, 0, 1, 1], [], []>} : vector<2x1568xbf16>, vector<1568x16xbf16>, vector<2x16xf32> -> vector<2x16xf32>
    %c0_3 = arith.constant 0 : index
    %c0_4 = arith.constant 0 : index
    %3 = vector.load %arg3[%c0_3, %c0_4] : memref<1x16xf32, #tpu.memory_space<vmem>>, vector<1x16xf32>
    %4 = vector.broadcast %3 : vector<1x16xf32> to vector<2x16xf32>
    %5 = arith.addf %2, %4 : vector<2x16xf32>
    %c0_5 = arith.constant 0 : index
    %c0_6 = arith.constant 0 : index
    %6 = vector.load %arg4[%c0_5, %c0_6] : memref<1568x16xbf16, #tpu.memory_space<vmem>>, vector<1568x16xbf16>
    %cst_7 = arith.constant dense<0.000000e+00> : vector<2x16xf32>
    %7 = tpu.matmul %0, %6, %cst_7 {dimension_numbers = #tpu.dot_dimension_numbers<[1], [0], [0], [1], [0, 0, 1, 1], [], []>} : vector<2x1568xbf16>, vector<1568x16xbf16>, vector<2x16xf32> -> vector<2x16xf32>
    %c0_8 = arith.constant 0 : index
    %c0_9 = arith.constant 0 : index
    %8 = vector.load %arg5[%c0_8, %c0_9] : memref<1x16xf32, #tpu.memory_space<vmem>>, vector<1x16xf32>
    %9 = vector.broadcast %8 : vector<1x16xf32> to vector<2x16xf32>
    %10 = arith.addf %7, %9 : vector<2x16xf32>
    %cst_10 = arith.constant 0.000000e+00 : f32
    %11 = vector.broadcast %cst_10 : f32 to vector<2x16xf32>
    %12 = arith.maximumf %10, %11 : vector<2x16xf32>
    %13 = math.absf %10 : vector<2x16xf32>
    %cst_11 = arith.constant 0.000000e+00 : f32
    %14 = vector.broadcast %cst_11 : f32 to vector<2x16xf32>
    %15 = arith.subf %14, %13 : vector<2x16xf32>
    %16 = math.exp %15 : vector<2x16xf32>
    %cst_12 = arith.constant 1.000000e+00 : f32
    %17 = vector.broadcast %cst_12 : f32 to vector<2x16xf32>
    %18 = arith.addf %17, %16 : vector<2x16xf32>
    %19 = math.log %18 : vector<2x16xf32>
    %20 = arith.addf %12, %19 : vector<2x16xf32>
    %c0_13 = arith.constant 0 : index
    %c0_14 = arith.constant 0 : index
    %21 = vector.load %arg6[%c0_13, %c0_14] : memref<2x16xf32, #tpu.memory_space<vmem>>, vector<2x16xf32>
    %22 = arith.mulf %21, %20 : vector<2x16xf32>
    %23 = arith.addf %5, %22 : vector<2x16xf32>
    %24 = arith.truncf %23 : vector<2x16xf32> to vector<2x16xbf16>
    %c0_15 = arith.constant 0 : index
    %c0_16 = arith.constant 0 : index
    %25 = vector.load %arg7[%c0_15, %c0_16] : memref<16x1568xbf16, #tpu.memory_space<vmem>>, vector<16x1568xbf16>
    %cst_17 = arith.constant dense<0.000000e+00> : vector<2x1568xf32>
    %26 = tpu.matmul %24, %25, %cst_17 {dimension_numbers = #tpu.dot_dimension_numbers<[1], [0], [0], [1], [0, 0, 1, 1], [], []>} : vector<2x16xbf16>, vector<16x1568xbf16>, vector<2x1568xf32> -> vector<2x1568xf32>
    %c0_18 = arith.constant 0 : index
    %c0_19 = arith.constant 0 : index
    %27 = vector.load %arg8[%c0_18, %c0_19] : memref<1x1568xf32, #tpu.memory_space<vmem>>, vector<1x1568xf32>
    %28 = vector.broadcast %27 : vector<1x1568xf32> to vector<2x1568xf32>
    %29 = arith.addf %26, %28 : vector<2x1568xf32>
    %c0_20 = arith.constant 0 : index
    %c0_21 = arith.constant 0 : index
    %30 = vector.load %arg9[%c0_20, %c0_21] : memref<2x16xf32, #tpu.memory_space<vmem>>, vector<2x16xf32>
    tpu.vector_store %arg9[%c0_20, %c0_21], %5 {strides = array<i32>} : memref<2x16xf32, #tpu.memory_space<vmem>>, vector<2x16xf32>,
    %c0_22 = arith.constant 0 : index
    %c0_23 = arith.constant 0 : index
    %31 = vector.load %arg10[%c0_22, %c0_23] : memref<2x16xf32, #tpu.memory_space<vmem>>, vector<2x16xf32>
    tpu.vector_store %arg10[%c0_22, %c0_23], %20 {strides = array<i32>} : memref<2x16xf32, #tpu.memory_space<vmem>>, vector<2x16xf32>,
    %32 = arith.truncf %29 : vector<2x1568xf32> to vector<2x1568xbf16>
    %c0_24 = arith.constant 0 : index
    %c0_25 = arith.constant 0 : index
    %33 = vector.load %arg11[%c0_24, %c0_25] : memref<2x1568xbf16, #tpu.memory_space<vmem>>, vector<2x1568xbf16>
    tpu.vector_store %arg11[%c0_24, %c0_25], %32 {strides = array<i32>} : memref<2x1568xbf16, #tpu.memory_space<vmem>>, vector<2x1568xbf16>,
    return
  }
  func.func @transform_0(%arg0: i32) -> (i32, i32) {
    %c0_i32 = arith.constant 0 : i32
    %c0_i32_0 = arith.constant 0 : i32
    return %arg0, %c0_i32 : i32, i32
  }
  func.func @transform_1(%arg0: i32) -> (i32, i32) {
    %c0_i32 = arith.constant 0 : i32
    %c0_i32_0 = arith.constant 0 : i32
    %c0_i32_1 = arith.constant 0 : i32
    return %c0_i32, %c0_i32_0 : i32, i32
  }
  func.func @transform_2(%arg0: i32) -> (i32, i32) {
    %c0_i32 = arith.constant 0 : i32
    %c0_i32_0 = arith.constant 0 : i32
    %c0_i32_1 = arith.constant 0 : i32
    return %c0_i32, %c0_i32_0 : i32, i32
  }
  func.func @transform_3(%arg0: i32) -> (i32, i32) {
    %c0_i32 = arith.constant 0 : i32
    %c0_i32_0 = arith.constant 0 : i32
    %c0_i32_1 = arith.constant 0 : i32
    return %c0_i32, %c0_i32_0 : i32, i32
  }
  func.func @transform_4(%arg0: i32) -> (i32, i32) {
    %c0_i32 = arith.constant 0 : i32
    %c0_i32_0 = arith.constant 0 : i32
    %c0_i32_1 = arith.constant 0 : i32
    return %c0_i32, %c0_i32_0 : i32, i32
  }
  func.func @transform_5(%arg0: i32) -> (i32, i32) {
    %c0_i32 = arith.constant 0 : i32
    %c0_i32_0 = arith.constant 0 : i32
    return %arg0, %c0_i32 : i32, i32
  }
  func.func @transform_6(%arg0: i32) -> (i32, i32) {
    %c0_i32 = arith.constant 0 : i32
    %c0_i32_0 = arith.constant 0 : i32
    %c0_i32_1 = arith.constant 0 : i32
    return %c0_i32, %c0_i32_0 : i32, i32
  }
  func.func @transform_7(%arg0: i32) -> (i32, i32) {
    %c0_i32 = arith.constant 0 : i32
    %c0_i32_0 = arith.constant 0 : i32
    %c0_i32_1 = arith.constant 0 : i32
    return %c0_i32, %c0_i32_0 : i32, i32
  }
  func.func @transform_8(%arg0: i32) -> (i32, i32) {
    %c0_i32 = arith.constant 0 : i32
    %c0_i32_0 = arith.constant 0 : i32
    return %arg0, %c0_i32 : i32, i32
  }
  func.func @transform_9(%arg0: i32) -> (i32, i32) {
    %c0_i32 = arith.constant 0 : i32
    %c0_i32_0 = arith.constant 0 : i32
    return %arg0, %c0_i32 : i32, i32
  }
  func.func @transform_10(%arg0: i32) -> (i32, i32) {
    %c0_i32 = arith.constant 0 : i32
    %c0_i32_0 = arith.constant 0 : i32
    return %arg0, %c0_i32 : i32, i32
  }
}

module attributes {stable_mosaic.version = 11 : i64} {
  func.func @_linear_kernel(%arg0: i32, %arg1: memref<98x288xbf16, #tpu.memory_space<vmem>>, %arg2: memref<288x64xbf16, #tpu.memory_space<vmem>>, %arg3: memref<1x64xf32, #tpu.memory_space<vmem>>, %arg4: memref<98x64xbf16, #tpu.memory_space<vmem>>) attributes {dimension_semantics = [#tpu.dimension_semantics<parallel>], iteration_bounds = array<i64: 1>, scalar_prefetch = 0 : i64, scratch_operands = 0 : i64, tpu.core_type = #tpu.core_type<tc>, window_params = [{transform_indices = @transform_0, window_bounds = array<i64: 98, 288>}, {pipeline_mode = #tpu.pipeline_mode<synchronous>, transform_indices = @transform_1, window_bounds = array<i64: 288, 64>}, {pipeline_mode = #tpu.pipeline_mode<synchronous>, transform_indices = @transform_2, window_bounds = array<i64: 1, 64>}, {transform_indices = @transform_3, window_bounds = array<i64: 98, 64>}]} {
    %c0 = arith.constant 0 : index
    %c0_0 = arith.constant 0 : index
    %0 = vector.load %arg1[%c0, %c0_0] : memref<98x288xbf16, #tpu.memory_space<vmem>>, vector<98x288xbf16>
    %c0_1 = arith.constant 0 : index
    %c0_2 = arith.constant 0 : index
    %1 = vector.load %arg2[%c0_1, %c0_2] : memref<288x64xbf16, #tpu.memory_space<vmem>>, vector<288x64xbf16>
    %cst = arith.constant dense<0.000000e+00> : vector<98x64xf32>
    %2 = tpu.matmul %0, %1, %cst {dimension_numbers = #tpu.dot_dimension_numbers<[1], [0], [0], [1], [0, 0, 1, 1], [], []>} : vector<98x288xbf16>, vector<288x64xbf16>, vector<98x64xf32> -> vector<98x64xf32>
    %c0_3 = arith.constant 0 : index
    %c0_4 = arith.constant 0 : index
    %3 = vector.load %arg3[%c0_3, %c0_4] : memref<1x64xf32, #tpu.memory_space<vmem>>, vector<1x64xf32>
    %4 = vector.broadcast %3 : vector<1x64xf32> to vector<98x64xf32>
    %5 = arith.addf %2, %4 : vector<98x64xf32>
    %cst_5 = arith.constant 0.000000e+00 : f32
    %6 = vector.broadcast %cst_5 : f32 to vector<98x64xf32>
    %7 = arith.maximumf %5, %6 : vector<98x64xf32>
    %8 = arith.truncf %7 : vector<98x64xf32> to vector<98x64xbf16>
    %c0_6 = arith.constant 0 : index
    %c0_7 = arith.constant 0 : index
    %9 = vector.load %arg4[%c0_6, %c0_7] : memref<98x64xbf16, #tpu.memory_space<vmem>>, vector<98x64xbf16>
    tpu.vector_store %arg4[%c0_6, %c0_7], %8 {strides = array<i32>} : memref<98x64xbf16, #tpu.memory_space<vmem>>, vector<98x64xbf16>,
    return
  }
  func.func @transform_0(%arg0: i32) -> (i32, i32) {
    %c0_i32 = arith.constant 0 : i32
    %c0_i32_0 = arith.constant 0 : i32
    return %arg0, %c0_i32 : i32, i32
  }
  func.func @transform_1(%arg0: i32) -> (i32, i32) {
    %c0_i32 = arith.constant 0 : i32
    %c0_i32_0 = arith.constant 0 : i32
    %c0_i32_1 = arith.constant 0 : i32
    return %c0_i32, %c0_i32_0 : i32, i32
  }
  func.func @transform_2(%arg0: i32) -> (i32, i32) {
    %c0_i32 = arith.constant 0 : i32
    %c0_i32_0 = arith.constant 0 : i32
    %c0_i32_1 = arith.constant 0 : i32
    return %c0_i32, %c0_i32_0 : i32, i32
  }
  func.func @transform_3(%arg0: i32) -> (i32, i32) {
    %c0_i32 = arith.constant 0 : i32
    %c0_i32_0 = arith.constant 0 : i32
    return %arg0, %c0_i32 : i32, i32
  }
}

module attributes {stable_mosaic.version = 11 : i64} {
  func.func @_heads_elbo_kernel(%arg0: i32, %arg1: memref<392x144xbf16, #tpu.memory_space<vmem>>, %arg2: memref<144x4xbf16, #tpu.memory_space<vmem>>, %arg3: memref<1x4xf32, #tpu.memory_space<vmem>>, %arg4: memref<2x392xf32, #tpu.memory_space<vmem>>, %arg5: memref<2x3136xbf16, #tpu.memory_space<vmem>>, %arg6: memref<3136x2xbf16, #tpu.memory_space<vmem>>, %arg7: memref<1x2xf32, #tpu.memory_space<vmem>>, %arg8: memref<392x4xbf16, #tpu.memory_space<vmem>>, %arg9: memref<2x2xf32, #tpu.memory_space<vmem>>, %arg10: memref<2x16xf32, #tpu.memory_space<vmem>>, %arg11: memref<2x16xf32, #tpu.memory_space<vmem>>, %arg12: memref<2x1xf32, #tpu.memory_space<vmem>>) attributes {dimension_semantics = [#tpu.dimension_semantics<parallel>], iteration_bounds = array<i64: 1>, scalar_prefetch = 0 : i64, scratch_operands = 0 : i64, tpu.core_type = #tpu.core_type<tc>, window_params = [{transform_indices = @transform_0, window_bounds = array<i64: 392, 144>}, {pipeline_mode = #tpu.pipeline_mode<synchronous>, transform_indices = @transform_1, window_bounds = array<i64: 144, 4>}, {pipeline_mode = #tpu.pipeline_mode<synchronous>, transform_indices = @transform_2, window_bounds = array<i64: 1, 4>}, {pipeline_mode = #tpu.pipeline_mode<synchronous>, transform_indices = @transform_3, window_bounds = array<i64: 2, 392>}, {transform_indices = @transform_4, window_bounds = array<i64: 2, 3136>}, {pipeline_mode = #tpu.pipeline_mode<synchronous>, transform_indices = @transform_5, window_bounds = array<i64: 3136, 2>}, {pipeline_mode = #tpu.pipeline_mode<synchronous>, transform_indices = @transform_6, window_bounds = array<i64: 1, 2>}, {transform_indices = @transform_7, window_bounds = array<i64: 392, 4>}, {transform_indices = @transform_8, window_bounds = array<i64: 2, 2>}, {transform_indices = @transform_9, window_bounds = array<i64: 2, 16>}, {transform_indices = @transform_10, window_bounds = array<i64: 2, 16>}, {transform_indices = @transform_11, window_bounds = array<i64: 2, 1>}]} {
    %c0 = arith.constant 0 : index
    %c0_0 = arith.constant 0 : index
    %0 = vector.load %arg1[%c0, %c0_0] : memref<392x144xbf16, #tpu.memory_space<vmem>>, vector<392x144xbf16>
    %c0_1 = arith.constant 0 : index
    %c0_2 = arith.constant 0 : index
    %1 = vector.load %arg2[%c0_1, %c0_2] : memref<144x4xbf16, #tpu.memory_space<vmem>>, vector<144x4xbf16>
    %cst = arith.constant dense<0.000000e+00> : vector<392x4xf32>
    %2 = tpu.matmul %0, %1, %cst {dimension_numbers = #tpu.dot_dimension_numbers<[1], [0], [0], [1], [0, 0, 1, 1], [], []>} : vector<392x144xbf16>, vector<144x4xbf16>, vector<392x4xf32> -> vector<392x4xf32>
    %c0_3 = arith.constant 0 : index
    %c0_4 = arith.constant 0 : index
    %3 = vector.load %arg3[%c0_3, %c0_4] : memref<1x4xf32, #tpu.memory_space<vmem>>, vector<1x4xf32>
    %4 = vector.broadcast %3 : vector<1x4xf32> to vector<392x4xf32>
    %5 = arith.addf %2, %4 : vector<392x4xf32>
    %c0_5 = arith.constant 0 : index
    %c0_6 = arith.constant 0 : index
    %6 = vector.load %arg8[%c0_5, %c0_6] : memref<392x4xbf16, #tpu.memory_space<vmem>>, vector<392x4xbf16>
    %7 = arith.extf %6 : vector<392x4xbf16> to vector<392x4xf32>
    %cst_7 = arith.constant 0.000000e+00 : f32
    %8 = vector.broadcast %cst_7 : f32 to vector<392x4xf32>
    %9 = arith.maximumf %5, %8 : vector<392x4xf32>
    %10 = math.absf %5 : vector<392x4xf32>
    %cst_8 = arith.constant 0.000000e+00 : f32
    %11 = vector.broadcast %cst_8 : f32 to vector<392x4xf32>
    %12 = arith.subf %11, %10 : vector<392x4xf32>
    %13 = math.exp %12 : vector<392x4xf32>
    %cst_9 = arith.constant 1.000000e+00 : f32
    %14 = vector.broadcast %cst_9 : f32 to vector<392x4xf32>
    %15 = arith.addf %14, %13 : vector<392x4xf32>
    %16 = math.log %15 : vector<392x4xf32>
    %17 = arith.addf %9, %16 : vector<392x4xf32>
    %18 = arith.mulf %7, %5 : vector<392x4xf32>
    %19 = arith.subf %18, %17 : vector<392x4xf32>
    %c0_10 = arith.constant 0 : index
    %c0_11 = arith.constant 0 : index
    %20 = vector.load %arg4[%c0_10, %c0_11] : memref<2x392xf32, #tpu.memory_space<vmem>>, vector<2x392xf32>
    %cst_12 = arith.constant dense<0.000000e+00> : vector<2x4xf32>
    %21 = tpu.matmul %20, %19, %cst_12 {dimension_numbers = #tpu.dot_dimension_numbers<[1], [0], [0], [1], [0, 0, 1, 1], [], []>} : vector<2x392xf32>, vector<392x4xf32>, vector<2x4xf32> -> vector<2x4xf32>
    %cst_13 = arith.constant dense<0.000000e+00> : vector<2xf32>
    %22 = vector.multi_reduction <add>, %21, %cst_13 [1] : vector<2x4xf32> to vector<2xf32>
    %23 = vector.shape_cast %22 : vector<2xf32> to vector<2x1xf32>
    %c0_14 = arith.constant 0 : index
    %c0_15 = arith.constant 0 : index
    %24 = vector.load %arg5[%c0_14, %c0_15] : memref<2x3136xbf16, #tpu.memory_space<vmem>>, vector<2x3136xbf16>
    %c0_16 = arith.constant 0 : index
    %c0_17 = arith.constant 0 : index
    %25 = vector.load %arg6[%c0_16, %c0_17] : memref<3136x2xbf16, #tpu.memory_space<vmem>>, vector<3136x2xbf16>
    %cst_18 = arith.constant dense<0.000000e+00> : vector<2x2xf32>
    %26 = tpu.matmul %24, %25, %cst_18 {dimension_numbers = #tpu.dot_dimension_numbers<[1], [0], [0], [1], [0, 0, 1, 1], [], []>} : vector<2x3136xbf16>, vector<3136x2xbf16>, vector<2x2xf32> -> vector<2x2xf32>
    %c0_19 = arith.constant 0 : index
    %c0_20 = arith.constant 0 : index
    %27 = vector.load %arg7[%c0_19, %c0_20] : memref<1x2xf32, #tpu.memory_space<vmem>>, vector<1x2xf32>
    %28 = vector.broadcast %27 : vector<1x2xf32> to vector<2x2xf32>
    %29 = arith.addf %26, %28 : vector<2x2xf32>
    %cst_21 = arith.constant dense<0xFF800000> : vector<2xf32>
    %30 = vector.multi_reduction <maximumf>, %29, %cst_21 [1] : vector<2x2xf32> to vector<2xf32>
    %31 = vector.shape_cast %30 : vector<2xf32> to vector<2x1xf32>
    %32 = vector.broadcast %31 : vector<2x1xf32> to vector<2x2xf32>
    %33 = arith.subf %29, %32 : vector<2x2xf32>
    %34 = math.exp %33 : vector<2x2xf32>
    %cst_22 = arith.constant dense<0.000000e+00> : vector<2xf32>
    %35 = vector.multi_reduction <add>, %34, %cst_22 [1] : vector<2x2xf32> to vector<2xf32>
    %36 = vector.shape_cast %35 : vector<2xf32> to vector<2x1xf32>
    %37 = math.log %36 : vector<2x1xf32>
    %38 = arith.addf %31, %37 : vector<2x1xf32>
    %c0_23 = arith.constant 0 : index
    %c0_24 = arith.constant 0 : index
    %39 = vector.load %arg9[%c0_23, %c0_24] : memref<2x2xf32, #tpu.memory_space<vmem>>, vector<2x2xf32>
    %40 = vector.broadcast %38 : vector<2x1xf32> to vector<2x2xf32>
    %41 = arith.subf %29, %40 : vector<2x2xf32>
    %42 = arith.mulf %39, %41 : vector<2x2xf32>
    %cst_25 = arith.constant dense<0.000000e+00> : vector<2xf32>
    %43 = vector.multi_reduction <add>, %42, %cst_25 [1] : vector<2x2xf32> to vector<2xf32>
    %44 = vector.shape_cast %43 : vector<2xf32> to vector<2x1xf32>
    %c0_26 = arith.constant 0 : index
    %c0_27 = arith.constant 0 : index
    %45 = vector.load %arg10[%c0_26, %c0_27] : memref<2x16xf32, #tpu.memory_space<vmem>>, vector<2x16xf32>
    %c0_28 = arith.constant 0 : index
    %c0_29 = arith.constant 0 : index
    %46 = vector.load %arg11[%c0_28, %c0_29] : memref<2x16xf32, #tpu.memory_space<vmem>>, vector<2x16xf32>
    %47 = math.log %46 : vector<2x16xf32>
    %cst_30 = arith.constant 0.000000e+00 : f32
    %48 = vector.broadcast %cst_30 : f32 to vector<2x16xf32>
    %49 = arith.subf %48, %47 : vector<2x16xf32>
    %50 = arith.mulf %46, %46 : vector<2x16xf32>
    %51 = arith.mulf %45, %45 : vector<2x16xf32>
    %52 = arith.addf %50, %51 : vector<2x16xf32>
    %cst_31 = arith.constant 5.000000e-01 : f32
    %53 = vector.broadcast %cst_31 : f32 to vector<2x16xf32>
    %54 = arith.mulf %53, %52 : vector<2x16xf32>
    %55 = arith.addf %49, %54 : vector<2x16xf32>
    %cst_32 = arith.constant 5.000000e-01 : f32
    %56 = vector.broadcast %cst_32 : f32 to vector<2x16xf32>
    %57 = arith.subf %55, %56 : vector<2x16xf32>
    %cst_33 = arith.constant dense<0.000000e+00> : vector<2xf32>
    %58 = vector.multi_reduction <add>, %57, %cst_33 [1] : vector<2x16xf32> to vector<2xf32>
    %59 = vector.shape_cast %58 : vector<2xf32> to vector<2x1xf32>
    %60 = arith.addf %23, %44 : vector<2x1xf32>
    %61 = arith.subf %60, %59 : vector<2x1xf32>
    %c0_34 = arith.constant 0 : index
    %c0_35 = arith.constant 0 : index
    %62 = vector.load %arg12[%c0_34, %c0_35] : memref<2x1xf32, #tpu.memory_space<vmem>>, vector<2x1xf32>
    tpu.vector_store %arg12[%c0_34, %c0_35], %61 {strides = array<i32>} : memref<2x1xf32, #tpu.memory_space<vmem>>, vector<2x1xf32>,
    return
  }
  func.func @transform_0(%arg0: i32) -> (i32, i32) {
    %c0_i32 = arith.constant 0 : i32
    %c0_i32_0 = arith.constant 0 : i32
    return %arg0, %c0_i32 : i32, i32
  }
  func.func @transform_1(%arg0: i32) -> (i32, i32) {
    %c0_i32 = arith.constant 0 : i32
    %c0_i32_0 = arith.constant 0 : i32
    %c0_i32_1 = arith.constant 0 : i32
    return %c0_i32, %c0_i32_0 : i32, i32
  }
  func.func @transform_2(%arg0: i32) -> (i32, i32) {
    %c0_i32 = arith.constant 0 : i32
    %c0_i32_0 = arith.constant 0 : i32
    %c0_i32_1 = arith.constant 0 : i32
    return %c0_i32, %c0_i32_0 : i32, i32
  }
  func.func @transform_3(%arg0: i32) -> (i32, i32) {
    %c0_i32 = arith.constant 0 : i32
    %c0_i32_0 = arith.constant 0 : i32
    %c0_i32_1 = arith.constant 0 : i32
    return %c0_i32, %c0_i32_0 : i32, i32
  }
  func.func @transform_4(%arg0: i32) -> (i32, i32) {
    %c0_i32 = arith.constant 0 : i32
    %c0_i32_0 = arith.constant 0 : i32
    return %arg0, %c0_i32 : i32, i32
  }
  func.func @transform_5(%arg0: i32) -> (i32, i32) {
    %c0_i32 = arith.constant 0 : i32
    %c0_i32_0 = arith.constant 0 : i32
    %c0_i32_1 = arith.constant 0 : i32
    return %c0_i32, %c0_i32_0 : i32, i32
  }
  func.func @transform_6(%arg0: i32) -> (i32, i32) {
    %c0_i32 = arith.constant 0 : i32
    %c0_i32_0 = arith.constant 0 : i32
    %c0_i32_1 = arith.constant 0 : i32
    return %c0_i32, %c0_i32_0 : i32, i32
  }
  func.func @transform_7(%arg0: i32) -> (i32, i32) {
    %c0_i32 = arith.constant 0 : i32
    %c0_i32_0 = arith.constant 0 : i32
    return %arg0, %c0_i32 : i32, i32
  }
  func.func @transform_8(%arg0: i32) -> (i32, i32) {
    %c0_i32 = arith.constant 0 : i32
    %c0_i32_0 = arith.constant 0 : i32
    return %arg0, %c0_i32 : i32, i32
  }
  func.func @transform_9(%arg0: i32) -> (i32, i32) {
    %c0_i32 = arith.constant 0 : i32
    %c0_i32_0 = arith.constant 0 : i32
    return %arg0, %c0_i32 : i32, i32
  }
  func.func @transform_10(%arg0: i32) -> (i32, i32) {
    %c0_i32 = arith.constant 0 : i32
    %c0_i32_0 = arith.constant 0 : i32
    return %arg0, %c0_i32 : i32, i32
  }
  func.func @transform_11(%arg0: i32) -> (i32, i32) {
    %c0_i32 = arith.constant 0 : i32
    %c0_i32_0 = arith.constant 0 : i32
    return %arg0, %c0_i32 : i32, i32
  }
}

</mosaic_0001>

<bundles_post_ra>
// kernel: vae_forward.5
= control target key start
LH: loop header
LB: loop body
LE: loop exit
PB: predicated region body
PF: predicated region fallthrough
CT: control target
= control target key end

     0   :  { %s1237_s15 = smov 0   ;;  %s1239_s16 = smov 0   ;;  %s1531_s0 = inlined_call_operand.vmem [shape: bf16[392,16], index: 0, kind: input, shape index: {}]   ;;  %s1532_s1 = inlined_call_operand.vmem [shape: bf16[16,16], index: 1, kind: input, shape index: {}]   ;;  %s1533_s2 = inlined_call_operand.vmem [shape: f32[1,16], index: 2, kind: input, shape index: {}]   ;;  %s1534_s3 = inlined_call_operand.vmem [shape: f32[392,16], index: 3, kind: input, shape index: {}]   ;;  %s1535_s4 = inlined_call_operand.vmem [shape: bf16[392,16], index: 4, kind: output, shape index: {}]  }
   0x1   :  { %s1241_s17 = smov 0  }
   0x2 LB: > { %s1250_s18 = sadd.s32 4294967295, %s1178_s17   ;;  %s1252_s19 = sadd.s32 1, %s1178_s17   ;;  %s1178_s17 = sphi %s1241_s17, %s1544_s17   ;;  %s1174_s16 = sphi %s1239_s16, %s1543_s16   ;;  %s1170_s15 = sphi %s1237_s15, %s1542_s15  }
   0x3   : > { %s112_s20 = ssub.s32 %s1178_s17, %s1252_s19  ;;  %s115_s21 = sadd.s32 1, %s1174_s16 }
   0x4   : > { %p113_p0 = scmp.eq.s32.totalorder %s112_s20, 0  ;;  %p125_p1 = scmp.ne.s32.totalorder %s1174_s16, %s1170_s15 }
   0x5   : > { %p126_p2 = scmp.eq.s32.totalorder %s1250_s18, 1  ;;  %p930_p3 = scmp.ge.s32.totalorder %s1178_s17, 1 }
   0x6   : > { %s1260_s22 = scalar_select %p113_p0, %s1174_s16, %s115_s21  }
   0x7   : > { %p1262_p4 = por %p126_p2, %p125_p1  ;;  %p190_p5 = scmp.lt.s32.totalorder %s1178_s17, 3 }
   0x9   : > { %p191_p6 = pnand %p930_p3, %p190_p5 }
   0xa   : > { %s1270_s26 = smul.u32 (!%p191_p6), 25, %s1250_s18  ;;  %s225_s12 = sand.u32 (!%p191_p6), 1, %s1170_s15  }
   0xb   : > { %194 = sbr.rel (%p191_p6) target bundleno = 285 (0x11d), region = 36 }
   0xc   : > { %p233_p7 = scmp.lt.s32.totalorder (!%p191_p6), %s1270_s26, 48  ;;  %s1027_s13 = smul.u32 (!%p191_p6), 100, %s225_s12 }
   0xe   : > { %s1313_s14 = scalar_lea.vmem (!%p191_p6), [#allocation2], %s1027_s13  }
  0x10   : > { %v1022_v0 = vld [vmem:[%s1532_s1] sm:$0xff]  ;;  %s1274_s27 = scalar_select %p233_p7, %s1270_s26, 48  ;;  %vm362_vm0 = vcmask 130048   ;;  %vm575_vm1 = vcmask 125952  }
  0x11   : > { %409 = vmatpush.bf16.msra.mxu0 %v1022_v0  ;;  %1024 = vmatpush.bf16.msra.mxu1 %v1022_v0  ;;  %v1302_v16 = vld [vmem:[%s1533_s2] ss:$0 sm:$0xff]  ;;  %s609_s15 = ssub.s32 (%p1262_p4), 49, %s1270_s26  ;;  %s1023_s17 = smul.u32 (%p1262_p4), 100, %s1250_s18 }
  0x12   : > { %1026 = vmatpush.bf16.msra.mxu3 %v1022_v0  ;;  %1025 = vmatpush.bf16.msra.mxu2 %v1022_v0  ;;  %s931_s28 = sshll.u32 %s1274_s27, 2  ;;  %s932_s6 = sshll.u32 %s1274_s27, 3 }
  0x13   : > { %s236_s5 = scalar_lea.vmem %s1531_s0, %s931_s28  ;;  %s1297_s9 = scalar_lea.vmem %s1534_s3, %s932_s6 }
  0x14   : > { %v1010_v1 = vld [vmem:[%s236_s5] sm:$0xff]  ;;  %v1019_v3 = vld [vmem:[%s236_s5 + $0x48] sm:$0xff]  ;;  %v1020_v7 = vld [vmem:[%s236_s5 + $0x50] sm:$0xff]  ;;  %p610_p8 = scmp.lt.s32.totalorder (%p1262_p4), %s609_s15, 25  ;;  %s1414_s24 = scalar_lea.vmem (%p1262_p4), %s1535_s4, %s1023_s17  }
  0x15   : > { %v1014_v2 = vld [vmem:[%s236_s5 + $0x20] sm:$0xff]  ;;  %985 = vmatmul.msk.bf16.vlgmr.msra.gmra.mxu0 %vm362_vm0, %v1010_v1  ;;  %994 = vmatmul.msk.bf16.vlgmr.msra.gmra.mxu3 %vm362_vm0, %v1019_v3  ;;  %v1011_v5 = vld [vmem:[%s236_s5 + $0x8] sm:$0xff]  ;;  %v1012_v8 = vld [vmem:[%s236_s5 + $0x10] sm:$0xff] }
  0x16   : > { %989 = vmatmul.msk.bf16.vlgmr.msra.gmra.mxu1 %vm362_vm0, %v1014_v2  ;;  %v1018_v4 = vld [vmem:[%s236_s5 + $0x40] sm:$0xff]  ;;  %v1015_v6 = vld [vmem:[%s236_s5 + $0x28] sm:$0xff]  ;;  %v1016_v9 = vld [vmem:[%s236_s5 + $0x30] sm:$0xff] }
  0x17   : > { %993 = vmatmul.msk.bf16.vlgmr.msra.gmra.mxu2 %vm362_vm0, %v1018_v4  ;;  %v1021_v10 = vld [vmem:[%s236_s5 + $0x58] sm:$0xff]  ;;  %v286_v11 = vld [vmem:[%s236_s5 + $0x60] sm:$0xf]  ;;  %v493_v30 = vld [vmem:[%s1297_s9 + $0x90] sm:$0xff] }
  0x18   : > { %v342_v12 = vunpack.c.l.b16 %v286_v11  ;;  %v1013_v13 = vld [vmem:[%s236_s5 + $0x18] sm:$0xff]  ;;  %v475_v18 = vld [vmem:[%s1297_s9] sm:$0xff]  ;;  %v476_v33 = vld [vmem:[%s1297_s9 + $0x8] sm:$0xff] }
  0x19   : > { %v1017_v14 = vld [vmem:[%s236_s5 + $0x38] sm:$0xff]  ;;  %v483_v20 = vld [vmem:[%s1297_s9 + $0x40] sm:$0xff]  ;;  %v484_v35 = vld [vmem:[%s1297_s9 + $0x48] sm:$0xff] }
  0x1a   : > { %v355_v15 = vpack.c.b16 %v342_v12, %v342_v12  ;;  %v494_v49 = vld [vmem:[%s1297_s9 + $0x98] sm:$0xff]  ;;  %v477_v52 = vld [vmem:[%s1297_s9 + $0x10] sm:$0xff]  ;;  %v491_v60 = vld [vmem:[%s1297_s9 + $0x80] sm:$0xff] }
  0x1b   : > { %v485_v54 = vld [vmem:[%s1297_s9 + $0x50] sm:$0xff]  ;;  %v492_v0 = vld [vmem:[%s1297_s9 + $0x88] sm:$0xff]  ;;  %v495_v12 = vld [vmem:[%s1297_s9 + $0xa0] sm:$0xff] }
  0x25   : > { %986 = vmatmul.msk.bf16.gmra.mxu0 %vm362_vm0, %v1011_v5  ;;  %995 = vmatmul.msk.bf16.gmra.mxu3 %vm362_vm0, %v1020_v7 }
  0x26   : > { %990 = vmatmul.msk.bf16.gmra.mxu1 %vm362_vm0, %v1015_v6 }
  0x35   : > { %987 = vmatmul.msk.bf16.gmra.mxu0 %vm362_vm0, %v1012_v8  ;;  %996 = vmatmul.msk.bf16.gmra.mxu3 %vm362_vm0, %v1021_v10 }
  0x36   : > { %991 = vmatmul.msk.bf16.gmra.mxu1 %vm362_vm0, %v1016_v9 }
  0x45   : > { %988 = vmatmul.msk.bf16.gmra.mxu0 %vm362_vm0, %v1013_v13  ;;  %997 = vmatmul.msk.bf16.gmra.mxu3 %vm362_vm0, %v355_v15  ;;  %v478_v15 = vld [vmem:[%s1297_s9 + $0x18] sm:$0xff] }
  0x46   : > { %992 = vmatmul.msk.bf16.gmra.mxu1 %vm362_vm0, %v1017_v14 }
  0x92   : > { %v411_v17 = vpop.f32.mrf.mxu0 }
  0x93   : > { %v431_v19 = vpop.f32.mrf.mxu1  ;;  %v412_v21 = vadd.f32 %v1302_v16, %v411_v17 }
  0x94   : > { %v432_v22 = vadd.f32 %v1302_v16, %v431_v19 }
  0x95   : > { %v500_v23 = vadd.f32 %v475_v18, %v412_v21  ;;  %v486_v18 = vld [vmem:[%s1297_s9 + $0x58] sm:$0xff] }
  0x96   : > { %v508_v24 = vadd.f32 %v483_v20, %v432_v22 }
  0x97   : > { %v525_v25 = vmax.f32 %v500_v23, 0.0 }
  0x98   : > { %v533_v26 = vmax.f32 %v508_v24, 0.0  ;;  %v456_v29 = vpop.f32.mrf.mxu3 }
  0x99   : > { %v550_v27 = vpack.c.bf16 %v525_v25, %v525_v25  ;;  %v457_v31 = vadd.f32 %v1302_v16, %v456_v29 }
  0x9a   : > { %v558_v28 = vpack.c.bf16 %v533_v26, %v533_v26  ;;  %v413_v32 = vpop.f32.mrf.mxu0  ;;  %v451_v38 = vpop.f32.mrf.mxu2 }
  0x9b   : > { %v433_v34 = vpop.f32.mrf.mxu1  ;;  %576 = vst.msk [vmem:[%s1313_s14] sm:$0xf] %vm575_vm1, %v550_v27  ;;  %v414_v36 = vadd.f32 %v1302_v16, %v413_v32  ;;  %v518_v39 = vadd.f32 %v493_v30, %v457_v31  ;;  %v452_v59 = vadd.f32 %v1302_v16, %v451_v38  ;;  %v487_v38 = vld [vmem:[%s1297_s9 + $0x60] sm:$0xff] }
  0x9c   : > { %v434_v37 = vadd.f32 %v1302_v16, %v433_v34  ;;  %584 = vst.msk [vmem:[%s1313_s14 + $0x20] sm:$0xf] %vm575_vm1, %v558_v28 }
  0x9d   : > { %v501_v40 = vadd.f32 %v476_v33, %v414_v36  ;;  %v543_v42 = vmax.f32 %v518_v39, 0.0  ;;  %v516_v2 = vadd.f32 %v491_v60, %v452_v59  ;;  %v496_v33 = vld [vmem:[%s1297_s9 + $0xa8] sm:$0xff]  ;;  %v479_v36 = vld [vmem:[%s1297_s9 + $0x20] sm:$0xff] }
  0x9e   : > { %v509_v41 = vadd.f32 %v484_v35, %v434_v37 }
  0x9f   : > { %v526_v43 = vmax.f32 %v501_v40, 0.0  ;;  %v568_v45 = vpack.c.bf16 %v543_v42, %v543_v42  ;;  %v541_v7 = vmax.f32 %v516_v2, 0.0 }
  0xa0   : > { %v534_v44 = vmax.f32 %v509_v41, 0.0  ;;  %v458_v48 = vpop.f32.mrf.mxu3 }
  0xa1   : > { %v551_v46 = vpack.c.bf16 %v526_v43, %v526_v43  ;;  %594 = vst.msk [vmem:[%s1313_s14 + $0x48] sm:$0xf] %vm575_vm1, %v568_v45  ;;  %v459_v50 = vadd.f32 %v1302_v16, %v458_v48  ;;  %v566_v19 = vpack.c.bf16 %v541_v7, %v541_v7 }
  0xa2   : > { %v559_v47 = vpack.c.bf16 %v534_v44, %v534_v44  ;;  %v416_v51 = vpop.f32.mrf.mxu0  ;;  %v453_v57 = vpop.f32.mrf.mxu2 }
  0xa3   : > { %v436_v53 = vpop.f32.mrf.mxu1  ;;  %577 = vst.msk [vmem:[%s1313_s14 + $0x4] sm:$0xf] %vm575_vm1, %v551_v46  ;;  %v417_v55 = vadd.f32 %v1302_v16, %v416_v51  ;;  %v519_v58 = vadd.f32 %v494_v49, %v459_v50  ;;  %v454_v61 = vadd.f32 %v1302_v16, %v453_v57  ;;  %v497_v51 = vld [vmem:[%s1297_s9 + $0xb0] sm:$0xff] }
  0xa4   : > { %v437_v56 = vadd.f32 %v1302_v16, %v436_v53  ;;  %585 = vst.msk [vmem:[%s1313_s14 + $0x24] sm:$0xf] %vm575_vm1, %v559_v47 }
  0xa5   : > { %v502_v62 = vadd.f32 %v477_v52, %v417_v55  ;;  %v544_v1 = vmax.f32 %v519_v58, 0.0  ;;  %v517_v3 = vadd.f32 %v492_v0, %v454_v61  ;;  %592 = vst.msk [vmem:[%s1313_s14 + $0x40] sm:$0xf] %vm575_vm1, %v566_v19 }
  0xa6   : > { %v510_v63 = vadd.f32 %v485_v54, %v437_v56  ;;  %v480_v54 = vld [vmem:[%s1297_s9 + $0x28] sm:$0xff] }
  0xa7   : > { %v527_v4 = vmax.f32 %v502_v62, 0.0  ;;  %v569_v6 = vpack.c.bf16 %v544_v1, %v544_v1  ;;  %v542_v8 = vmax.f32 %v517_v3, 0.0  ;;  %v488_v56 = vld [vmem:[%s1297_s9 + $0x68] sm:$0xff] }
  0xa8   : > { %v535_v5 = vmax.f32 %v510_v63, 0.0  ;;  %v461_v11 = vpop.f32.mrf.mxu3 }
  0xa9   : > { %v552_v9 = vpack.c.bf16 %v527_v4, %v527_v4  ;;  %595 = vst.msk [vmem:[%s1313_s14 + $0x4c] sm:$0xf] %vm575_vm1, %v569_v6  ;;  %v462_v13 = vadd.f32 %v1302_v16, %v461_v11  ;;  %v567_v20 = vpack.c.bf16 %v542_v8, %v542_v8  ;;  %v481_v8 = vld [vmem:[%s1297_s9 + $0x30] sm:$0xff] }
  0xaa   : > { %v560_v10 = vpack.c.bf16 %v535_v5, %v535_v5  ;;  %v418_v14 = vpop.f32.mrf.mxu0  ;;  %v498_v5 = vld [vmem:[%s1297_s9 + $0xb8] sm:$0xff] }
  0xab   : > { %v438_v17 = vpop.f32.mrf.mxu1  ;;  %578 = vst.msk [vmem:[%s1313_s14 + $0x8] sm:$0xf] %vm575_vm1, %v552_v9  ;;  %v419_v21 = vadd.f32 %v1302_v16, %v418_v14  ;;  %v520_v23 = vadd.f32 %v495_v12, %v462_v13 }
  0xac   : > { %v439_v22 = vadd.f32 %v1302_v16, %v438_v17  ;;  %586 = vst.msk [vmem:[%s1313_s14 + $0x28] sm:$0xf] %vm575_vm1, %v560_v10  ;;  %v489_v10 = vld [vmem:[%s1297_s9 + $0x70] sm:$0xff] }
  0xad   : > { %v503_v24 = vadd.f32 %v478_v15, %v419_v21  ;;  %v545_v26 = vmax.f32 %v520_v23, 0.0  ;;  %593 = vst.msk [vmem:[%s1313_s14 + $0x44] sm:$0xf] %vm575_vm1, %v567_v20 }
  0xae   : > { %v511_v25 = vadd.f32 %v486_v18, %v439_v22 }
  0xaf   : > { %v528_v27 = vmax.f32 %v503_v24, 0.0  ;;  %v570_v29 = vpack.c.bf16 %v545_v26, %v545_v26  ;;  %v499_v24 = vld [vmem:[%s1297_s9 + $0xc0] sm:$0xff] }
  0xb0   : > { %v536_v28 = vmax.f32 %v511_v25, 0.0  ;;  %v463_v32 = vpop.f32.mrf.mxu3 }
  0xb1   : > { %v553_v30 = vpack.c.bf16 %v528_v27, %v528_v27  ;;  %596 = vst.msk [vmem:[%s1313_s14 + $0x50] sm:$0xf] %vm575_vm1, %v570_v29  ;;  %v464_v34 = vadd.f32 %v1302_v16, %v463_v32  ;;  %v482_v27 = vld [vmem:[%s1297_s9 + $0x38] sm:$0xff] }
  0xb2   : > { %v561_v31 = vpack.c.bf16 %v536_v28, %v536_v28  ;;  %v421_v35 = vpop.f32.mrf.mxu0  ;;  %v490_v29 = vld [vmem:[%s1297_s9 + $0x78] sm:$0xff] }
  0xb3   : > { %v441_v37 = vpop.f32.mrf.mxu1  ;;  %579 = vst.msk [vmem:[%s1313_s14 + $0xc] sm:$0xf] %vm575_vm1, %v553_v30  ;;  %v422_v39 = vadd.f32 %v1302_v16, %v421_v35  ;;  %v521_v41 = vadd.f32 %v496_v33, %v464_v34 }
  0xb4   : > { %v442_v40 = vadd.f32 %v1302_v16, %v441_v37  ;;  %587 = vst.msk [vmem:[%s1313_s14 + $0x2c] sm:$0xf] %vm575_vm1, %v561_v31 }
  0xb5   : > { %v504_v42 = vadd.f32 %v479_v36, %v422_v39  ;;  %v546_v44 = vmax.f32 %v521_v41, 0.0 }
  0xb6   : > { %v512_v43 = vadd.f32 %v487_v38, %v442_v40 }
  0xb7   : > { %v529_v45 = vmax.f32 %v504_v42, 0.0  ;;  %v571_v47 = vpack.c.bf16 %v546_v44, %v546_v44 }
  0xb8   : > { %v537_v46 = vmax.f32 %v512_v43, 0.0  ;;  %v466_v50 = vpop.f32.mrf.mxu3 }
  0xb9   : > { %v554_v48 = vpack.c.bf16 %v529_v45, %v529_v45  ;;  %597 = vst.msk [vmem:[%s1313_s14 + $0x54] sm:$0xf] %vm575_vm1, %v571_v47  ;;  %v467_v52 = vadd.f32 %v1302_v16, %v466_v50 }
  0xba   : > { %v562_v49 = vpack.c.bf16 %v537_v46, %v537_v46  ;;  %v423_v53 = vpop.f32.mrf.mxu0 }
  0xbb   : > { %v443_v55 = vpop.f32.mrf.mxu1  ;;  %580 = vst.msk [vmem:[%s1313_s14 + $0x10] sm:$0xf] %vm575_vm1, %v554_v48  ;;  %v424_v57 = vadd.f32 %v1302_v16, %v423_v53  ;;  %v522_v59 = vadd.f32 %v497_v51, %v467_v52 }
  0xbc   : > { %v444_v58 = vadd.f32 %v1302_v16, %v443_v55  ;;  %588 = vst.msk [vmem:[%s1313_s14 + $0x30] sm:$0xf] %vm575_vm1, %v562_v49 }
  0xbd   : > { %v505_v60 = vadd.f32 %v480_v54, %v424_v57  ;;  %v547_v62 = vmax.f32 %v522_v59, 0.0 }
  0xbe   : > { %v513_v61 = vadd.f32 %v488_v56, %v444_v58 }
  0xbf   : > { %v530_v63 = vmax.f32 %v505_v60, 0.0  ;;  %v572_v1 = vpack.c.bf16 %v547_v62, %v547_v62 }
  0xc0   : > { %v538_v0 = vmax.f32 %v513_v61, 0.0  ;;  %v468_v4 = vpop.f32.mrf.mxu3 }
  0xc1   : > { %v555_v2 = vpack.c.bf16 %v530_v63, %v530_v63  ;;  %598 = vst.msk [vmem:[%s1313_s14 + $0x58] sm:$0xf] %vm575_vm1, %v572_v1  ;;  %v469_v6 = vadd.f32 %v1302_v16, %v468_v4 }
  0xc2   : > { %v563_v3 = vpack.c.bf16 %v538_v0, %v538_v0  ;;  %v426_v7 = vpop.f32.mrf.mxu0 }
  0xc3   : > { %v446_v9 = vpop.f32.mrf.mxu1  ;;  %581 = vst.msk [vmem:[%s1313_s14 + $0x14] sm:$0xf] %vm575_vm1, %v555_v2  ;;  %v427_v11 = vadd.f32 %v1302_v16, %v426_v7  ;;  %v523_v13 = vadd.f32 %v498_v5, %v469_v6 }
  0xc4   : > { %v447_v12 = vadd.f32 %v1302_v16, %v446_v9  ;;  %589 = vst.msk [vmem:[%s1313_s14 + $0x34] sm:$0xf] %vm575_vm1, %v563_v3 }
  0xc5   : > { %v506_v14 = vadd.f32 %v481_v8, %v427_v11  ;;  %v548_v17 = vmax.f32 %v523_v13, 0.0 }
  0xc6   : > { %v514_v15 = vadd.f32 %v489_v10, %v447_v12 }
  0xc7   : > { %v531_v18 = vmax.f32 %v506_v14, 0.0  ;;  %v573_v20 = vpack.c.bf16 %v548_v17, %v548_v17 }
  0xc8   : > { %v539_v19 = vmax.f32 %v514_v15, 0.0  ;;  %v471_v23 = vpop.f32.mrf.mxu3 }
  0xc9   : > { %v556_v21 = vpack.c.bf16 %v531_v18, %v531_v18  ;;  %599 = vst.msk [vmem:[%s1313_s14 + $0x5c] sm:$0xf] %vm575_vm1, %v573_v20  ;;  %v472_v25 = vadd.f32 %v1302_v16, %v471_v23 }
  0xca   : > { %v564_v22 = vpack.c.bf16 %v539_v19, %v539_v19  ;;  %v428_v26 = vpop.f32.mrf.mxu0 }
  0xcb   : > { %v448_v28 = vpop.f32.mrf.mxu1  ;;  %582 = vst.msk [vmem:[%s1313_s14 + $0x18] sm:$0xf] %vm575_vm1, %v556_v21  ;;  %v429_v30 = vadd.f32 %v1302_v16, %v428_v26  ;;  %v524_v32 = vadd.f32 %v499_v24, %v472_v25 }
  0xcc   : > { %v449_v31 = vadd.f32 %v1302_v16, %v448_v28  ;;  %590 = vst.msk [vmem:[%s1313_s14 + $0x38] sm:$0xf] %vm575_vm1, %v564_v22 }
  0xcd   : > { %v507_v33 = vadd.f32 %v482_v27, %v429_v30  ;;  %v549_v35 = vmax.f32 %v524_v32, 0.0 }
  0xce   : > { %v515_v34 = vadd.f32 %v490_v29, %v449_v31 }
  0xcf   : > { %v532_v36 = vmax.f32 %v507_v33, 0.0  ;;  %v574_v38 = vpack.c.bf16 %v549_v35, %v549_v35 }
  0xd0   : > { %v540_v37 = vmax.f32 %v515_v34, 0.0  ;;  %v473_v41 = vpop.f32.mrf.mxu3  ;;  %607 = sbr.rel (!%p1262_p4) target bundleno = 285 (0x11d), region = 40 }
  0xd1   : > { %v557_v39 = vpack.c.bf16 %v532_v36, %v532_v36  ;;  %600 = vst.msk [vmem:[%s1313_s14 + $0x60] sm:$0xf] %vm575_vm1, %v574_v38 }
  0xd2   : > { %v565_v40 = vpack.c.bf16 %v540_v37, %v540_v37 }
  0xd3   : > { %583 = vst.msk [vmem:[%s1313_s14 + $0x1c] sm:$0xf] %vm575_vm1, %v557_v39 }
  0xd4   : > { %591 = vst.msk [vmem:[%s1313_s14 + $0x3c] sm:$0xf] %vm575_vm1, %v565_v40 }
  0xd5   : > { %s1546_s15 = smov (!%p610_p8, %s609_s15), 25 }
  0xd6   : > { %s998_s25 = sshll.u32 %s1546_s15, 2 }
  0xd7   : > { %p1001_p9 = scmp.eq.s32.totalorder %s998_s25, 0 }
  0xd8   : > { %1118 = sdivrem.u32 (!%p1001_p9), %s1546_s15, 25 }
  0xd9   : > { %618 = sbr.rel (%p1001_p9) target bundleno = 285 (0x11d), region = 44 }
  0xe1   : > { %s1420_s23 = spop.drf %1118 }
  0xe2   : > { %s1120_s27 = spop.drf %1118  ;;  %p1002_p10 = scmp.le.s32.totalorder %s1420_s23, 0 }
  0xe3   : > { %s1537_s18 = smov (!%p1002_p10), %s1414_s24  ;;  %s1538_s26 = smov (!%p1002_p10), %s1313_s14 }
  0xe4   : > { %877 = sbr.rel (%p1002_p10) target bundleno = 259 (0x103), region = 119  ;;  %s1429_s28 = smov (!%p1002_p10), 0  }
  0xe5   : > { %s1431_s29 = smov (!%p1002_p10), 0  }
  0xe9 LB: >> { %v636_v16 = vld [vmem:[%s1186_s26] sm:$0xf]  ;;  %v638_v42 = vld [vmem:[%s1186_s26 + $0x4] sm:$0xf]  ;;  %v640_v43 = vld [vmem:[%s1186_s26 + $0x8] sm:$0xf]  ;;  %s1194_s29 = sphi %s1431_s29, %s630_s29   ;;  %s1190_s28 = sphi %s1429_s28, %s1541_s28   ;;  %s1186_s26 = sphi %s1538_s26, %s1540_s26   ;;  %s1182_s18 = sphi %s1537_s18, %s1539_s18  }
  0xea   : >> { %637 = vst [vmem:[%s1182_s18] sm:$0xf] %v636_v16  ;;  %v642_v44 = vld [vmem:[%s1186_s26 + $0xc] sm:$0xf]  ;;  %v644_v45 = vld [vmem:[%s1186_s26 + $0x10] sm:$0xf]  ;;  %s686_s30 = sadd.s32 1, %s1190_s28 }
  0xeb   : >> { %639 = vst [vmem:[%s1182_s18 + $0x4] sm:$0xf] %v638_v42  ;;  %v646_v46 = vld [vmem:[%s1186_s26 + $0x14] sm:$0xf]  ;;  %v648_v47 = vld [vmem:[%s1186_s26 + $0x18] sm:$0xf]  ;;  %p687_p11 = scmp.ge.s32.totalorder %s686_s30, %s1420_s23 }
  0xec   : >> { %641 = vst [vmem:[%s1182_s18 + $0x8] sm:$0xf] %v640_v43  ;;  %v650_v48 = vld [vmem:[%s1186_s26 + $0x1c] sm:$0xf]  ;;  %v652_v49 = vld [vmem:[%s1186_s26 + $0x20] sm:$0xf] }
  0xed   : >> { %643 = vst [vmem:[%s1182_s18 + $0xc] sm:$0xf] %v642_v44  ;;  %v654_v50 = vld [vmem:[%s1186_s26 + $0x24] sm:$0xf]  ;;  %v656_v51 = vld [vmem:[%s1186_s26 + $0x28] sm:$0xf] }
  0xee   : >> { %645 = vst [vmem:[%s1182_s18 + $0x10] sm:$0xf] %v644_v45  ;;  %v658_v52 = vld [vmem:[%s1186_s26 + $0x2c] sm:$0xf]  ;;  %v660_v53 = vld [vmem:[%s1186_s26 + $0x30] sm:$0xf] }
  0xef   : >> { %647 = vst [vmem:[%s1182_s18 + $0x14] sm:$0xf] %v646_v46  ;;  %v662_v54 = vld [vmem:[%s1186_s26 + $0x34] sm:$0xf]  ;;  %v664_v55 = vld [vmem:[%s1186_s26 + $0x38] sm:$0xf] }
  0xf0   : >> { %649 = vst [vmem:[%s1182_s18 + $0x18] sm:$0xf] %v648_v47  ;;  %s1548_s30 = smov (%p687_p11, %s686_s30), 0  ;;  %v666_v56 = vld [vmem:[%s1186_s26 + $0x3c] sm:$0xf]  ;;  %s630_s29 = sadd.s32 1, %s1194_s29  }
  0xf1   : >> { %651 = vst [vmem:[%s1182_s18 + $0x1c] sm:$0xf] %v650_v48  ;;  %v668_v57 = vld [vmem:[%s1186_s26 + $0x40] sm:$0xf]  ;;  %s689_s5 = smul.u32 100, %s1548_s30  ;;  %p629_p12 = scmp.ge.s32.totalorder %s630_s29, %s1420_s23 }
  0xf2   : >> { %653 = vst [vmem:[%s1182_s18 + $0x20] sm:$0xf] %v652_v49  ;;  %v670_v58 = vld [vmem:[%s1186_s26 + $0x44] sm:$0xf]  ;;  %v672_v59 = vld [vmem:[%s1186_s26 + $0x48] sm:$0xf]  ;;  %s1541_s28 = smov %s1548_s30 }
  0xf3   : >> { %655 = vst [vmem:[%s1182_s18 + $0x24] sm:$0xf] %v654_v50  ;;  %s691_s6 = scalar_lea.vmem %s1313_s14, %s689_s5 [#allocation2]   ;;  %s692_s7 = scalar_lea.vmem %s1414_s24, %s689_s5   ;;  %v674_v60 = vld [vmem:[%s1186_s26 + $0x4c] sm:$0xf]  ;;  %v676_v61 = vld [vmem:[%s1186_s26 + $0x50] sm:$0xf] }
  0xf4   : >> { %657 = vst [vmem:[%s1182_s18 + $0x28] sm:$0xf] %v656_v51  ;;  %v678_v62 = vld [vmem:[%s1186_s26 + $0x54] sm:$0xf]  ;;  %v680_v63 = vld [vmem:[%s1186_s26 + $0x58] sm:$0xf] }
  0xf5   : >> { %659 = vst [vmem:[%s1182_s18 + $0x2c] sm:$0xf] %v658_v52  ;;  %v682_v0 = vld [vmem:[%s1186_s26 + $0x5c] sm:$0xf]  ;;  %v684_v1 = vld [vmem:[%s1186_s26 + $0x60] sm:$0xf]  ;;  %s1540_s26 = smov %s691_s6 }
  0xf6   : >> { %661 = vst [vmem:[%s1182_s18 + $0x30] sm:$0xf] %v660_v53 }
  0xf7   : >> { %663 = vst [vmem:[%s1182_s18 + $0x34] sm:$0xf] %v662_v54 }
  0xf8   : >> { %665 = vst [vmem:[%s1182_s18 + $0x38] sm:$0xf] %v664_v55 }
  0xf9   : >> { %667 = vst [vmem:[%s1182_s18 + $0x3c] sm:$0xf] %v666_v56 }
  0xfa   : >> { %669 = vst [vmem:[%s1182_s18 + $0x40] sm:$0xf] %v668_v57 }
  0xfb   : >> { %671 = vst [vmem:[%s1182_s18 + $0x44] sm:$0xf] %v670_v58 }
  0xfc   : >> { %673 = vst [vmem:[%s1182_s18 + $0x48] sm:$0xf] %v672_v59 }
  0xfd   : >> { %675 = vst [vmem:[%s1182_s18 + $0x4c] sm:$0xf] %v674_v60 }
  0xfe   : >> { %677 = vst [vmem:[%s1182_s18 + $0x50] sm:$0xf] %v676_v61  ;;  %632 = sbr.rel (!%p629_p12) target bundleno = 233 (0xe9), region = 125 }
  0xff   : >> { %679 = vst [vmem:[%s1182_s18 + $0x54] sm:$0xf] %v678_v62 }
 0x100   : >> { %681 = vst [vmem:[%s1182_s18 + $0x58] sm:$0xf] %v680_v63 }
 0x101   : >> { %683 = vst [vmem:[%s1182_s18 + $0x5c] sm:$0xf] %v682_v0 }
 0x102   : >> { %685 = vst [vmem:[%s1182_s18 + $0x60] sm:$0xf] %v684_v1  ;;  %s1539_s18 = smov %s692_s7 }
 0x103 PF: > { %1121 = sdivrem.u32 %s1546_s15, 25 }
 0x104   : > { %s1003_s8 = smul.u32 100, %s1420_s23 }
 0x106   : > { %s1516_s9 = scalar_lea.vmem %s1313_s14, %s1003_s8 [#allocation2]   ;;  %s699_s10 = scalar_lea.vmem %s1414_s24, %s1003_s8  }
 0x10c   : > { %s1122_s11 = spop.drf %1121 }
 0x10d   : > { %s1123_s12 = spop.drf %1121 }
 0x10e   : > { %p1005_p13 = scmp.le.s32.totalorder %s1123_s12, 0 }
 0x10f   : > { %s1196_s13 = smov (!%p1005_p13), %s699_s10   ;;  %s1200_s17 = smov (!%p1005_p13), %s1516_s9  }
 0x110   : > { %891 = sbr.rel (%p1005_p13) target bundleno = 285 (0x11d), region = 130  ;;  %s1204_s20 = smov (!%p1005_p13), 0  }
 0x111   : > { %s1208_s21 = smov (!%p1005_p13), 0  }
 0x115 LB: >> { %v709_v2 = vld [vmem:[%s1202_s17] sm:$0xf]  ;;  %s711_s14 = sadd.s32 1, %s1206_s20  ;;  %s703_s21 = sadd.s32 1, %s1210_s21   ;;  %s1210_s21 = sphi %s1208_s21, %s703_s21   ;;  %s1206_s20 = sphi %s1204_s20, %s1205_s20   ;;  %s1202_s17 = sphi %s1200_s17, %s716_s17   ;;  %s1198_s13 = sphi %s1196_s13, %s717_s13  }
 0x116   : >> { %710 = vst [vmem:[%s1198_s13] sm:$0xf] %v709_v2  ;;  %p712_p0 = scmp.ge.s32.totalorder %s711_s14, %s1123_s12  ;;  %p702_p1 = scmp.ge.s32.totalorder %s703_s21, %s1123_s12 }
 0x118   : >> { %s1550_s14 = smov (%p712_p0, %s711_s14), 0  ;;  %705 = sbr.rel (!%p702_p1) target bundleno = 277 (0x115), region = 136 }
 0x119   : >> { %s1006_s15 = sshll.u32 %s1550_s14, 2  ;;  %s1205_s20 = smov %s1550_s14  }
 0x11a   : >> { %s716_s17 = scalar_lea.vmem %s1516_s9, %s1006_s15 [#allocation2]   ;;  %s717_s13 = scalar_lea.vmem %s699_s10, %s1006_s15  }
 0x11d PF: > { %p11_p2 = scmp.ge.s32.totalorder %s1252_s19, 4   ;;  %s1542_s15 = smov %s1174_s16 }
 0x11e   : > { %s1543_s16 = smov %s1260_s22  ;;  %s1544_s17 = smov %s1252_s19 }
 0x11f   :  { %13 = sbr.rel (!%p11_p2) target bundleno = 2 (0x2), region = 147 }

// kernel: vae_forward.6
= control target key start
LH: loop header
LB: loop body
LE: loop exit
PB: predicated region body
PF: predicated region fallthrough
CT: control target
= control target key end

     0   :  { %vm338_vm0 = vcmask 257024   ;;  %vm351_vm1 = vcmask 253952   ;;  %s732_s1 = inlined_call_operand.vmem [shape: bf16[256,32], index: 1, kind: input, shape index: {}]   ;;  %s733_s2 = inlined_call_operand.vmem [shape: f32[1,32], index: 2, kind: input, shape index: {}]   ;;  %s734_s0 = inlined_call_operand.vmem [shape: bf16[98,256], index: 0, kind: input, shape index: {}]   ;;  %s735_s3 = inlined_call_operand.vmem [shape: bf16[98,32], index: 3, kind: output, shape index: {}]  }
   0x1   :  { %v488_v0 = vld [vmem:[%s732_s1 + $0x38] sm:$0xff]  ;;  %v487_v2 = vld [vmem:[%s732_s1 + $0x30] sm:$0xff]  ;;  %v486_v4 = vld [vmem:[%s732_s1 + $0x28] sm:$0xff] }
   0x2   :  { %v496_v1 = vld [vmem:[%s732_s1 + $0x78] sm:$0xff]  ;;  %226 = vmatpush.bf16.msra.mxu0 %v488_v0  ;;  %497 = vmatpush.bf16.msra.mxu2 %v488_v0  ;;  %v495_v3 = vld [vmem:[%s732_s1 + $0x70] sm:$0xff]  ;;  %v494_v5 = vld [vmem:[%s732_s1 + $0x68] sm:$0xff] }
   0x3   :  { %269 = vmatpush.bf16.msra.mxu1 %v496_v1  ;;  %505 = vmatpush.bf16.msra.mxu3 %v496_v1  ;;  %v485_v6 = vld [vmem:[%s732_s1 + $0x20] sm:$0xff]  ;;  %v484_v8 = vld [vmem:[%s732_s1 + $0x18] sm:$0xff]  ;;  %v483_v10 = vld [vmem:[%s732_s1 + $0x10] sm:$0xff] }
   0x4   :  { %v493_v7 = vld [vmem:[%s732_s1 + $0x60] sm:$0xff]  ;;  %v492_v9 = vld [vmem:[%s732_s1 + $0x58] sm:$0xff]  ;;  %v491_v11 = vld [vmem:[%s732_s1 + $0x50] sm:$0xff] }
   0x5   :  { %v482_v12 = vld [vmem:[%s732_s1 + $0x8] sm:$0xff]  ;;  %v481_v14 = vld [vmem:[%s732_s1] sm:$0xff]  ;;  %v383_v18 = vld [vmem:[%s734_s0 + $0x30] sm:$0xf] }
   0x6   :  { %227 = vmatpush.bf16.msra.mxu0 %v487_v2  ;;  %498 = vmatpush.bf16.msra.mxu2 %v487_v2  ;;  %v490_v13 = vld [vmem:[%s732_s1 + $0x48] sm:$0xff]  ;;  %v489_v15 = vld [vmem:[%s732_s1 + $0x40] sm:$0xff]  ;;  %v476_v19 = vld [vmem:[%s734_s0 + $0x34] sm:$0xf0] }
   0x7   :  { %270 = vmatpush.bf16.msra.mxu1 %v495_v3  ;;  %506 = vmatpush.bf16.msra.mxu3 %v495_v3  ;;  %v359_v16 = vld [vmem:[%s734_s0] sm:$0xf]  ;;  %v470_v17 = vld [vmem:[%s734_s0 + $0x4] sm:$0xf0]  ;;  %v469_v20 = vld [vmem:[%s734_s0 + $0x4] sm:$0xf]  ;;  %v384_v25 = vor.u32 %v476_v19, %v383_v18 }
   0x8   :  { %v361_v21 = vld [vmem:[%s734_s0 + $0x8] sm:$0xf0]  ;;  %v477_v22 = vld [vmem:[%s734_s0 + $0x44] sm:$0xf]  ;;  %v360_v24 = vor.u32 %v470_v17, %v359_v16  ;;  %v367_v28 = vld [vmem:[%s734_s0 + $0x10] sm:$0xf] }
   0x9   :  { %v393_v23 = vld [vmem:[%s734_s0 + $0x48] sm:$0xf0]  ;;  %v364_v26 = vor.u32 %v469_v20, %v361_v21  ;;  %v472_v29 = vld [vmem:[%s734_s0 + $0x14] sm:$0xf0]  ;;  %v391_v30 = vld [vmem:[%s734_s0 + $0x40] sm:$0xf] }
   0xa   :  { %228 = vmatpush.bf16.msra.mxu0 %v486_v4  ;;  %499 = vmatpush.bf16.msra.mxu2 %v486_v4  ;;  %v396_v27 = vor.u32 %v477_v22, %v393_v23  ;;  %v478_v31 = vld [vmem:[%s734_s0 + $0x44] sm:$0xf0]  ;;  %v471_v32 = vld [vmem:[%s734_s0 + $0x14] sm:$0xf]  ;;  %v369_v33 = vld [vmem:[%s734_s0 + $0x18] sm:$0xf0]  ;;  %v368_v36 = vor.u32 %v472_v29, %v367_v28 }
   0xb   :  { %271 = vmatpush.bf16.msra.mxu1 %v494_v5  ;;  %507 = vmatpush.bf16.msra.mxu3 %v494_v5  ;;  %v479_v34 = vld [vmem:[%s734_s0 + $0x54] sm:$0xf]  ;;  %v401_v35 = vld [vmem:[%s734_s0 + $0x58] sm:$0xf0]  ;;  %v392_v37 = vor.u32 %v478_v31, %v391_v30  ;;  %v372_v38 = vor.u32 %v471_v32, %v369_v33  ;;  %v26_v40 = vld [vmem:[%s734_s0 + $0x60] sm:$0x11] }
   0xc   :  { %v404_v39 = vor.u32 %v479_v34, %v401_v35  ;;  %v375_v41 = vld [vmem:[%s734_s0 + $0x20] sm:$0xf]  ;;  %v474_v42 = vld [vmem:[%s734_s0 + $0x24] sm:$0xf0]  ;;  %v399_v43 = vld [vmem:[%s734_s0 + $0x50] sm:$0xf]  ;;  %v101_v45 = vunpack.c.h.b16 %v26_v40  ;;  %v100_v52 = vunpack.c.l.b16 %v26_v40 }
   0xd   :  { %v480_v44 = vld [vmem:[%s734_s0 + $0x54] sm:$0xf0]  ;;  %v473_v46 = vld [vmem:[%s734_s0 + $0x24] sm:$0xf]  ;;  %v377_v47 = vld [vmem:[%s734_s0 + $0x28] sm:$0xf0]  ;;  %v376_v48 = vor.u32 %v474_v42, %v375_v41 }
   0xe   :  { %229 = vmatpush.bf16.msra.mxu0 %v485_v6  ;;  %500 = vmatpush.bf16.msra.mxu2 %v485_v6  ;;  %v400_v49 = vor.u32 %v480_v44, %v399_v43  ;;  %v380_v50 = vor.u32 %v473_v46, %v377_v47  ;;  %v115_v51 = vpack.c.b16 %v101_v45, %v101_v45  ;;  %v475_v53 = vld [vmem:[%s734_s0 + $0x34] sm:$0xf]  ;;  %v385_v54 = vld [vmem:[%s734_s0 + $0x38] sm:$0xf0]  ;;  %v660_v57 = vld [vmem:[%s733_s2] ss:$0 sm:$0xff] }
   0xf   :  { %272 = vmatpush.bf16.msra.mxu1 %v493_v7  ;;  %508 = vmatpush.bf16.msra.mxu3 %v493_v7  ;;  %v114_v55 = vpack.c.b16 %v100_v52, %v100_v52  ;;  %v388_v56 = vor.u32 %v475_v53, %v385_v54 }
  0x12   :  { %230 = vmatpush.bf16.msra.mxu0 %v484_v8  ;;  %501 = vmatpush.bf16.msra.mxu2 %v484_v8 }
  0x13   :  { %273 = vmatpush.bf16.msra.mxu1 %v492_v9  ;;  %509 = vmatpush.bf16.msra.mxu3 %v492_v9 }
  0x16   :  { %231 = vmatpush.bf16.msra.mxu0 %v483_v10  ;;  %502 = vmatpush.bf16.msra.mxu2 %v483_v10 }
  0x17   :  { %274 = vmatpush.bf16.msra.mxu1 %v491_v11  ;;  %510 = vmatpush.bf16.msra.mxu3 %v491_v11 }
  0x1a   :  { %232 = vmatpush.bf16.msra.mxu0 %v482_v12  ;;  %503 = vmatpush.bf16.msra.mxu2 %v482_v12 }
  0x1b   :  { %275 = vmatpush.bf16.msra.mxu1 %v490_v13  ;;  %511 = vmatpush.bf16.msra.mxu3 %v490_v13 }
  0x1e   :  { %233 = vmatpush.bf16.msra.mxu0 %v481_v14  ;;  %504 = vmatpush.bf16.msra.mxu2 %v481_v14 }
  0x1f   :  { %276 = vmatpush.bf16.msra.mxu1 %v489_v15  ;;  %512 = vmatpush.bf16.msra.mxu3 %v489_v15 }
  0x21   :  { %234 = vmatmul.bf16.vlgmr.msra.gmra.mxu0 %v360_v24  ;;  %249 = vmatmul.bf16.vlgmr.msra.gmra.mxu2 %v384_v25 }
  0x22   :  { %277 = vmatmul.bf16.vlgmr.msra.gmra.mxu1 %v364_v26  ;;  %297 = vmatmul.bf16.vlgmr.msra.gmra.mxu3 %v396_v27 }
  0x31   :  { %239 = vmatmul.bf16.gmra.mxu0 %v368_v36  ;;  %254 = vmatmul.bf16.gmra.mxu2 %v392_v37 }
  0x32   :  { %282 = vmatmul.bf16.gmra.mxu1 %v372_v38  ;;  %302 = vmatmul.bf16.gmra.mxu3 %v404_v39 }
  0x41   :  { %244 = vmatmul.bf16.gmra.mxu0 %v376_v48  ;;  %259 = vmatmul.bf16.gmra.mxu2 %v400_v49 }
  0x42   :  { %287 = vmatmul.bf16.gmra.mxu1 %v380_v50  ;;  %307 = vmatmul.bf16.gmra.mxu3 %v115_v51 }
  0x51   :  { %264 = vmatmul.bf16.gmra.mxu2 %v114_v55 }
  0x52   :  { %292 = vmatmul.bf16.gmra.mxu1 %v388_v56 }
  0x9e   :  { %v235_v58 = vpop.f32.mrf.mxu0 }
  0x9f   :  { %v236_v59 = vadd.f32 %v660_v57, %v235_v58  ;;  %v278_v60 = vpop.f32.mrf.mxu1 }
  0xa1   :  { %v279_v61 = vadd.f32 %v278_v60, %v236_v59 }
  0xa3   :  { %v312_v62 = vmax.f32 %v279_v61, 0.0 }
  0xa4   :  { %v663_v63 = vpop.f32.mrf.mxu2 }
  0xa5   :  { %v325_v0 = vpack.c.bf16 %v312_v62, %v312_v62  ;;  %v298_v1 = vpop.f32.mrf.mxu3  ;;  %v251_v55 = vadd.f32 %v660_v57, %v663_v63 }
  0xa6   :  { %v237_v2 = vpop.f32.mrf.mxu0 }
  0xa7   :  { %339 = vst.msk [vmem:[%s735_s3] sm:$0xf] %vm338_vm0, %v325_v0  ;;  %v238_v3 = vadd.f32 %v660_v57, %v237_v2  ;;  %v280_v4 = vpop.f32.mrf.mxu1 }
  0xa9   :  { %v281_v5 = vadd.f32 %v280_v4, %v238_v3 }
  0xab   :  { %v313_v6 = vmax.f32 %v281_v5, 0.0 }
  0xac   :  { %v670_v7 = vpop.f32.mrf.mxu2 }
  0xad   :  { %v326_v8 = vpack.c.bf16 %v313_v6, %v313_v6  ;;  %v300_v9 = vpop.f32.mrf.mxu3  ;;  %v253_v2 = vadd.f32 %v660_v57, %v670_v7 }
  0xae   :  { %v240_v10 = vpop.f32.mrf.mxu0 }
  0xaf   :  { %340 = vst.msk [vmem:[%s735_s3 + $0x4] sm:$0xf] %vm338_vm0, %v326_v8  ;;  %v241_v11 = vadd.f32 %v660_v57, %v240_v10  ;;  %v283_v12 = vpop.f32.mrf.mxu1 }
  0xb1   :  { %v284_v13 = vadd.f32 %v283_v12, %v241_v11 }
  0xb3   :  { %v314_v14 = vmax.f32 %v284_v13, 0.0 }
  0xb4   :  { %v255_v15 = vpop.f32.mrf.mxu2 }
  0xb5   :  { %v327_v16 = vpack.c.bf16 %v314_v14, %v314_v14  ;;  %v256_v17 = vadd.f32 %v660_v57, %v255_v15  ;;  %v303_v18 = vpop.f32.mrf.mxu3 }
  0xb6   :  { %v242_v19 = vpop.f32.mrf.mxu0 }
  0xb7   :  { %341 = vst.msk [vmem:[%s735_s3 + $0x8] sm:$0xf] %vm338_vm0, %v327_v16  ;;  %v299_v20 = vadd.f32 %v298_v1, %v256_v17  ;;  %v243_v21 = vadd.f32 %v660_v57, %v242_v19  ;;  %v285_v22 = vpop.f32.mrf.mxu1 }
  0xb9   :  { %v320_v23 = vmax.f32 %v299_v20, 0.0  ;;  %v286_v24 = vadd.f32 %v285_v22, %v243_v21 }
  0xbb   :  { %v333_v25 = vpack.c.bf16 %v320_v23, %v320_v23  ;;  %v315_v26 = vmax.f32 %v286_v24, 0.0 }
  0xbc   :  { %v257_v27 = vpop.f32.mrf.mxu2 }
  0xbd   :  { %347 = vst.msk [vmem:[%s735_s3 + $0x20] sm:$0xf] %vm338_vm0, %v333_v25  ;;  %v328_v28 = vpack.c.bf16 %v315_v26, %v315_v26  ;;  %v258_v29 = vadd.f32 %v660_v57, %v257_v27  ;;  %v305_v30 = vpop.f32.mrf.mxu3 }
  0xbe   :  { %v245_v31 = vpop.f32.mrf.mxu0 }
  0xbf   :  { %342 = vst.msk [vmem:[%s735_s3 + $0xc] sm:$0xf] %vm338_vm0, %v328_v28  ;;  %v301_v32 = vadd.f32 %v300_v9, %v258_v29  ;;  %v246_v33 = vadd.f32 %v660_v57, %v245_v31  ;;  %v288_v34 = vpop.f32.mrf.mxu1 }
  0xc1   :  { %v321_v35 = vmax.f32 %v301_v32, 0.0  ;;  %v289_v36 = vadd.f32 %v288_v34, %v246_v33 }
  0xc3   :  { %v334_v37 = vpack.c.bf16 %v321_v35, %v321_v35  ;;  %v316_v38 = vmax.f32 %v289_v36, 0.0 }
  0xc4   :  { %v260_v39 = vpop.f32.mrf.mxu2 }
  0xc5   :  { %348 = vst.msk [vmem:[%s735_s3 + $0x24] sm:$0xf] %vm338_vm0, %v334_v37  ;;  %v329_v40 = vpack.c.bf16 %v316_v38, %v316_v38  ;;  %v261_v41 = vadd.f32 %v660_v57, %v260_v39  ;;  %v308_v42 = vpop.f32.mrf.mxu3 }
  0xc6   :  { %v247_v43 = vpop.f32.mrf.mxu0 }
  0xc7   :  { %343 = vst.msk [vmem:[%s735_s3 + $0x10] sm:$0xf] %vm338_vm0, %v329_v40  ;;  %v304_v44 = vadd.f32 %v303_v18, %v261_v41  ;;  %v248_v45 = vadd.f32 %v660_v57, %v247_v43  ;;  %v290_v46 = vpop.f32.mrf.mxu1 }
  0xc9   :  { %v322_v47 = vmax.f32 %v304_v44, 0.0  ;;  %v291_v48 = vadd.f32 %v290_v46, %v248_v45 }
  0xcb   :  { %v335_v49 = vpack.c.bf16 %v322_v47, %v322_v47  ;;  %v317_v50 = vmax.f32 %v291_v48, 0.0 }
  0xcc   :  { %v262_v51 = vpop.f32.mrf.mxu2 }
  0xcd   :  { %349 = vst.msk [vmem:[%s735_s3 + $0x28] sm:$0xf] %vm338_vm0, %v335_v49  ;;  %v330_v52 = vpack.c.bf16 %v317_v50, %v317_v50  ;;  %v263_v53 = vadd.f32 %v660_v57, %v262_v51  ;;  %v310_v54 = vpop.f32.mrf.mxu3 }
  0xcf   :  { %344 = vst.msk [vmem:[%s735_s3 + $0x14] sm:$0xf] %vm338_vm0, %v330_v52  ;;  %v306_v56 = vadd.f32 %v305_v30, %v263_v53  ;;  %v293_v58 = vpop.f32.mrf.mxu1 }
  0xd0   :  { %v294_v59 = vadd.f32 %v293_v58, %v251_v55 }
  0xd1   :  { %v323_v60 = vmax.f32 %v306_v56, 0.0 }
  0xd2   :  { %v318_v61 = vmax.f32 %v294_v59, 0.0 }
  0xd3   :  { %v336_v62 = vpack.c.bf16 %v323_v60, %v323_v60 }
  0xd4   :  { %v331_v0 = vpack.c.bf16 %v318_v61, %v318_v61  ;;  %v265_v1 = vpop.f32.mrf.mxu2 }
  0xd5   :  { %350 = vst.msk [vmem:[%s735_s3 + $0x2c] sm:$0xf] %vm338_vm0, %v336_v62  ;;  %v266_v63 = vadd.f32 %v660_v57, %v265_v1 }
  0xd6   :  { %345 = vst.msk [vmem:[%s735_s3 + $0x18] sm:$0xf] %vm338_vm0, %v331_v0 }
  0xd7   :  { %v309_v3 = vadd.f32 %v308_v42, %v266_v63  ;;  %v295_v4 = vpop.f32.mrf.mxu1 }
  0xd8   :  { %v296_v5 = vadd.f32 %v295_v4, %v253_v2 }
  0xd9   :  { %v324_v6 = vmax.f32 %v309_v3, 0.0 }
  0xda   :  { %v319_v8 = vmax.f32 %v296_v5, 0.0 }
  0xdb   :  { %v337_v9 = vpack.c.bf16 %v324_v6, %v324_v6 }
  0xdc   :  { %v332_v10 = vpack.c.bf16 %v319_v8, %v319_v8  ;;  %v267_v11 = vpop.f32.mrf.mxu2 }
  0xdd   :  { %352 = vst.msk [vmem:[%s735_s3 + $0x30] sm:$0x1] %vm351_vm1, %v337_v9 }
  0xde   :  { %346 = vst.msk [vmem:[%s735_s3 + $0x1c] sm:$0xf] %vm338_vm0, %v332_v10 }

// kernel: vae_forward.8
= control target key start
LH: loop header
LB: loop body
LE: loop exit
PB: predicated region body
PF: predicated region fallthrough
CT: control target
= control target key end

     0   :  { %vm289_vm0 = vcmask 261120   ;;  %vm466_vm1 = vcmask 519168   ;;  %vm479_vm2 = vcmask 516096   ;;  %s962_s1 = inlined_call_operand.vmem [shape: bf16[288,64], index: 1, kind: input, shape index: {}]   ;;  %s963_s0 = inlined_call_operand.vmem [shape: bf16[98,288], index: 0, kind: input, shape index: {}]   ;;  %s964_s2 = inlined_call_operand.vmem [shape: f32[1,64], index: 2, kind: input, shape index: {}]   ;;  %s965_s3 = inlined_call_operand.vmem [shape: bf16[98,64], index: 3, kind: output, shape index: {}]  }
   0x1   :  { %v661_v0 = vld [vmem:[%s962_s1 + $0x38] sm:$0xff]  ;;  %v671_v2 = vld [vmem:[%s962_s1 + $0x88] sm:$0xff]  ;;  %v660_v3 = vld [vmem:[%s962_s1 + $0x30] sm:$0xff] }
   0x2   :  { %v669_v1 = vld [vmem:[%s962_s1 + $0x78] sm:$0xff]  ;;  %311 = vmatpush.bf16.msra.mxu0 %v661_v0  ;;  %672 = vmatpush.bf16.msra.mxu3 %v661_v0  ;;  %v668_v4 = vld [vmem:[%s962_s1 + $0x70] sm:$0xff]  ;;  %v670_v5 = vld [vmem:[%s962_s1 + $0x80] sm:$0xff] }
   0x3   :  { %354 = vmatpush.bf16.msra.mxu1 %v669_v1  ;;  %403 = vmatpush.bf16.msra.mxu2 %v671_v2  ;;  %v495_v6 = vld [vmem:[%s963_s0 + $0x8] sm:$0xf]  ;;  %v638_v7 = vld [vmem:[%s963_s0 + $0x10] sm:$0xf0]  ;;  %v658_v11 = vld [vmem:[%s962_s1 + $0x20] sm:$0xff] }
   0x4   :  { %v496_v8 = vor.u32 %v638_v7, %v495_v6  ;;  %v659_v9 = vld [vmem:[%s962_s1 + $0x28] sm:$0xff]  ;;  %v666_v12 = vld [vmem:[%s962_s1 + $0x60] sm:$0xff]  ;;  %v657_v13 = vld [vmem:[%s962_s1 + $0x18] sm:$0xff] }
   0x5   :  { %v667_v10 = vld [vmem:[%s962_s1 + $0x68] sm:$0xff]  ;;  %v665_v14 = vld [vmem:[%s962_s1 + $0x58] sm:$0xff]  ;;  %v656_v15 = vld [vmem:[%s962_s1 + $0x10] sm:$0xff] }
   0x6   :  { %312 = vmatpush.bf16.msra.mxu0 %v660_v3  ;;  %673 = vmatpush.bf16.msra.mxu3 %v660_v3  ;;  %v664_v16 = vld [vmem:[%s962_s1 + $0x50] sm:$0xff]  ;;  %v507_v17 = vld [vmem:[%s963_s0 + $0x20] sm:$0xf]  ;;  %v641_v18 = vld [vmem:[%s963_s0 + $0x28] sm:$0xf0] }
   0x7   :  { %355 = vmatpush.bf16.msra.mxu1 %v668_v4  ;;  %404 = vmatpush.bf16.msra.mxu2 %v670_v5  ;;  %v508_v19 = vor.u32 %v641_v18, %v507_v17  ;;  %v655_v20 = vld [vmem:[%s962_s1 + $0x8] sm:$0xff]  ;;  %v654_v22 = vld [vmem:[%s962_s1] sm:$0xff]  ;;  %v547_v26 = vld [vmem:[%s963_s0 + $0x78] sm:$0xf] }
   0x8   :  { %v663_v21 = vld [vmem:[%s962_s1 + $0x48] sm:$0xff]  ;;  %v662_v23 = vld [vmem:[%s962_s1 + $0x40] sm:$0xff]  ;;  %v489_v29 = vld [vmem:[%s963_s0 + $0xc] sm:$0xf0] }
   0x9   :  { %v487_v24 = vld [vmem:[%s963_s0] sm:$0xf]  ;;  %v637_v25 = vld [vmem:[%s963_s0 + $0x8] sm:$0xf0]  ;;  %v652_v27 = vld [vmem:[%s963_s0 + $0x80] sm:$0xf0] }
   0xa   :  { %629 = vmatmul.msk.bf16.vlgmr.msra.gmra.mxu2 %vm289_vm0, %v496_v8  ;;  %313 = vmatpush.bf16.msra.mxu0 %v659_v9  ;;  %v636_v28 = vld [vmem:[%s963_s0 + $0x4] sm:$0xf]  ;;  %v488_v30 = vor.u32 %v637_v25, %v487_v24  ;;  %v548_v31 = vor.u32 %v652_v27, %v547_v26  ;;  %v519_v33 = vld [vmem:[%s963_s0 + $0x38] sm:$0xf]  ;;  %v39_v36 = vld [vmem:[%s963_s0 + $0x90] sm:$0x11] }
   0xb   :  { %674 = vmatpush.bf16.msra.mxu3 %v659_v9  ;;  %356 = vmatpush.bf16.msra.mxu1 %v667_v10  ;;  %v492_v32 = vor.u32 %v636_v28, %v489_v29  ;;  %v644_v34 = vld [vmem:[%s963_s0 + $0x40] sm:$0xf0]  ;;  %v499_v37 = vld [vmem:[%s963_s0 + $0x18] sm:$0xf]  ;;  %v143_v39 = vunpack.c.l.b16 %v39_v36  ;;  %v639_v40 = vld [vmem:[%s963_s0 + $0x1c] sm:$0xf]  ;;  %v144_v62 = vunpack.c.h.b16 %v39_v36 }
   0xc   :  { %v520_v35 = vor.u32 %v644_v34, %v519_v33  ;;  %v640_v38 = vld [vmem:[%s963_s0 + $0x20] sm:$0xf0]  ;;  %v501_v41 = vld [vmem:[%s963_s0 + $0x24] sm:$0xf0]  ;;  %v531_v45 = vld [vmem:[%s963_s0 + $0x50] sm:$0xf] }
   0xd   :  { %v500_v42 = vor.u32 %v640_v38, %v499_v37  ;;  %v164_v43 = vpack.c.b16 %v143_v39, %v143_v39  ;;  %v504_v44 = vor.u32 %v639_v40, %v501_v41  ;;  %v647_v46 = vld [vmem:[%s963_s0 + $0x58] sm:$0xf0]  ;;  %v511_v48 = vld [vmem:[%s963_s0 + $0x30] sm:$0xf]  ;;  %v642_v50 = vld [vmem:[%s963_s0 + $0x34] sm:$0xf]  ;;  %v165_v3 = vpack.c.b16 %v144_v62, %v144_v62 }
   0xe   :  { %314 = vmatpush.bf16.msra.mxu0 %v658_v11  ;;  %v532_v47 = vor.u32 %v647_v46, %v531_v45  ;;  %v643_v49 = vld [vmem:[%s963_s0 + $0x38] sm:$0xf0]  ;;  %v513_v51 = vld [vmem:[%s963_s0 + $0x3c] sm:$0xf0]  ;;  %v549_v53 = vld [vmem:[%s963_s0 + $0x84] sm:$0xf0] }
   0xf   :  { %675 = vmatpush.bf16.msra.mxu3 %v658_v11  ;;  %357 = vmatpush.bf16.msra.mxu1 %v666_v12  ;;  %v651_v52 = vld [vmem:[%s963_s0 + $0x7c] sm:$0xf]  ;;  %v512_v54 = vor.u32 %v643_v49, %v511_v48  ;;  %v516_v55 = vor.u32 %v642_v50, %v513_v51  ;;  %v543_v57 = vld [vmem:[%s963_s0 + $0x68] sm:$0xf]  ;;  %v650_v58 = vld [vmem:[%s963_s0 + $0x70] sm:$0xf0] }
  0x10   :  { %v552_v56 = vor.u32 %v651_v52, %v549_v53  ;;  %v544_v59 = vor.u32 %v650_v58, %v543_v57  ;;  %v523_v60 = vld [vmem:[%s963_s0 + $0x48] sm:$0xf]  ;;  %v646_v61 = vld [vmem:[%s963_s0 + $0x50] sm:$0xf0]  ;;  %v645_v63 = vld [vmem:[%s963_s0 + $0x4c] sm:$0xf] }
  0x11   :  { %v525_v0 = vld [vmem:[%s963_s0 + $0x54] sm:$0xf0]  ;;  %v653_v5 = vld [vmem:[%s963_s0 + $0x88] sm:$0xf0]  ;;  %v535_v7 = vld [vmem:[%s963_s0 + $0x60] sm:$0xf] }
  0x12   :  { %315 = vmatpush.bf16.msra.mxu0 %v657_v13  ;;  %v528_v2 = vor.u32 %v645_v63, %v525_v0  ;;  %v649_v8 = vld [vmem:[%s963_s0 + $0x68] sm:$0xf0]  ;;  %v648_v9 = vld [vmem:[%s963_s0 + $0x64] sm:$0xf]  ;;  %v887_v18 = vld [vmem:[%s964_s2] ss:$0 sm:$0xff] }
  0x13   :  { %676 = vmatpush.bf16.msra.mxu3 %v657_v13  ;;  %358 = vmatpush.bf16.msra.mxu1 %v665_v14  ;;  %v536_v11 = vor.u32 %v649_v8, %v535_v7  ;;  %v40_v13 = vld [vmem:[%s963_s0 + $0x98] sm:$0x1] }
  0x16   :  { %316 = vmatpush.bf16.msra.mxu0 %v656_v15 }
  0x17   :  { %677 = vmatpush.bf16.msra.mxu3 %v656_v15  ;;  %359 = vmatpush.bf16.msra.mxu1 %v664_v16 }
  0x1a   :  { %630 = vmatmul.msk.bf16.gmra.mxu2 %vm289_vm0, %v508_v19  ;;  %317 = vmatpush.bf16.msra.mxu0 %v655_v20 }
  0x1b   :  { %678 = vmatpush.bf16.msra.mxu3 %v655_v20  ;;  %360 = vmatpush.bf16.msra.mxu1 %v663_v21 }
  0x1e   :  { %318 = vmatpush.bf16.msra.mxu0 %v654_v22 }
  0x1f   :  { %679 = vmatpush.bf16.msra.mxu3 %v654_v22  ;;  %361 = vmatpush.bf16.msra.mxu1 %v662_v23 }
  0x21   :  { %319 = vmatmul.bf16.vlgmr.msra.gmra.mxu0 %v488_v30 }
  0x22   :  { %344 = vmatmul.bf16.vlgmr.msra.gmra.mxu3 %v548_v31  ;;  %362 = vmatmul.bf16.vlgmr.msra.gmra.mxu1 %v492_v32 }
  0x23   :  { %680 = vmatpush.bf16.msrb.mxu3 %v669_v1  ;;  %v524_v1 = vor.u32 %v646_v61, %v523_v60 }
  0x27   :  { %681 = vmatpush.bf16.msrb.mxu3 %v668_v4  ;;  %v555_v4 = vld [vmem:[%s963_s0 + $0x80] sm:$0xf] }
  0x28   :  { %v556_v6 = vor.u32 %v653_v5, %v555_v4 }
  0x2a   :  { %631 = vmatmul.msk.bf16.gmra.mxu2 %vm289_vm0, %v520_v35 }
  0x2b   :  { %682 = vmatpush.bf16.msrb.mxu3 %v667_v10  ;;  %v537_v10 = vld [vmem:[%s963_s0 + $0x6c] sm:$0xf0] }
  0x2f   :  { %683 = vmatpush.bf16.msrb.mxu3 %v666_v12  ;;  %v540_v12 = vor.u32 %v648_v9, %v537_v10 }
  0x31   :  { %324 = vmatmul.bf16.gmra.mxu0 %v500_v42 }
  0x32   :  { %349 = vmatmul.bf16.gmra.mxu3 %v164_v43  ;;  %367 = vmatmul.bf16.gmra.mxu1 %v504_v44 }
  0x33   :  { %684 = vmatpush.bf16.msrb.mxu3 %v665_v14  ;;  %v145_v14 = vunpack.c.l.b16 %v40_v13 }
  0x35   :  { %v166_v15 = vpack.c.b16 %v145_v14, %v145_v14 }
  0x37   :  { %685 = vmatpush.bf16.msrb.mxu3 %v664_v16 }
  0x3a   :  { %632 = vmatmul.msk.bf16.gmra.mxu2 %vm289_vm0, %v532_v47 }
  0x3b   :  { %686 = vmatpush.bf16.msrb.mxu3 %v663_v21 }
  0x3f   :  { %687 = vmatpush.bf16.msrb.mxu3 %v662_v23 }
  0x41   :  { %329 = vmatmul.bf16.gmra.mxu0 %v512_v54 }
  0x42   :  { %372 = vmatmul.bf16.gmra.mxu1 %v516_v55  ;;  %387 = vmatmul.bf16.vlgmr.msrb.gmra.mxu3 %v552_v56 }
  0x4a   :  { %633 = vmatmul.msk.bf16.gmra.mxu2 %vm289_vm0, %v544_v59 }
  0x51   :  { %334 = vmatmul.bf16.gmra.mxu0 %v524_v1 }
  0x52   :  { %377 = vmatmul.bf16.gmra.mxu1 %v528_v2  ;;  %392 = vmatmul.bf16.gmra.mxu3 %v165_v3 }
  0x5a   :  { %634 = vmatmul.msk.bf16.gmra.mxu2 %vm289_vm0, %v556_v6 }
  0x61   :  { %339 = vmatmul.bf16.gmra.mxu0 %v536_v11 }
  0x62   :  { %382 = vmatmul.bf16.gmra.mxu1 %v540_v12 }
  0x6a   :  { %635 = vmatmul.msk.bf16.gmra.mxu2 %vm289_vm0, %v166_v15 }
  0x8d   :  { %v406_v16 = vpop.f32.mrf.mxu2 }
  0x95   :  { %v408_v17 = vpop.f32.mrf.mxu2 }
  0x9d   :  { %v411_v19 = vpop.f32.mrf.mxu2 }
  0x9e   :  { %v320_v20 = vpop.f32.mrf.mxu0 }
  0x9f   :  { %v321_v21 = vadd.f32 %v887_v18, %v320_v20  ;;  %v363_v22 = vpop.f32.mrf.mxu1 }
  0xa1   :  { %v364_v23 = vadd.f32 %v363_v22, %v321_v21 }
  0xa3   :  { %v407_v24 = vadd.f32 %v406_v16, %v364_v23 }
  0xa5   :  { %v440_v25 = vmax.f32 %v407_v24, 0.0  ;;  %v890_v26 = vpop.f32.mrf.mxu3  ;;  %v413_v27 = vpop.f32.mrf.mxu2 }
  0xa6   :  { %v322_v28 = vpop.f32.mrf.mxu0  ;;  %v346_v24 = vadd.f32 %v887_v18, %v890_v26 }
  0xa7   :  { %v453_v29 = vpack.c.bf16 %v440_v25, %v440_v25  ;;  %v323_v30 = vadd.f32 %v887_v18, %v322_v28  ;;  %v365_v31 = vpop.f32.mrf.mxu1 }
  0xa9   :  { %467 = vst.msk [vmem:[%s965_s3] sm:$0xf] %vm466_vm1, %v453_v29  ;;  %v366_v32 = vadd.f32 %v365_v31, %v323_v30 }
  0xab   :  { %v409_v33 = vadd.f32 %v408_v17, %v366_v32 }
  0xad   :  { %v441_v34 = vmax.f32 %v409_v33, 0.0  ;;  %v897_v35 = vpop.f32.mrf.mxu3  ;;  %v416_v36 = vpop.f32.mrf.mxu2 }
  0xae   :  { %v325_v37 = vpop.f32.mrf.mxu0  ;;  %v348_v26 = vadd.f32 %v887_v18, %v897_v35 }
  0xaf   :  { %v454_v38 = vpack.c.bf16 %v441_v34, %v441_v34  ;;  %v326_v39 = vadd.f32 %v887_v18, %v325_v37  ;;  %v368_v40 = vpop.f32.mrf.mxu1 }
  0xb1   :  { %468 = vst.msk [vmem:[%s965_s3 + $0x4] sm:$0xf] %vm466_vm1, %v454_v38  ;;  %v369_v41 = vadd.f32 %v368_v40, %v326_v39 }
  0xb3   :  { %v412_v42 = vadd.f32 %v411_v19, %v369_v41 }
  0xb5   :  { %v442_v43 = vmax.f32 %v412_v42, 0.0  ;;  %v904_v44 = vpop.f32.mrf.mxu3  ;;  %v418_v45 = vpop.f32.mrf.mxu2 }
  0xb6   :  { %v327_v46 = vpop.f32.mrf.mxu0 }
  0xb7   :  { %v455_v47 = vpack.c.bf16 %v442_v43, %v442_v43  ;;  %v328_v48 = vadd.f32 %v887_v18, %v327_v46  ;;  %v370_v49 = vpop.f32.mrf.mxu1 }
  0xb9   :  { %469 = vst.msk [vmem:[%s965_s3 + $0x8] sm:$0xf] %vm466_vm1, %v455_v47  ;;  %v371_v50 = vadd.f32 %v370_v49, %v328_v48 }
  0xbb   :  { %v414_v51 = vadd.f32 %v413_v27, %v371_v50 }
  0xbd   :  { %v443_v52 = vmax.f32 %v414_v51, 0.0  ;;  %v352_v53 = vpop.f32.mrf.mxu3  ;;  %v421_v54 = vpop.f32.mrf.mxu2  ;;  %v351_v51 = vadd.f32 %v887_v18, %v904_v44 }
  0xbe   :  { %v330_v55 = vpop.f32.mrf.mxu0 }
  0xbf   :  { %v456_v56 = vpack.c.bf16 %v443_v52, %v443_v52  ;;  %v331_v57 = vadd.f32 %v887_v18, %v330_v55  ;;  %v373_v58 = vpop.f32.mrf.mxu1 }
  0xc1   :  { %470 = vst.msk [vmem:[%s965_s3 + $0xc] sm:$0xf] %vm466_vm1, %v456_v56  ;;  %v374_v59 = vadd.f32 %v373_v58, %v331_v57 }
  0xc3   :  { %v417_v60 = vadd.f32 %v416_v36, %v374_v59 }
  0xc5   :  { %v444_v61 = vmax.f32 %v417_v60, 0.0  ;;  %v388_v62 = vpop.f32.mrf.mxu3  ;;  %v423_v63 = vpop.f32.mrf.mxu2 }
  0xc6   :  { %v332_v0 = vpop.f32.mrf.mxu0  ;;  %v389_v27 = vadd.f32 %v388_v62, %v346_v24 }
  0xc7   :  { %v457_v1 = vpack.c.bf16 %v444_v61, %v444_v61  ;;  %v333_v2 = vadd.f32 %v887_v18, %v332_v0  ;;  %v375_v3 = vpop.f32.mrf.mxu1 }
  0xc9   :  { %471 = vst.msk [vmem:[%s965_s3 + $0x10] sm:$0xf] %vm466_vm1, %v457_v1  ;;  %v376_v4 = vadd.f32 %v375_v3, %v333_v2 }
  0xcb   :  { %v419_v5 = vadd.f32 %v418_v45, %v376_v4 }
  0xcd   :  { %v445_v6 = vmax.f32 %v419_v5, 0.0  ;;  %v390_v7 = vpop.f32.mrf.mxu3  ;;  %v426_v8 = vpop.f32.mrf.mxu2 }
  0xce   :  { %v335_v9 = vpop.f32.mrf.mxu0  ;;  %v391_v41 = vadd.f32 %v390_v7, %v348_v26 }
  0xcf   :  { %v458_v10 = vpack.c.bf16 %v445_v6, %v445_v6  ;;  %v336_v11 = vadd.f32 %v887_v18, %v335_v9  ;;  %v378_v12 = vpop.f32.mrf.mxu1 }
  0xd1   :  { %472 = vst.msk [vmem:[%s965_s3 + $0x14] sm:$0xf] %vm466_vm1, %v458_v10  ;;  %v379_v13 = vadd.f32 %v378_v12, %v336_v11 }
  0xd3   :  { %v422_v14 = vadd.f32 %v421_v54, %v379_v13 }
  0xd5   :  { %v446_v15 = vmax.f32 %v422_v14, 0.0  ;;  %v393_v16 = vpop.f32.mrf.mxu3  ;;  %v428_v17 = vpop.f32.mrf.mxu2 }
  0xd6   :  { %v337_v19 = vpop.f32.mrf.mxu0  ;;  %v394_v54 = vadd.f32 %v393_v16, %v351_v51 }
  0xd7   :  { %v459_v20 = vpack.c.bf16 %v446_v15, %v446_v15  ;;  %v338_v21 = vadd.f32 %v887_v18, %v337_v19  ;;  %v380_v22 = vpop.f32.mrf.mxu1 }
  0xd9   :  { %473 = vst.msk [vmem:[%s965_s3 + $0x18] sm:$0xf] %vm466_vm1, %v459_v20  ;;  %v381_v23 = vadd.f32 %v380_v22, %v338_v21 }
  0xdb   :  { %v424_v25 = vadd.f32 %v423_v63, %v381_v23 }
  0xdd   :  { %v447_v28 = vmax.f32 %v424_v25, 0.0  ;;  %v431_v29 = vpop.f32.mrf.mxu2  ;;  %v395_v30 = vpop.f32.mrf.mxu3 }
  0xde   :  { %v432_v31 = vadd.f32 %v431_v29, %v389_v27  ;;  %v340_v32 = vpop.f32.mrf.mxu0 }
  0xdf   :  { %v460_v33 = vpack.c.bf16 %v447_v28, %v447_v28  ;;  %v341_v34 = vadd.f32 %v887_v18, %v340_v32  ;;  %v383_v36 = vpop.f32.mrf.mxu1 }
  0xe0   :  { %v450_v37 = vmax.f32 %v432_v31, 0.0 }
  0xe1   :  { %474 = vst.msk [vmem:[%s965_s3 + $0x1c] sm:$0xf] %vm466_vm1, %v460_v33  ;;  %v384_v38 = vadd.f32 %v383_v36, %v341_v34 }
  0xe2   :  { %v463_v39 = vpack.c.bf16 %v450_v37, %v450_v37 }
  0xe3   :  { %v427_v40 = vadd.f32 %v426_v8, %v384_v38 }
  0xe4   :  { %477 = vst.msk [vmem:[%s965_s3 + $0x28] sm:$0xf] %vm466_vm1, %v463_v39 }
  0xe5   :  { %v448_v42 = vmax.f32 %v427_v40, 0.0  ;;  %v433_v43 = vpop.f32.mrf.mxu2 }
  0xe6   :  { %v434_v45 = vadd.f32 %v433_v43, %v391_v41  ;;  %v342_v46 = vpop.f32.mrf.mxu0 }
  0xe7   :  { %v461_v47 = vpack.c.bf16 %v448_v42, %v448_v42  ;;  %v343_v48 = vadd.f32 %v887_v18, %v342_v46  ;;  %v385_v50 = vpop.f32.mrf.mxu1 }
  0xe8   :  { %v451_v49 = vmax.f32 %v434_v45, 0.0 }
  0xe9   :  { %475 = vst.msk [vmem:[%s965_s3 + $0x20] sm:$0xf] %vm466_vm1, %v461_v47  ;;  %v386_v35 = vadd.f32 %v385_v50, %v343_v48 }
  0xea   :  { %v464_v52 = vpack.c.bf16 %v451_v49, %v451_v49 }
  0xeb   :  { %v429_v53 = vadd.f32 %v428_v17, %v386_v35 }
  0xec   :  { %478 = vst.msk [vmem:[%s965_s3 + $0x2c] sm:$0xf] %vm466_vm1, %v464_v52 }
  0xed   :  { %v449_v55 = vmax.f32 %v429_v53, 0.0  ;;  %v436_v56 = vpop.f32.mrf.mxu2 }
  0xee   :  { %v437_v57 = vadd.f32 %v436_v56, %v394_v54 }
  0xef   :  { %v462_v58 = vpack.c.bf16 %v449_v55, %v449_v55 }
  0xf0   :  { %v452_v59 = vmax.f32 %v437_v57, 0.0 }
  0xf1   :  { %476 = vst.msk [vmem:[%s965_s3 + $0x24] sm:$0xf] %vm466_vm1, %v462_v58 }
  0xf2   :  { %v465_v18 = vpack.c.bf16 %v452_v59, %v452_v59 }
  0xf4   :  { %480 = vst.msk [vmem:[%s965_s3 + $0x30] sm:$0x1] %vm479_vm2, %v465_v18 }
  0xf5   :  { %v438_v44 = vpop.f32.mrf.mxu2 }

// kernel: vae_forward.7
= control target key start
LH: loop header
LB: loop body
LE: loop exit
PB: predicated region body
PF: predicated region fallthrough
CT: control target
= control target key end

     0   :  { %vm852_vm0 = vcmask 261120   ;;  %vm2306_vm1 = vcmask 123904   ;;  %vm2133_vm2 = vcmask 130048   ;;  %vm2335_vm3 = vcmask 1040384   ;;  %s4273_s1 = inlined_call_operand.vmem [shape: bf16[1568,16], index: 1, kind: input, shape index: {}]   ;;  %s4274_s0 = inlined_call_operand.vmem [shape: bf16[2,1568], index: 0, kind: input, shape index: {}]   ;;  %s4275_s2 = inlined_call_operand.vmem [shape: f32[1,16], index: 2, kind: input, shape index: {}]   ;;  %s4276_s3 = inlined_call_operand.vmem [shape: bf16[1568,16], index: 3, kind: input, shape index: {}]   ;;  %s4277_s4 = inlined_call_operand.vmem [shape: f32[1,16], index: 4, kind: input, shape index: {}]   ;;  %s4278_s8 = inlined_call_operand.vmem [shape: f32[2,16], index: 8, kind: output, shape index: {0}]   ;;  %s4279_s6 = inlined_call_operand.vmem [shape: bf16[16,1568], index: 6, kind: input, shape index: {}]   ;;  %s4280_s5 = inlined_call_operand.vmem [shape: f32[2,16], index: 5, kind: input, shape index: {}]   ;;  %s4281_s9 = inlined_call_operand.vmem [shape: f32[2,16], index: 9, kind: output, shape index: {1}]   ;;  %s4282_s7 = inlined_call_operand.vmem [shape: f32[1,1568], index: 7, kind: input, shape index: {}]   ;;  %s4283_s10 = inlined_call_operand.vmem [shape: bf16[2,1568], index: 10, kind: output, shape index: {2}]  }
   0x1   :  { %v3251_v0 = vld [vmem:[%s4273_s1 + $0x38] sm:$0xff]  ;;  %v3250_v4 = vld [vmem:[%s4273_s1 + $0x30] sm:$0xff]  ;;  %v3249_v8 = vld [vmem:[%s4273_s1 + $0x28] sm:$0xff]  ;;  %vm2339_vm4 = vcmask 1042434   ;;  %vm2343_vm5 = vcmask 1041408   ;;  %vm2349_vm6 = vcmask 1046534  }
   0x2   :  { %v3259_v1 = vld [vmem:[%s4273_s1 + $0x78] sm:$0xff]  ;;  %855 = vmatpush.bf16.msra.mxu0 %v3251_v0  ;;  %v3258_v5 = vld [vmem:[%s4273_s1 + $0x70] sm:$0xff]  ;;  %v3257_v9 = vld [vmem:[%s4273_s1 + $0x68] sm:$0xff]  ;;  %vm2345_vm7 = vcmask 1044484   ;;  %vm2353_vm8 = vcmask 1045508   ;;  %vm2355_vm9 = vcmask 1043456  }
   0x3   :  { %v3267_v2 = vld [vmem:[%s4273_s1 + $0xb8] sm:$0xff]  ;;  %868 = vmatpush.bf16.msra.mxu1 %v3259_v1  ;;  %v3266_v6 = vld [vmem:[%s4273_s1 + $0xb0] sm:$0xff]  ;;  %v3265_v10 = vld [vmem:[%s4273_s1 + $0xa8] sm:$0xff]  ;;  %vm2374_vm10 = vcmask 1041409   ;;  %vm2362_vm12 = vcmask 1043459   ;;  %vm2366_vm14 = vcmask 1044483  }
   0x4   :  { %v3275_v3 = vld [vmem:[%s4273_s1 + $0xf8] sm:$0xff]  ;;  %881 = vmatpush.bf16.msra.mxu2 %v3267_v2  ;;  %v3274_v7 = vld [vmem:[%s4273_s1 + $0xf0] sm:$0xff]  ;;  %v3273_v11 = vld [vmem:[%s4273_s1 + $0xe8] sm:$0xff] }
   0x5   :  { %894 = vmatpush.bf16.msra.mxu3 %v3275_v3  ;;  %v3248_v12 = vld [vmem:[%s4273_s1 + $0x20] sm:$0xff]  ;;  %v3247_v16 = vld [vmem:[%s4273_s1 + $0x18] sm:$0xff]  ;;  %v3246_v21 = vld [vmem:[%s4273_s1 + $0x10] sm:$0xff] }
   0x6   :  { %856 = vmatpush.bf16.msra.mxu0 %v3250_v4  ;;  %v3256_v13 = vld [vmem:[%s4273_s1 + $0x60] sm:$0xff]  ;;  %v3255_v17 = vld [vmem:[%s4273_s1 + $0x58] sm:$0xff]  ;;  %v3254_v22 = vld [vmem:[%s4273_s1 + $0x50] sm:$0xff] }
   0x7   :  { %869 = vmatpush.bf16.msra.mxu1 %v3258_v5  ;;  %v3264_v14 = vld [vmem:[%s4273_s1 + $0xa0] sm:$0xff]  ;;  %v3263_v18 = vld [vmem:[%s4273_s1 + $0x98] sm:$0xff]  ;;  %v3262_v23 = vld [vmem:[%s4273_s1 + $0x90] sm:$0xff] }
   0x8   :  { %882 = vmatpush.bf16.msra.mxu2 %v3266_v6  ;;  %v3272_v15 = vld [vmem:[%s4273_s1 + $0xe0] sm:$0xff]  ;;  %v3271_v19 = vld [vmem:[%s4273_s1 + $0xd8] sm:$0xff]  ;;  %v3270_v24 = vld [vmem:[%s4273_s1 + $0xd0] sm:$0xff] }
   0x9   :  { %895 = vmatpush.bf16.msra.mxu3 %v3274_v7  ;;  %v3577_v20 = vld [vmem:[%s4274_s0] sm:$0xff]  ;;  %v3245_v25 = vld [vmem:[%s4273_s1 + $0x8] sm:$0xff]  ;;  %v3283_v33 = vld [vmem:[%s4273_s1 + $0x138] sm:$0xff] }
   0xa   :  { %857 = vmatpush.bf16.msra.mxu0 %v3249_v8  ;;  %236 = vst [vmem:[#allocation1] ss:$9 sm:$0xff] %v3577_v20  ;;  %v3253_v26 = vld [vmem:[%s4273_s1 + $0x48] sm:$0xff]  ;;  %v3244_v29 = vld [vmem:[%s4273_s1] sm:$0xff]  ;;  %v3291_v34 = vld [vmem:[%s4273_s1 + $0x178] sm:$0xff] }
   0xb   :  { %870 = vmatpush.bf16.msra.mxu1 %v3257_v9  ;;  %v3261_v27 = vld [vmem:[%s4273_s1 + $0x88] sm:$0xff]  ;;  %v3252_v30 = vld [vmem:[%s4273_s1 + $0x40] sm:$0xff]  ;;  %v3299_v35 = vld [vmem:[%s4273_s1 + $0x1b8] sm:$0xff] }
   0xc   :  { %883 = vmatpush.bf16.msra.mxu2 %v3265_v10  ;;  %v3269_v28 = vld [vmem:[%s4273_s1 + $0xc8] sm:$0xff]  ;;  %v3260_v31 = vld [vmem:[%s4273_s1 + $0x80] sm:$0xff]  ;;  %v3307_v36 = vld [vmem:[%s4273_s1 + $0x1f8] sm:$0xff] }
   0xd   :  { %896 = vmatpush.bf16.msra.mxu3 %v3273_v11  ;;  %v3268_v32 = vld [vmem:[%s4273_s1 + $0xc0] sm:$0xff]  ;;  %v3282_v37 = vld [vmem:[%s4273_s1 + $0x130] sm:$0xff]  ;;  %v3643_v45 = vld [vmem:[%s4274_s0 + $0x8] sm:$0x1f] }
   0xe   :  { %858 = vmatpush.bf16.msra.mxu0 %v3248_v12  ;;  %v3290_v40 = vld [vmem:[%s4273_s1 + $0x170] sm:$0xff]  ;;  %v3281_v50 = vld [vmem:[%s4273_s1 + $0x128] sm:$0xff]  ;;  %v3280_v54 = vld [vmem:[%s4273_s1 + $0x120] sm:$0xff] }
   0xf   :  { %871 = vmatpush.bf16.msra.mxu1 %v3256_v13  ;;  %v3298_v43 = vld [vmem:[%s4273_s1 + $0x1b0] sm:$0xff]  ;;  %v3289_v51 = vld [vmem:[%s4273_s1 + $0x168] sm:$0xff]  ;;  %v3288_v55 = vld [vmem:[%s4273_s1 + $0x160] sm:$0xff] }
  0x10   :  { %884 = vmatpush.bf16.msra.mxu2 %v3264_v14  ;;  %v3306_v44 = vld [vmem:[%s4273_s1 + $0x1f0] sm:$0xff]  ;;  %v3297_v52 = vld [vmem:[%s4273_s1 + $0x1a8] sm:$0xff]  ;;  %v3296_v56 = vld [vmem:[%s4273_s1 + $0x1a0] sm:$0xff] }
  0x11   :  { %897 = vmatpush.bf16.msra.mxu3 %v3272_v15  ;;  %v239_v38 = vld [vmem:[#allocation1 + $0x12] sm:$0xff]  ;;  %v237_v39 = vld [vmem:[#allocation1] sm:$0xff]  ;;  %v238_v42 = vld [vmem:[#allocation1 + $0x9] sm:$0xff] }
  0x12   :  { %859 = vmatpush.bf16.msra.mxu0 %v3247_v16  ;;  %v240_v41 = vld [vmem:[#allocation1 + $0x1b] sm:$0xff]  ;;  %v3647_v47 = vld [vmem:[#allocation1 + $0x24] sm:$0xff]  ;;  %v3651_v49 = vld [vmem:[#allocation1 + $0x2d] sm:$0xff] }
  0x13   :  { %872 = vmatpush.bf16.msra.mxu1 %v3255_v17  ;;  %v3645_v46 = vld [vmem:[#allocation1 + $0x36] sm:$0xff]  ;;  %v3649_v48 = vld [vmem:[#allocation1 + $0x3f] sm:$0xff]  ;;  %v3305_v53 = vld [vmem:[%s4273_s1 + $0x1e8] sm:$0xff] }
  0x14   :  { %885 = vmatpush.bf16.msra.mxu2 %v3263_v18  ;;  %246 = vst [vmem:[#allocation1] ss:$9 sm:$0xff] %v3643_v45  ;;  %v3304_v57 = vld [vmem:[%s4273_s1 + $0x1e0] sm:$0xff]  ;;  %v3279_v58 = vld [vmem:[%s4273_s1 + $0x118] sm:$0xff]  ;;  %v3278_v62 = vld [vmem:[%s4273_s1 + $0x110] sm:$0xff] }
  0x15   :  { %898 = vmatpush.bf16.msra.mxu3 %v3271_v19  ;;  %v3287_v59 = vld [vmem:[%s4273_s1 + $0x158] sm:$0xff]  ;;  %v3286_v63 = vld [vmem:[%s4273_s1 + $0x150] sm:$0xff]  ;;  %v3277_v2 = vld [vmem:[%s4273_s1 + $0x108] sm:$0xff] }
  0x16   :  { %860 = vmatpush.bf16.msra.mxu0 %v3246_v21  ;;  %v3295_v60 = vld [vmem:[%s4273_s1 + $0x198] sm:$0xff]  ;;  %v3294_v0 = vld [vmem:[%s4273_s1 + $0x190] sm:$0xff]  ;;  %v3285_v3 = vld [vmem:[%s4273_s1 + $0x148] sm:$0xff] }
  0x17   :  { %873 = vmatpush.bf16.msra.mxu1 %v3254_v22  ;;  %v3303_v61 = vld [vmem:[%s4273_s1 + $0x1d8] sm:$0xff]  ;;  %v3302_v1 = vld [vmem:[%s4273_s1 + $0x1d0] sm:$0xff]  ;;  %v3293_v4 = vld [vmem:[%s4273_s1 + $0x188] sm:$0xff] }
  0x18   :  { %886 = vmatpush.bf16.msra.mxu2 %v3262_v23  ;;  %v3301_v5 = vld [vmem:[%s4273_s1 + $0x1c8] sm:$0xff]  ;;  %v3276_v6 = vld [vmem:[%s4273_s1 + $0x100] sm:$0xff]  ;;  %v3315_v10 = vld [vmem:[%s4273_s1 + $0x238] sm:$0xff] }
  0x19   :  { %899 = vmatpush.bf16.msra.mxu3 %v3270_v24  ;;  %v3284_v7 = vld [vmem:[%s4273_s1 + $0x140] sm:$0xff]  ;;  %v3323_v11 = vld [vmem:[%s4273_s1 + $0x278] sm:$0xff]  ;;  %v3314_v14 = vld [vmem:[%s4273_s1 + $0x230] sm:$0xff] }
  0x1a   :  { %861 = vmatpush.bf16.msra.mxu0 %v3245_v25  ;;  %v3292_v8 = vld [vmem:[%s4273_s1 + $0x180] sm:$0xff]  ;;  %v3331_v12 = vld [vmem:[%s4273_s1 + $0x2b8] sm:$0xff]  ;;  %v3322_v15 = vld [vmem:[%s4273_s1 + $0x270] sm:$0xff] }
  0x1b   :  { %874 = vmatpush.bf16.msra.mxu1 %v3253_v26  ;;  %v3300_v9 = vld [vmem:[%s4273_s1 + $0x1c0] sm:$0xff]  ;;  %v3339_v13 = vld [vmem:[%s4273_s1 + $0x2f8] sm:$0xff]  ;;  %v3330_v16 = vld [vmem:[%s4273_s1 + $0x2b0] sm:$0xff] }
  0x1c   :  { %887 = vmatpush.bf16.msra.mxu2 %v3261_v27  ;;  %v3338_v17 = vld [vmem:[%s4273_s1 + $0x2f0] sm:$0xff]  ;;  %v3313_v18 = vld [vmem:[%s4273_s1 + $0x228] sm:$0xff]  ;;  %v3312_v23 = vld [vmem:[%s4273_s1 + $0x220] sm:$0xff] }
  0x1d   :  { %900 = vmatpush.bf16.msra.mxu3 %v3269_v28  ;;  %v3321_v19 = vld [vmem:[%s4273_s1 + $0x268] sm:$0xff]  ;;  %v3320_v24 = vld [vmem:[%s4273_s1 + $0x260] sm:$0xff]  ;;  %v3311_v27 = vld [vmem:[%s4273_s1 + $0x218] sm:$0xff] }
  0x1e   :  { %862 = vmatpush.bf16.msra.mxu0 %v3244_v29  ;;  %v3329_v21 = vld [vmem:[%s4273_s1 + $0x2a8] sm:$0xff]  ;;  %v3328_v25 = vld [vmem:[%s4273_s1 + $0x2a0] sm:$0xff]  ;;  %v3319_v28 = vld [vmem:[%s4273_s1 + $0x258] sm:$0xff] }
  0x1f   :  { %875 = vmatpush.bf16.msra.mxu1 %v3252_v30  ;;  %v3337_v22 = vld [vmem:[%s4273_s1 + $0x2e8] sm:$0xff]  ;;  %v3336_v26 = vld [vmem:[%s4273_s1 + $0x2e0] sm:$0xff]  ;;  %v3327_v29 = vld [vmem:[%s4273_s1 + $0x298] sm:$0xff] }
  0x20   :  { %888 = vmatpush.bf16.msra.mxu2 %v3260_v31  ;;  %v3335_v30 = vld [vmem:[%s4273_s1 + $0x2d8] sm:$0xff]  ;;  %v247_v31 = vld [vmem:[#allocation1] sm:$0xff]  ;;  %vm2375_vm11 = vmor %vm2374_vm10, %vm2335_vm3 }
  0x21   :  { %901 = vmatpush.bf16.msra.mxu3 %v3268_v32  ;;  %863 = vmatmul.bf16.vlgmr.msra.gmra.mxu0 %v237_v39  ;;  %v249_v32 = vld [vmem:[#allocation1 + $0x12] sm:$0xff]  ;;  %vm2376_vm13 = vmor %vm2339_vm4, %vm2375_vm11 }
  0x22   :  { %907 = vmatpush.bf16.msrb.mxu0 %v3283_v33  ;;  %876 = vmatmul.bf16.vlgmr.msra.gmra.mxu1 %v238_v42  ;;  %v248_v33 = vld [vmem:[#allocation1 + $0x9] sm:$0xff]  ;;  %vm2377_vm15 = vmor %vm2362_vm12, %vm2376_vm13 }
  0x23   :  { %920 = vmatpush.bf16.msrb.mxu1 %v3291_v34  ;;  %889 = vmatmul.bf16.vlgmr.msra.gmra.mxu2 %v239_v38  ;;  %v250_v34 = vld [vmem:[#allocation1 + $0x1b] sm:$0xff]  ;;  %v3326_v38 = vld [vmem:[%s4273_s1 + $0x290] sm:$0xff]  ;;  %v3333_v42 = vld [vmem:[%s4273_s1 + $0x2c8] sm:$0xff] }
  0x24   :  { %933 = vmatpush.bf16.msrb.mxu2 %v3299_v35  ;;  %902 = vmatmul.bf16.vlgmr.msra.gmra.mxu3 %v240_v41  ;;  %v3790_v35 = vld [vmem:[#allocation1 + $0x24] sm:$0xff]  ;;  %v3334_v39 = vld [vmem:[%s4273_s1 + $0x2d0] sm:$0xff] }
  0x25   :  { %946 = vmatpush.bf16.msrb.mxu3 %v3307_v36  ;;  %v3310_v36 = vld [vmem:[%s4273_s1 + $0x210] sm:$0xff]  ;;  %1224 = vst [vmem:[#allocation1] ss:$9 sm:$0xff] %v3577_v20  ;;  %v3317_v20 = vld [vmem:[%s4273_s1 + $0x248] sm:$0xff] }
  0x26   :  { %908 = vmatpush.bf16.msrb.mxu0 %v3282_v37  ;;  %v3318_v37 = vld [vmem:[%s4273_s1 + $0x250] sm:$0xff]  ;;  %v3325_v41 = vld [vmem:[%s4273_s1 + $0x288] sm:$0xff] }
  0x27   :  { %921 = vmatpush.bf16.msrb.mxu1 %v3290_v40  ;;  %v3309_v40 = vld [vmem:[%s4273_s1 + $0x208] sm:$0xff] }
  0x28   :  { %934 = vmatpush.bf16.msrb.mxu2 %v3298_v43  ;;  %v3308_v43 = vld [vmem:[%s4273_s1 + $0x200] sm:$0xff] }
  0x29   :  { %947 = vmatpush.bf16.msrb.mxu3 %v3306_v44  ;;  %v3316_v44 = vld [vmem:[%s4273_s1 + $0x240] sm:$0xff] }
  0x2a   :  { %909 = vmatpush.bf16.msrb.mxu0 %v3281_v50  ;;  %v3365_v50 = vld [vmem:[%s4276_s3 + $0xb8] sm:$0xff] }
  0x2b   :  { %922 = vmatpush.bf16.msrb.mxu1 %v3289_v51  ;;  %v3341_v51 = vld [vmem:[%s4273_s1 + $0x308] sm:$0xff] }
  0x2c   :  { %935 = vmatpush.bf16.msrb.mxu2 %v3297_v52  ;;  %v3348_v52 = vld [vmem:[%s4276_s3 + $0x30] sm:$0xff] }
  0x2d   :  { %948 = vmatpush.bf16.msrb.mxu3 %v3305_v53  ;;  %v3356_v53 = vld [vmem:[%s4276_s3 + $0x70] sm:$0xff] }
  0x2e   :  { %910 = vmatpush.bf16.msrb.mxu0 %v3280_v54  ;;  %v3364_v54 = vld [vmem:[%s4276_s3 + $0xb0] sm:$0xff] }
  0x2f   :  { %923 = vmatpush.bf16.msrb.mxu1 %v3288_v55  ;;  %v3340_v55 = vld [vmem:[%s4273_s1 + $0x300] sm:$0xff] }
  0x30   :  { %936 = vmatpush.bf16.msrb.mxu2 %v3296_v56  ;;  %v3373_v56 = vld [vmem:[%s4276_s3 + $0xf8] sm:$0xff] }
  0x31   :  { %949 = vmatpush.bf16.msrb.mxu3 %v3304_v57  ;;  %v3347_v57 = vld [vmem:[%s4276_s3 + $0x28] sm:$0xff] }
  0x32   :  { %911 = vmatpush.bf16.msrb.mxu0 %v3279_v58  ;;  %v3355_v58 = vld [vmem:[%s4276_s3 + $0x68] sm:$0xff] }
  0x33   :  { %924 = vmatpush.bf16.msrb.mxu1 %v3287_v59  ;;  %v3363_v59 = vld [vmem:[%s4276_s3 + $0xa8] sm:$0xff] }
  0x34   :  { %937 = vmatpush.bf16.msrb.mxu2 %v3295_v60  ;;  %v3372_v60 = vld [vmem:[%s4276_s3 + $0xf0] sm:$0xff] }
  0x35   :  { %950 = vmatpush.bf16.msrb.mxu3 %v3303_v61  ;;  %v3346_v61 = vld [vmem:[%s4276_s3 + $0x20] sm:$0xff] }
  0x36   :  { %912 = vmatpush.bf16.msrb.mxu0 %v3278_v62  ;;  %v3354_v62 = vld [vmem:[%s4276_s3 + $0x60] sm:$0xff] }
  0x37   :  { %925 = vmatpush.bf16.msrb.mxu1 %v3286_v63  ;;  %v3362_v63 = vld [vmem:[%s4276_s3 + $0xa0] sm:$0xff] }
  0x38   :  { %938 = vmatpush.bf16.msrb.mxu2 %v3294_v0  ;;  %v3371_v0 = vld [vmem:[%s4276_s3 + $0xe8] sm:$0xff] }
  0x39   :  { %951 = vmatpush.bf16.msrb.mxu3 %v3302_v1  ;;  %v3345_v1 = vld [vmem:[%s4276_s3 + $0x18] sm:$0xff] }
  0x3a   :  { %913 = vmatpush.bf16.msrb.mxu0 %v3277_v2  ;;  %v3353_v2 = vld [vmem:[%s4276_s3 + $0x58] sm:$0xff] }
  0x3b   :  { %926 = vmatpush.bf16.msrb.mxu1 %v3285_v3  ;;  %v3361_v3 = vld [vmem:[%s4276_s3 + $0x98] sm:$0xff] }
  0x3c   :  { %939 = vmatpush.bf16.msrb.mxu2 %v3293_v4  ;;  %v3370_v4 = vld [vmem:[%s4276_s3 + $0xe0] sm:$0xff] }
  0x3d   :  { %952 = vmatpush.bf16.msrb.mxu3 %v3301_v5  ;;  %v3344_v5 = vld [vmem:[%s4276_s3 + $0x10] sm:$0xff] }
  0x3e   :  { %914 = vmatpush.bf16.msrb.mxu0 %v3276_v6  ;;  %v3352_v6 = vld [vmem:[%s4276_s3 + $0x50] sm:$0xff] }
  0x3f   :  { %927 = vmatpush.bf16.msrb.mxu1 %v3284_v7  ;;  %v3360_v7 = vld [vmem:[%s4276_s3 + $0x90] sm:$0xff] }
  0x40   :  { %940 = vmatpush.bf16.msrb.mxu2 %v3292_v8  ;;  %v3369_v8 = vld [vmem:[%s4276_s3 + $0xd8] sm:$0xff] }
  0x41   :  { %953 = vmatpush.bf16.msrb.mxu3 %v3300_v9  ;;  %915 = vmatmul.bf16.vlgmr.msrb.gmra.mxu0 %v3647_v47  ;;  %v3332_v47 = vld [vmem:[%s4273_s1 + $0x2c0] sm:$0xff]  ;;  %v3343_v9 = vld [vmem:[%s4276_s3 + $0x8] sm:$0xff] }
  0x42   :  { %959 = vmatpush.bf16.msra.mxu0 %v3315_v10  ;;  %928 = vmatmul.bf16.vlgmr.msrb.gmra.mxu1 %v3651_v49  ;;  %v3357_v49 = vld [vmem:[%s4276_s3 + $0x78] sm:$0xff]  ;;  %v3351_v10 = vld [vmem:[%s4276_s3 + $0x48] sm:$0xff] }
  0x43   :  { %972 = vmatpush.bf16.msra.mxu1 %v3323_v11  ;;  %941 = vmatmul.bf16.vlgmr.msrb.gmra.mxu2 %v3645_v46  ;;  %v3324_v46 = vld [vmem:[%s4273_s1 + $0x280] sm:$0xff]  ;;  %v3359_v11 = vld [vmem:[%s4276_s3 + $0x88] sm:$0xff] }
  0x44   :  { %985 = vmatpush.bf16.msra.mxu2 %v3331_v12  ;;  %954 = vmatmul.bf16.vlgmr.msrb.gmra.mxu3 %v3649_v48  ;;  %v3349_v48 = vld [vmem:[%s4276_s3 + $0x38] sm:$0xff]  ;;  %v3368_v12 = vld [vmem:[%s4276_s3 + $0xd0] sm:$0xff] }
  0x45   :  { %998 = vmatpush.bf16.msra.mxu3 %v3339_v13  ;;  %v3342_v13 = vld [vmem:[%s4276_s3] sm:$0xff] }
  0x46   :  { %960 = vmatpush.bf16.msra.mxu0 %v3314_v14  ;;  %v3350_v14 = vld [vmem:[%s4276_s3 + $0x40] sm:$0xff] }
  0x47   :  { %973 = vmatpush.bf16.msra.mxu1 %v3322_v15  ;;  %v3358_v15 = vld [vmem:[%s4276_s3 + $0x80] sm:$0xff] }
  0x48   :  { %986 = vmatpush.bf16.msra.mxu2 %v3330_v16  ;;  %v3381_v16 = vld [vmem:[%s4276_s3 + $0x138] sm:$0xff] }
  0x49   :  { %999 = vmatpush.bf16.msra.mxu3 %v3338_v17  ;;  %v3389_v17 = vld [vmem:[%s4276_s3 + $0x178] sm:$0xff] }
  0x4a   :  { %961 = vmatpush.bf16.msra.mxu0 %v3313_v18  ;;  %v3397_v18 = vld [vmem:[%s4276_s3 + $0x1b8] sm:$0xff] }
  0x4b   :  { %974 = vmatpush.bf16.msra.mxu1 %v3321_v19  ;;  %v3367_v19 = vld [vmem:[%s4276_s3 + $0xc8] sm:$0xff] }
  0x4c   :  { %987 = vmatpush.bf16.msra.mxu2 %v3329_v21  ;;  %v1226_v21 = vld [vmem:[#allocation1 + $0x9] sm:$0xff] }
  0x4d   :  { %1000 = vmatpush.bf16.msra.mxu3 %v3337_v22  ;;  %v3380_v22 = vld [vmem:[%s4276_s3 + $0x130] sm:$0xff] }
  0x4e   :  { %962 = vmatpush.bf16.msra.mxu0 %v3312_v23  ;;  %v1227_v23 = vld [vmem:[#allocation1 + $0x12] sm:$0xff] }
  0x4f   :  { %975 = vmatpush.bf16.msra.mxu1 %v3320_v24  ;;  %v1225_v24 = vld [vmem:[#allocation1] sm:$0xff] }
  0x50   :  { %988 = vmatpush.bf16.msra.mxu2 %v3328_v25  ;;  %v3388_v25 = vld [vmem:[%s4276_s3 + $0x170] sm:$0xff] }
  0x51   :  { %1001 = vmatpush.bf16.msra.mxu3 %v3336_v26  ;;  %v3396_v26 = vld [vmem:[%s4276_s3 + $0x1b0] sm:$0xff] }
  0x52   :  { %963 = vmatpush.bf16.msra.mxu0 %v3311_v27  ;;  %v3366_v27 = vld [vmem:[%s4276_s3 + $0xc0] sm:$0xff] }
  0x53   :  { %976 = vmatpush.bf16.msra.mxu1 %v3319_v28  ;;  %v3405_v28 = vld [vmem:[%s4276_s3 + $0x1f8] sm:$0xff] }
  0x54   :  { %989 = vmatpush.bf16.msra.mxu2 %v3327_v29  ;;  %v3379_v29 = vld [vmem:[%s4276_s3 + $0x128] sm:$0xff] }
  0x55   :  { %1002 = vmatpush.bf16.msra.mxu3 %v3335_v30  ;;  %v3387_v30 = vld [vmem:[%s4276_s3 + $0x168] sm:$0xff] }
  0x56   :  { %964 = vmatpush.bf16.msra.mxu0 %v3310_v36  ;;  %v3394_v36 = vld [vmem:[%s4276_s3 + $0x1a0] sm:$0xff] }
  0x57   :  { %977 = vmatpush.bf16.msra.mxu1 %v3318_v37  ;;  %v3403_v37 = vld [vmem:[%s4276_s3 + $0x1e8] sm:$0xff] }
  0x58   :  { %990 = vmatpush.bf16.msra.mxu2 %v3326_v38  ;;  %v1230_v38 = vld [vmem:[#allocation1 + $0x2d] sm:$0xff] }
  0x59   :  { %1003 = vmatpush.bf16.msra.mxu3 %v3334_v39  ;;  %v1231_v39 = vld [vmem:[#allocation1 + $0x36] sm:$0xff] }
  0x5a   :  { %965 = vmatpush.bf16.msra.mxu0 %v3309_v40  ;;  %v1229_v40 = vld [vmem:[#allocation1 + $0x24] sm:$0xff] }
  0x5b   :  { %978 = vmatpush.bf16.msra.mxu1 %v3317_v20  ;;  %v3978_v20 = vld [vmem:[#allocation1 + $0x3f] sm:$0xff] }
  0x5c   :  { %991 = vmatpush.bf16.msra.mxu2 %v3325_v41  ;;  %v3377_v41 = vld [vmem:[%s4276_s3 + $0x118] sm:$0xff] }
  0x5d   :  { %1004 = vmatpush.bf16.msra.mxu3 %v3333_v42  ;;  %v3385_v42 = vld [vmem:[%s4276_s3 + $0x158] sm:$0xff] }
  0x5e   :  { %966 = vmatpush.bf16.msra.mxu0 %v3308_v43  ;;  %v3393_v43 = vld [vmem:[%s4276_s3 + $0x198] sm:$0xff] }
  0x5f   :  { %979 = vmatpush.bf16.msra.mxu1 %v3316_v44  ;;  %v3402_v44 = vld [vmem:[%s4276_s3 + $0x1e0] sm:$0xff] }
  0x60   :  { %992 = vmatpush.bf16.msra.mxu2 %v3324_v46  ;;  %v3384_v46 = vld [vmem:[%s4276_s3 + $0x150] sm:$0xff] }
  0x61   :  { %1005 = vmatpush.bf16.msra.mxu3 %v3332_v47  ;;  %967 = vmatmul.bf16.vlgmr.msra.gmra.mxu0 %v247_v31  ;;  %v3395_v31 = vld [vmem:[%s4276_s3 + $0x1a8] sm:$0xff]  ;;  %v3392_v47 = vld [vmem:[%s4276_s3 + $0x190] sm:$0xff] }
  0x62   :  { %1017 = vmatpush.bf16.msrb.mxu0 %v3341_v51  ;;  %980 = vmatmul.bf16.vlgmr.msra.gmra.mxu1 %v248_v33  ;;  %v1228_v33 = vld [vmem:[#allocation1 + $0x1b] sm:$0xff]  ;;  %v3391_v51 = vld [vmem:[%s4276_s3 + $0x188] sm:$0xff] }
  0x63   :  { %1841 = vmatpush.bf16.msrb.mxu1 %v3349_v48  ;;  %993 = vmatmul.bf16.vlgmr.msra.gmra.mxu2 %v249_v32  ;;  %v3404_v32 = vld [vmem:[%s4276_s3 + $0x1f0] sm:$0xff]  ;;  %1233 = vst [vmem:[#allocation1] ss:$9 sm:$0xff] %v3643_v45  ;;  %v3401_v48 = vld [vmem:[%s4276_s3 + $0x1d8] sm:$0xff] }
  0x64   :  { %1854 = vmatpush.bf16.msrb.mxu2 %v3357_v49  ;;  %1006 = vmatmul.bf16.vlgmr.msra.gmra.mxu3 %v250_v34  ;;  %v3378_v34 = vld [vmem:[%s4276_s3 + $0x120] sm:$0xff]  ;;  %v3376_v45 = vld [vmem:[%s4276_s3 + $0x110] sm:$0xff]  ;;  %v3375_v49 = vld [vmem:[%s4276_s3 + $0x108] sm:$0xff] }
  0x65   :  { %1867 = vmatpush.bf16.msrb.mxu3 %v3365_v50  ;;  %v3383_v50 = vld [vmem:[%s4276_s3 + $0x148] sm:$0xff] }
  0x66   :  { %1018 = vmatpush.bf16.msrb.mxu0 %v3340_v55  ;;  %v3390_v55 = vld [vmem:[%s4276_s3 + $0x180] sm:$0xff] }
  0x67   :  { %1842 = vmatpush.bf16.msrb.mxu1 %v3348_v52  ;;  %v3400_v52 = vld [vmem:[%s4276_s3 + $0x1d0] sm:$0xff] }
  0x68   :  { %1855 = vmatpush.bf16.msrb.mxu2 %v3356_v53  ;;  %v3374_v53 = vld [vmem:[%s4276_s3 + $0x100] sm:$0xff] }
  0x69   :  { %1868 = vmatpush.bf16.msrb.mxu3 %v3364_v54  ;;  %v3382_v54 = vld [vmem:[%s4276_s3 + $0x140] sm:$0xff] }
  0x6a   :  { %1880 = vmatpush.bf16.msra.mxu0 %v3373_v56  ;;  %v3413_v56 = vld [vmem:[%s4276_s3 + $0x238] sm:$0xff] }
  0x6b   :  { %1843 = vmatpush.bf16.msrb.mxu1 %v3347_v57  ;;  %v3421_v57 = vld [vmem:[%s4276_s3 + $0x278] sm:$0xff] }
  0x6c   :  { %1856 = vmatpush.bf16.msrb.mxu2 %v3355_v58  ;;  %v3429_v58 = vld [vmem:[%s4276_s3 + $0x2b8] sm:$0xff] }
  0x6d   :  { %1869 = vmatpush.bf16.msrb.mxu3 %v3363_v59  ;;  %v3399_v59 = vld [vmem:[%s4276_s3 + $0x1c8] sm:$0xff] }
  0x6e   :  { %1881 = vmatpush.bf16.msra.mxu0 %v3372_v60  ;;  %v3412_v60 = vld [vmem:[%s4276_s3 + $0x230] sm:$0xff] }
  0x6f   :  { %1844 = vmatpush.bf16.msrb.mxu1 %v3346_v61  ;;  %v3420_v61 = vld [vmem:[%s4276_s3 + $0x270] sm:$0xff] }
  0x70   :  { %1857 = vmatpush.bf16.msrb.mxu2 %v3354_v62  ;;  %v3428_v62 = vld [vmem:[%s4276_s3 + $0x2b0] sm:$0xff] }
  0x71   :  { %1870 = vmatpush.bf16.msrb.mxu3 %v3362_v63  ;;  %2785 = vmatmul.msk.bf16.vlgmr.msrb.gmra.mxu0 %vm852_vm0, %v3790_v35  ;;  %v3386_v35 = vld [vmem:[%s4276_s3 + $0x160] sm:$0xff] }
  0x72   :  { %1882 = vmatpush.bf16.msra.mxu0 %v3371_v0  ;;  %v3398_v63 = vld [vmem:[%s4276_s3 + $0x1c0] sm:$0xff]  ;;  %v3437_v0 = vld [vmem:[%s4276_s3 + $0x2f8] sm:$0xff] }
  0x73   :  { %1845 = vmatpush.bf16.msrb.mxu1 %v3345_v1  ;;  %v3411_v1 = vld [vmem:[%s4276_s3 + $0x228] sm:$0xff] }
  0x74   :  { %1858 = vmatpush.bf16.msrb.mxu2 %v3353_v2  ;;  %v3419_v2 = vld [vmem:[%s4276_s3 + $0x268] sm:$0xff] }
  0x75   :  { %1871 = vmatpush.bf16.msrb.mxu3 %v3361_v3  ;;  %v3427_v3 = vld [vmem:[%s4276_s3 + $0x2a8] sm:$0xff] }
  0x76   :  { %1883 = vmatpush.bf16.msra.mxu0 %v3370_v4  ;;  %v3436_v4 = vld [vmem:[%s4276_s3 + $0x2f0] sm:$0xff] }
  0x77   :  { %1846 = vmatpush.bf16.msrb.mxu1 %v3344_v5  ;;  %v3410_v5 = vld [vmem:[%s4276_s3 + $0x220] sm:$0xff] }
  0x78   :  { %1859 = vmatpush.bf16.msrb.mxu2 %v3352_v6  ;;  %v3418_v6 = vld [vmem:[%s4276_s3 + $0x260] sm:$0xff] }
  0x79   :  { %1872 = vmatpush.bf16.msrb.mxu3 %v3360_v7 }
  0x7a   :  { %1884 = vmatpush.bf16.msra.mxu0 %v3369_v8  ;;  %v3426_v8 = vld [vmem:[%s4276_s3 + $0x2a0] sm:$0xff] }
  0x7b   :  { %1847 = vmatpush.bf16.msrb.mxu1 %v3343_v9 }
  0x7c   :  { %1860 = vmatpush.bf16.msrb.mxu2 %v3351_v10  ;;  %v3435_v10 = vld [vmem:[%s4276_s3 + $0x2e8] sm:$0xff] }
  0x7d   :  { %1873 = vmatpush.bf16.msrb.mxu3 %v3359_v11  ;;  %v3409_v11 = vld [vmem:[%s4276_s3 + $0x218] sm:$0xff] }
  0x7e   :  { %1885 = vmatpush.bf16.msra.mxu0 %v3368_v12  ;;  %v3417_v12 = vld [vmem:[%s4276_s3 + $0x258] sm:$0xff] }
  0x7f   :  { %1848 = vmatpush.bf16.msrb.mxu1 %v3342_v13  ;;  %v3425_v13 = vld [vmem:[%s4276_s3 + $0x298] sm:$0xff] }
  0x80   :  { %1861 = vmatpush.bf16.msrb.mxu2 %v3350_v14  ;;  %v3434_v14 = vld [vmem:[%s4276_s3 + $0x2e0] sm:$0xff] }
  0x81   :  { %1874 = vmatpush.bf16.msrb.mxu3 %v3358_v15 }
  0x82   :  { %1886 = vmatpush.bf16.msra.mxu0 %v3367_v19  ;;  %1849 = vmatmul.bf16.vlgmr.msrb.gmra.mxu1 %v1225_v24  ;;  %v3407_v24 = vld [vmem:[%s4276_s3 + $0x208] sm:$0xff] }
  0x83   :  { %1893 = vmatpush.bf16.msra.mxu1 %v3381_v16  ;;  %1862 = vmatmul.bf16.vlgmr.msrb.gmra.mxu2 %v1226_v21  ;;  %v3424_v21 = vld [vmem:[%s4276_s3 + $0x290] sm:$0xff] }
  0x84   :  { %1906 = vmatpush.bf16.msra.mxu2 %v3389_v17  ;;  %1875 = vmatmul.bf16.vlgmr.msrb.gmra.mxu3 %v1227_v23  ;;  %v3408_v17 = vld [vmem:[%s4276_s3 + $0x210] sm:$0xff]  ;;  %v3433_v23 = vld [vmem:[%s4276_s3 + $0x2d8] sm:$0xff] }
  0x85   :  { %1919 = vmatpush.bf16.msra.mxu3 %v3397_v18  ;;  %v3416_v18 = vld [vmem:[%s4276_s3 + $0x250] sm:$0xff] }
  0x86   :  { %1887 = vmatpush.bf16.msra.mxu0 %v3366_v27  ;;  %v3432_v27 = vld [vmem:[%s4276_s3 + $0x2d0] sm:$0xff] }
  0x87   :  { %1894 = vmatpush.bf16.msra.mxu1 %v3380_v22 }
  0x88   :  { %1907 = vmatpush.bf16.msra.mxu2 %v3388_v25  ;;  %v3415_v25 = vld [vmem:[%s4276_s3 + $0x248] sm:$0xff] }
  0x89   :  { %1920 = vmatpush.bf16.msra.mxu3 %v3396_v26  ;;  %1888 = vmatmul.bf16.vlgmr.msra.gmra.mxu0 %v1228_v33  ;;  %v3423_v26 = vld [vmem:[%s4276_s3 + $0x288] sm:$0xff] }
  0x8a   :  { %1932 = vmatpush.bf16.msrb.mxu0 %v3405_v28  ;;  %v3439_v33 = vld [vmem:[%s4276_s3 + $0x308] sm:$0xff] }
  0x8b   :  { %1895 = vmatpush.bf16.msra.mxu1 %v3379_v29 }
  0x8c   :  { %1908 = vmatpush.bf16.msra.mxu2 %v3387_v30  ;;  %v3406_v30 = vld [vmem:[%s4276_s3 + $0x200] sm:$0xff] }
  0x8d   :  { %1921 = vmatpush.bf16.msra.mxu3 %v3395_v31  ;;  %v3414_v31 = vld [vmem:[%s4276_s3 + $0x240] sm:$0xff] }
  0x8e   :  { %1933 = vmatpush.bf16.msrb.mxu0 %v3404_v32  ;;  %v3422_v32 = vld [vmem:[%s4276_s3 + $0x280] sm:$0xff] }
  0x8f   :  { %1896 = vmatpush.bf16.msra.mxu1 %v3378_v34  ;;  %v3431_v34 = vld [vmem:[%s4276_s3 + $0x2c8] sm:$0xff] }
  0x90   :  { %1909 = vmatpush.bf16.msra.mxu2 %v3386_v35  ;;  %v1234_v35 = vld [vmem:[#allocation1] sm:$0xff] }
  0x91   :  { %1922 = vmatpush.bf16.msra.mxu3 %v3394_v36  ;;  %v1235_v36 = vld [vmem:[#allocation1 + $0x9] sm:$0xff] }
  0x92   :  { %1934 = vmatpush.bf16.msrb.mxu0 %v3403_v37  ;;  %v1236_v37 = vld [vmem:[#allocation1 + $0x12] sm:$0xff] }
  0x93   :  { %1897 = vmatpush.bf16.msra.mxu1 %v3377_v41  ;;  %v3453_v41 = vld [vmem:[%s4275_s2] ss:$0 sm:$0xff] }
  0x94   :  { %1910 = vmatpush.bf16.msra.mxu2 %v3385_v42 }
  0x95   :  { %1923 = vmatpush.bf16.msra.mxu3 %v3393_v43 }
  0x96   :  { %1935 = vmatpush.bf16.msrb.mxu0 %v3402_v44  ;;  %v1238_v44 = vld [vmem:[#allocation1 + $0x24] sm:$0xff] }
  0x97   :  { %1898 = vmatpush.bf16.msra.mxu1 %v3376_v45 }
  0x98   :  { %1911 = vmatpush.bf16.msra.mxu2 %v3384_v46 }
  0x99   :  { %1924 = vmatpush.bf16.msra.mxu3 %v3392_v47 }
  0x9a   :  { %1936 = vmatpush.bf16.msrb.mxu0 %v3401_v48 }
  0x9b   :  { %1899 = vmatpush.bf16.msra.mxu1 %v3375_v49 }
  0x9c   :  { %1912 = vmatpush.bf16.msra.mxu2 %v3383_v50 }
  0x9d   :  { %1925 = vmatpush.bf16.msra.mxu3 %v3391_v51 }
  0x9e   :  { %1937 = vmatpush.bf16.msrb.mxu0 %v3400_v52  ;;  %v4071_v7 = vpop.f32.mrf.mxu0 }
  0x9f   :  { %1900 = vmatpush.bf16.msra.mxu1 %v3374_v53  ;;  %v4077_v9 = vpop.f32.mrf.mxu1  ;;  %v865_v43 = vadd.f32 %v3453_v41, %v4071_v7 }
  0xa0   :  { %1913 = vmatpush.bf16.msra.mxu2 %v3382_v54 }
  0xa1   :  { %1926 = vmatpush.bf16.msra.mxu3 %v3390_v55  ;;  %v878_v48 = vadd.f32 %v4077_v9, %v865_v43 }
  0xa2   :  { %1938 = vmatpush.bf16.msrb.mxu0 %v3399_v59  ;;  %1901 = vmatmul.bf16.vlgmr.msra.gmra.mxu1 %v1229_v40  ;;  %v1237_v40 = vld [vmem:[#allocation1 + $0x1b] sm:$0xff] }
  0xa3   :  { %1945 = vmatpush.bf16.msrb.mxu1 %v3413_v56  ;;  %1914 = vmatmul.bf16.vlgmr.msra.gmra.mxu2 %v1230_v38  ;;  %v3438_v38 = vld [vmem:[%s4276_s3 + $0x300] sm:$0xff] }
  0xa4   :  { %1958 = vmatpush.bf16.msrb.mxu2 %v3421_v57  ;;  %1927 = vmatmul.bf16.vlgmr.msra.gmra.mxu3 %v1231_v39  ;;  %v3430_v39 = vld [vmem:[%s4276_s3 + $0x2c0] sm:$0xff] }
  0xa5   :  { %1971 = vmatpush.bf16.msrb.mxu3 %v3429_v58 }
  0xa6   :  { %1939 = vmatpush.bf16.msrb.mxu0 %v3398_v63  ;;  %v890_v15 = vpop.f32.mrf.mxu2  ;;  %v866_v19 = vpop.f32.mrf.mxu0 }
  0xa7   :  { %1946 = vmatpush.bf16.msrb.mxu1 %v3412_v60  ;;  %v903_v16 = vpop.f32.mrf.mxu3  ;;  %v879_v22 = vpop.f32.mrf.mxu1  ;;  %v891_v50 = vadd.f32 %v890_v15, %v878_v48 }
  0xa8   :  { %1959 = vmatpush.bf16.msrb.mxu2 %v3420_v61 }
  0xa9   :  { %1972 = vmatpush.bf16.msrb.mxu3 %v3428_v62  ;;  %1940 = vmatmul.bf16.vlgmr.msrb.gmra.mxu0 %v3978_v20  ;;  %v904_v53 = vadd.f32 %v903_v16, %v891_v50  ;;  %v3183_v50 = vld [vmem:[%s4279_s6 + $0x34] sm:$0xf0] }
  0xaa   :  { %1984 = vmatpush.bf16.msra.mxu0 %v3437_v0 }
  0xab   :  { %1947 = vmatpush.bf16.msrb.mxu1 %v3411_v1 }
  0xac   :  { %1960 = vmatpush.bf16.msrb.mxu2 %v3419_v2 }
  0xad   :  { %1973 = vmatpush.bf16.msrb.mxu3 %v3427_v3 }
  0xae   :  { %1985 = vmatpush.bf16.msra.mxu0 %v3436_v4  ;;  %v892_v28 = vpop.f32.mrf.mxu2 }
  0xaf   :  { %1948 = vmatpush.bf16.msrb.mxu1 %v3410_v5  ;;  %v905_v29 = vpop.f32.mrf.mxu3 }
  0xb0   :  { %1961 = vmatpush.bf16.msrb.mxu2 %v3418_v6 }
  0xb1   :  { %1974 = vmatpush.bf16.msrb.mxu3 %v3426_v8 }
  0xb2   :  { %1986 = vmatpush.bf16.msra.mxu0 %v3435_v10 }
  0xb3   :  { %1949 = vmatpush.bf16.msrb.mxu1 %v3409_v11 }
  0xb4   :  { %1962 = vmatpush.bf16.msrb.mxu2 %v3417_v12 }
  0xb5   :  { %1975 = vmatpush.bf16.msrb.mxu3 %v3425_v13 }
  0xb6   :  { %1987 = vmatpush.bf16.msra.mxu0 %v3434_v14 }
  0xb7   :  { %1950 = vmatpush.bf16.msrb.mxu1 %v3408_v17  ;;  %v3454_v17 = vld [vmem:[%s4277_s4] ss:$0 sm:$0xff] }
  0xb8   :  { %1963 = vmatpush.bf16.msrb.mxu2 %v3416_v18 }
  0xb9   :  { %1976 = vmatpush.bf16.msrb.mxu3 %v3424_v21 }
  0xba   :  { %1988 = vmatpush.bf16.msra.mxu0 %v3433_v23 }
  0xbb   :  { %1951 = vmatpush.bf16.msrb.mxu1 %v3407_v24 }
  0xbc   :  { %1964 = vmatpush.bf16.msrb.mxu2 %v3415_v25 }
  0xbd   :  { %1977 = vmatpush.bf16.msrb.mxu3 %v3423_v26 }
  0xbe   :  { %1989 = vmatpush.bf16.msra.mxu0 %v3432_v27  ;;  %v916_v20 = vpop.f32.mrf.mxu0 }
  0xbf   :  { %1952 = vmatpush.bf16.msrb.mxu1 %v3406_v30  ;;  %v929_v42 = vpop.f32.mrf.mxu1  ;;  %v917_v54 = vadd.f32 %v916_v20, %v904_v53 }
  0xc0   :  { %1965 = vmatpush.bf16.msrb.mxu2 %v3414_v31 }
  0xc1   :  { %1978 = vmatpush.bf16.msrb.mxu3 %v3422_v32  ;;  %v930_v55 = vadd.f32 %v929_v42, %v917_v54 }
  0xc2   :  { %1990 = vmatpush.bf16.msra.mxu0 %v3431_v34  ;;  %1953 = vmatmul.bf16.vlgmr.msrb.gmra.mxu1 %v1234_v35 }
  0xc3   :  { %2003 = vmatpush.bf16.msra.mxu1 %v3439_v33  ;;  %1966 = vmatmul.bf16.vlgmr.msrb.gmra.mxu2 %v1235_v36 }
  0xc4   :  { %1979 = vmatmul.bf16.vlgmr.msrb.gmra.mxu3 %v1236_v37 }
  0xc6   :  { %1991 = vmatpush.bf16.msra.mxu0 %v3430_v39  ;;  %v942_v45 = vpop.f32.mrf.mxu2  ;;  %v918_v47 = vpop.f32.mrf.mxu0 }
  0xc7   :  { %2004 = vmatpush.bf16.msra.mxu1 %v3438_v38  ;;  %v955_v46 = vpop.f32.mrf.mxu3  ;;  %v931_v49 = vpop.f32.mrf.mxu1  ;;  %v943_v56 = vadd.f32 %v942_v45, %v930_v55  ;;  %v3446_v45 = vld [vmem:[%s4279_s6 + $0x30] sm:$0xf0] }
  0xc9   :  { %1992 = vmatmul.bf16.vlgmr.msra.gmra.mxu0 %v1237_v40  ;;  %v956_v59 = vadd.f32 %v955_v46, %v943_v56  ;;  %v3440_v46 = vld [vmem:[%s4279_s6 + $0x4] sm:$0xf]  ;;  %v3441_v56 = vld [vmem:[%s4279_s6 + $0xc] sm:$0xf] }
  0xca   :  { %v3186_v54 = vor.u32 %v3440_v46, %v3183_v50 }
  0xcc   :  { %2157 = vmatpush.bf16.msra.mxu3 %v3186_v54 }
  0xce   :  { %v944_v51 = vpop.f32.mrf.mxu2 }
  0xcf   :  { %v957_v52 = vpop.f32.mrf.mxu3  ;;  %v3189_v51 = vld [vmem:[%s4279_s6 + $0x8] sm:$0xf] }
  0xd0   :  { %v3447_v52 = vld [vmem:[%s4279_s6 + $0x38] sm:$0xf0] }
  0xd1   :  { %v3190_v55 = vor.u32 %v3447_v52, %v3189_v51 }
  0xd2   :  { %3178 = vmatmul.msk.bf16.vlgmr.msra.gmra.mxu1 %vm852_vm0, %v1238_v44  ;;  %v3181_v44 = vld [vmem:[%s4279_s6] sm:$0xf]  ;;  %vm2378_vm0 = vcmask 258052  }
  0xd3   :  { %v3182_v49 = vor.u32 %v3446_v45, %v3181_v44  ;;  %2170 = vmatpush.bf16.msrb.mxu0 %v3190_v55 }
  0xd5   :  { %2144 = vmatpush.bf16.msra.mxu2 %v3182_v49 }
  0xde   :  { %v968_v57 = vpop.f32.mrf.mxu0 }
  0xdf   :  { %v981_v58 = vpop.f32.mrf.mxu1  ;;  %v969_v60 = vadd.f32 %v968_v57, %v956_v59  ;;  %v3191_v57 = vld [vmem:[%s4279_s6 + $0x3c] sm:$0xf0] }
  0xe0   :  { %v3194_v59 = vor.u32 %v3441_v56, %v3191_v57 }
  0xe1   :  { %v982_v0 = vadd.f32 %v981_v58, %v969_v60 }
  0xe2   :  { %2183 = vmatpush.bf16.msrb.mxu1 %v3194_v59 }
  0xe6   :  { %v994_v61 = vpop.f32.mrf.mxu2  ;;  %v970_v63 = vpop.f32.mrf.mxu0 }
  0xe7   :  { %v1007_v62 = vpop.f32.mrf.mxu3  ;;  %v983_v1 = vpop.f32.mrf.mxu1  ;;  %v995_v2 = vadd.f32 %v994_v61, %v982_v0  ;;  %v3197_v61 = vld [vmem:[%s4279_s6 + $0x10] sm:$0xf]  ;;  %v3442_v63 = vld [vmem:[%s4279_s6 + $0x14] sm:$0xf] }
  0xe9   :  { %v1008_v4 = vadd.f32 %v1007_v62, %v995_v2  ;;  %v3448_v62 = vld [vmem:[%s4279_s6 + $0x40] sm:$0xf0]  ;;  %v3199_v2 = vld [vmem:[%s4279_s6 + $0x44] sm:$0xf0] }
  0xea   :  { %v3198_v1 = vor.u32 %v3448_v62, %v3197_v61 }
  0xec   :  { %2196 = vmatpush.bf16.msrb.mxu2 %v3198_v1 }
  0xee   :  { %v996_v3 = vpop.f32.mrf.mxu2  ;;  %v1020_v6 = vpop.f32.mrf.mxu0 }
  0xef   :  { %v1009_v5 = vpop.f32.mrf.mxu3  ;;  %v4145_v7 = vadd.f32 %v1020_v6, %v1008_v4  ;;  %v3205_v3 = vld [vmem:[%s4279_s6 + $0x18] sm:$0xf]  ;;  %v3202_v4 = vor.u32 %v3442_v63, %v3199_v2  ;;  %v3443_v6 = vld [vmem:[%s4279_s6 + $0x1c] sm:$0xf] }
  0xf0   :  { %v3449_v5 = vld [vmem:[%s4279_s6 + $0x48] sm:$0xf0] }
  0xf1   :  { %2307 = vst.msk [vmem:[%s4278_s8] sm:$0x3] %vm2306_vm1, %v4145_v7  ;;  %2209 = vmatpush.bf16.msrb.mxu3 %v3202_v4 }
  0xf6   :  { %v1022_v8 = vpop.f32.mrf.mxu0 }
  0xf7   :  { %v3207_v8 = vld [vmem:[%s4279_s6 + $0x4c] sm:$0xf0] }
  0xff   :  { %v1850_v9 = vpop.f32.mrf.mxu1 }
 0x100   :  { %v1851_v19 = vadd.f32 %v3454_v17, %v1850_v9 }
 0x106   :  { %v1863_v10 = vpop.f32.mrf.mxu2  ;;  %v1889_v12 = vpop.f32.mrf.mxu0 }
 0x107   :  { %v1876_v11 = vpop.f32.mrf.mxu3  ;;  %v1852_v13 = vpop.f32.mrf.mxu1  ;;  %v1864_v24 = vadd.f32 %v1863_v10, %v1851_v19  ;;  %v3206_v10 = vor.u32 %v3449_v5, %v3205_v3 }
 0x109   :  { %v1877_v26 = vadd.f32 %v1876_v11, %v1864_v24  ;;  %v3210_v11 = vor.u32 %v3443_v6, %v3207_v8  ;;  %2222 = vmatpush.bf16.msra.mxu0 %v3206_v10  ;;  %v3444_v24 = vld [vmem:[%s4279_s6 + $0x24] sm:$0xf] }
 0x10b   :  { %v1890_v30 = vadd.f32 %v1889_v12, %v1877_v26  ;;  %2235 = vmatpush.bf16.msra.mxu1 %v3210_v11  ;;  %v3221_v26 = vld [vmem:[%s4279_s6 + $0x28] sm:$0xf] }
 0x10e   :  { %v1865_v14 = vpop.f32.mrf.mxu2  ;;  %v1891_v16 = vpop.f32.mrf.mxu0 }
 0x10f   :  { %v1878_v15 = vpop.f32.mrf.mxu3 }
 0x11f   :  { %v1902_v18 = vpop.f32.mrf.mxu1 }
 0x120   :  { %v1903_v31 = vadd.f32 %v1902_v18, %v1890_v30  ;;  %v2019_v18 = vld [vmem:[%s4280_s5] sm:$0x3] }
 0x121   :  { %v3223_v30 = vld [vmem:[%s4279_s6 + $0x5c] sm:$0xf0] }
 0x126   :  { %v1915_v21 = vpop.f32.mrf.mxu2  ;;  %v1941_v23 = vpop.f32.mrf.mxu0 }
 0x127   :  { %v1928_v22 = vpop.f32.mrf.mxu3  ;;  %v1904_v25 = vpop.f32.mrf.mxu1  ;;  %v1916_v32 = vadd.f32 %v1915_v21, %v1903_v31 }
 0x128   :  { %v3215_v25 = vld [vmem:[%s4279_s6 + $0x54] sm:$0xf0] }
 0x129   :  { %v1929_v33 = vadd.f32 %v1928_v22, %v1916_v32  ;;  %v3213_v22 = vld [vmem:[%s4279_s6 + $0x20] sm:$0xf] }
 0x12b   :  { %v1942_v35 = vadd.f32 %v1941_v23, %v1929_v33  ;;  %v3450_v23 = vld [vmem:[%s4279_s6 + $0x50] sm:$0xf0]  ;;  %v3218_v33 = vor.u32 %v3444_v24, %v3215_v25 }
 0x12c   :  { %v3214_v32 = vor.u32 %v3450_v23, %v3213_v22 }
 0x12e   :  { %v1917_v27 = vpop.f32.mrf.mxu2  ;;  %v1943_v29 = vpop.f32.mrf.mxu0 }
 0x12f   :  { %v1930_v28 = vpop.f32.mrf.mxu3  ;;  %v3445_v29 = vld [vmem:[%s4279_s6 + $0x2c] sm:$0xf] }
 0x130   :  { %v3451_v28 = vld [vmem:[%s4279_s6 + $0x58] sm:$0xf0] }
 0x13f   :  { %v1954_v34 = vpop.f32.mrf.mxu1 }
 0x140   :  { %v1955_v36 = vadd.f32 %v1954_v34, %v1942_v35  ;;  %v3222_v34 = vor.u32 %v3451_v28, %v3221_v26  ;;  %v3226_v35 = vor.u32 %v3445_v29, %v3223_v30 }
 0x146   :  { %v1967_v37 = vpop.f32.mrf.mxu2  ;;  %v1993_v38 = vpop.f32.mrf.mxu0 }
 0x147   :  { %v1968_v39 = vadd.f32 %v1967_v37, %v1955_v36  ;;  %v1980_v40 = vpop.f32.mrf.mxu3  ;;  %v1956_v20 = vpop.f32.mrf.mxu1  ;;  %v3452_v36 = vld [vmem:[%s4279_s6 + $0x60] sm:$0xf0] }
 0x149   :  { %v1981_v41 = vadd.f32 %v1980_v40, %v1968_v39 }
 0x14b   :  { %v1994_v47 = vadd.f32 %v1993_v38, %v1981_v41  ;;  %v2037_v41 = vld [vmem:[%s4282_s7] sm:$0xff] }
 0x14c   :  { %v2041_v44 = vperm.slane %v2037_v41, 0  ;;  %v2042_v45 = vperm.slane %v2037_v41, 1  ;;  %v2043_v46 = vperm.slane %v2037_v41, 2  ;;  %v2047_v50 = vperm.slane %v2037_v41, 6 }
 0x14d   :  { %v2048_v51 = vperm.slane %v2037_v41, 7  ;;  %v2045_v61 = vperm.slane %v2037_v41, 4  ;;  %v2046_v62 = vperm.slane %v2037_v41, 5 }
 0x14e   :  { %v1969_v42 = vpop.f32.mrf.mxu2  ;;  %v1995_v43 = vpop.f32.mrf.mxu0 }
 0x14f   :  { %v1982_v48 = vpop.f32.mrf.mxu3  ;;  %v2006_v53 = vpop.f32.mrf.mxu1 }
 0x150   :  { %v2007_v58 = vadd.f32 %v2006_v53, %v1994_v47  ;;  %v2044_v47 = vperm.slane %v2037_v41, 3 }
 0x152   :  { %v2011_v60 = vand.u32 2147483647, %v2007_v58  ;;  %v2010_v16 = vmax.f32 %v2007_v58, 0.0 }
 0x154   :  { %v2012_v0 = vsub.f32 0.0, %v2011_v60 }
 0x156   :  { %v2013_v9 = vmul.f32 1.442695, %v2012_v0 }
 0x157   :  { %v2008_v12 = vpop.f32.mrf.mxu1 }
 0x158   :  { %3455 = vpow2.f32 %v2013_v9 }
 0x15e   :  { %v3456_v13 = vpop.eup %3455 }
 0x15f   :  { %v2015_v14 = vadd.f32 1.0, %v3456_v13 }
 0x161   :  { %3457 = vlog2.f32 %v2015_v14 }
 0x167   :  { %v3458_v15 = vpop.eup %3457 }
 0x168   :  { %v2017_v17 = vmul.f32 0.6931472, %v3458_v15 }
 0x16a   :  { %v2018_v19 = vadd.f32 %v2017_v17, %v2010_v16 }
 0x16c   :  { %v2020_v21 = vmul.f32 %v2019_v18, %v2018_v19  ;;  %2308 = vst.msk [vmem:[%s4281_s9] sm:$0x3] %vm2306_vm1, %v2018_v19  ;;  %vm2369_vm1 = vcmask 1042432  }
 0x16e   :  { %v2021_v27 = vadd.f32 %v2020_v21, %v4145_v7  ;;  %v3229_v7 = vld [vmem:[%s4279_s6 + $0x30] sm:$0xf] }
 0x16f   :  { %v3230_v37 = vor.u32 %v3452_v36, %v3229_v7 }
 0x170   :  { %v2022_v31 = vpack.c.bf16 %v2021_v27, %v2021_v27 }
 0x172   :  { %3231 = vmatmul.msk.bf16.vlgmr.msra.gmra.mxu2 %vm2133_vm2, %v2022_v31  ;;  %3232 = vmatmul.msk.bf16.vlgmr.msra.gmra.mxu3 %vm2133_vm2, %v2022_v31 }
 0x173   :  { %3233 = vmatmul.msk.bf16.vlgmr.msrb.gmra.mxu0 %vm2133_vm2, %v2022_v31  ;;  %3234 = vmatmul.msk.bf16.vlgmr.msrb.gmra.mxu1 %vm2133_vm2, %v2022_v31 }
 0x174   :  { %2248 = vmatpush.bf16.msra.mxu2 %v3214_v32  ;;  %2261 = vmatpush.bf16.msra.mxu3 %v3218_v33  ;;  %v2038_v32 = vld [vmem:[%s4282_s7 + $0x8] sm:$0x1f] }
 0x175   :  { %2274 = vmatpush.bf16.msrb.mxu0 %v3222_v34  ;;  %2287 = vmatpush.bf16.msrb.mxu1 %v3226_v35  ;;  %v2049_v33 = vperm.slane %v2038_v32, 0  ;;  %v2050_v34 = vperm.slane %v2038_v32, 1  ;;  %v2051_v36 = vperm.slane %v2038_v32, 2 }
 0x182   :  { %3235 = vmatmul.msk.bf16.vlgmr.msrb.gmra.mxu2 %vm2133_vm2, %v2022_v31  ;;  %3236 = vmatmul.msk.bf16.vlgmr.msrb.gmra.mxu3 %vm2133_vm2, %v2022_v31 }
 0x183   :  { %3237 = vmatmul.msk.bf16.vlgmr.msra.gmra.mxu0 %vm2133_vm2, %v2022_v31  ;;  %3238 = vmatmul.msk.bf16.vlgmr.msra.gmra.mxu1 %vm2133_vm2, %v2022_v31 }
 0x184   :  { %2300 = vmatpush.bf16.msrb.mxu2 %v3230_v37  ;;  %v2052_v37 = vperm.slane %v2038_v32, 3 }
 0x192   :  { %3239 = vmatmul.msk.bf16.vlgmr.msra.gmra.mxu2 %vm2133_vm2, %v2022_v31  ;;  %3240 = vmatmul.msk.bf16.vlgmr.msra.gmra.mxu3 %vm2133_vm2, %v2022_v31 }
 0x193   :  { %3241 = vmatmul.msk.bf16.vlgmr.msrb.gmra.mxu0 %vm2133_vm2, %v2022_v31  ;;  %3242 = vmatmul.msk.bf16.vlgmr.msrb.gmra.mxu1 %vm2133_vm2, %v2022_v31 }
 0x1a2   :  { %3243 = vmatmul.msk.bf16.vlgmr.msrb.gmra.mxu2 %vm2133_vm2, %v2022_v31  ;;  %vm2379_vm2 = vmor %vm2378_vm0, %vm2377_vm15 }
 0x1f0   :  { %v2172_v38 = vpop.f32.mrf.mxu0  ;;  %v2185_v39 = vpop.f32.mrf.mxu1 }
 0x1f1   :  { %v2173_v54 = vadd.f32 %v2172_v38, %v2043_v46  ;;  %v2186_v55 = vadd.f32 %v2185_v39, %v2044_v47 }
 0x1f3   :  { %v2310_v63 = vpack.c.bf16 %v2186_v55, %v2173_v54 }
 0x1f5   :  { %v2146_v40 = vpop.f32.mrf.mxu2  ;;  %v2159_v20 = vpop.f32.mrf.mxu3  ;;  %v2324_v6 = vrot.slane %v2310_v63, 6  ;;  %v2325_v8 = vrot.slane %v2310_v63, 1 }
 0x1f6   :  { %v2147_v52 = vadd.f32 %v2146_v40, %v2041_v44  ;;  %v2160_v53 = vadd.f32 %v2159_v20, %v2042_v45 }
 0x1f7   :  { %v2342_v17 = vsel %vm2339_vm4, %v2324_v6, %v2325_v8 }
 0x1f8   :  { %v2174_v42 = vpop.f32.mrf.mxu0  ;;  %v2187_v43 = vpop.f32.mrf.mxu1  ;;  %v2309_v60 = vpack.c.bf16 %v2160_v53, %v2147_v52 }
 0x1f9   :  { %v2053_v42 = vperm.slane %v2038_v32, 4 }
 0x1fa   :  { %v2323_v3 = vrot.slane %v2309_v60, 3 }
 0x1fc   :  { %v2338_v14 = vsel %vm2335_vm3, %v2309_v60, %v2323_v3 }
 0x1fd   :  { %v2148_v48 = vpop.f32.mrf.mxu2  ;;  %v2161_v49 = vpop.f32.mrf.mxu3  ;;  %v2344_v21 = vsel %vm2343_vm5, %v2338_v14, %v2342_v17 }
 0x200   :  { %v2224_v56 = vpop.f32.mrf.mxu0  ;;  %v2237_v57 = vpop.f32.mrf.mxu1 }
 0x201   :  { %v2225_v58 = vadd.f32 %v2224_v56, %v2047_v50  ;;  %v2238_v59 = vadd.f32 %v2237_v57, %v2048_v51 }
 0x203   :  { %v2312_v0 = vpack.c.bf16 %v2238_v59, %v2225_v58 }
 0x205   :  { %v2198_v1 = vpop.f32.mrf.mxu2  ;;  %v2211_v2 = vpop.f32.mrf.mxu3  ;;  %v2328_v9 = vrot.slane %v2312_v0, 2  ;;  %v2329_v10 = vrot.slane %v2312_v0, 5 }
 0x206   :  { %v2199_v4 = vadd.f32 %v2198_v1, %v2045_v61  ;;  %v2212_v5 = vadd.f32 %v2211_v2, %v2046_v62 }
 0x207   :  { %v2352_v18 = vsel %vm2349_vm6, %v2328_v9, %v2329_v10 }
 0x208   :  { %v2311_v11 = vpack.c.bf16 %v2212_v5, %v2199_v4  ;;  %v2226_v12 = vpop.f32.mrf.mxu0  ;;  %v2239_v13 = vpop.f32.mrf.mxu1 }
 0x20a   :  { %v2326_v15 = vrot.slane %v2311_v11, 4  ;;  %v2327_v16 = vrot.slane %v2311_v11, 7 }
 0x20c   :  { %v2348_v19 = vsel %vm2345_vm7, %v2326_v15, %v2327_v16 }
 0x20d   :  { %v2354_v22 = vsel %vm2353_vm8, %v2348_v19, %v2352_v18  ;;  %v2200_v23 = vpop.f32.mrf.mxu2  ;;  %v2213_v24 = vpop.f32.mrf.mxu3 }
 0x20e   :  { %v2356_v25 = vsel %vm2355_vm9, %v2344_v21, %v2354_v22 }
 0x20f   :  { %2373 = vst [vmem:[%s4283_s10] sm:$0xff] %v2356_v25 }
 0x210   :  { %v2276_v26 = vpop.f32.mrf.mxu0  ;;  %v2289_v27 = vpop.f32.mrf.mxu1 }
 0x211   :  { %v2277_v40 = vadd.f32 %v2276_v26, %v2051_v36  ;;  %v2290_v20 = vadd.f32 %v2289_v27, %v2052_v37 }
 0x213   :  { %v2314_v44 = vpack.c.bf16 %v2290_v20, %v2277_v40 }
 0x215   :  { %v2250_v28 = vpop.f32.mrf.mxu2  ;;  %v2263_v29 = vpop.f32.mrf.mxu3  ;;  %v2332_v48 = vrot.slane %v2314_v44, 1  ;;  %v2331_v52 = vrot.slane %v2314_v44, 6 }
 0x216   :  { %v2251_v38 = vadd.f32 %v2250_v28, %v2049_v33  ;;  %v2264_v39 = vadd.f32 %v2263_v29, %v2050_v34 }
 0x218   :  { %v2278_v30 = vpop.f32.mrf.mxu0  ;;  %v2291_v31 = vpop.f32.mrf.mxu1  ;;  %v2313_v41 = vpack.c.bf16 %v2264_v39, %v2251_v38 }
 0x21a   :  { %v2330_v45 = vrot.slane %v2313_v41, 3 }
 0x21c   :  { %v2359_v49 = vsel %vm2335_vm3, %v2313_v41, %v2330_v45 }
 0x21d   :  { %v2252_v35 = vpop.f32.mrf.mxu2  ;;  %v2265_v7 = vpop.f32.mrf.mxu3  ;;  %v2361_v54 = vsel %vm2343_vm5, %v2359_v49, %v2331_v52 }
 0x225   :  { %v2302_v43 = vpop.f32.mrf.mxu2 }
 0x226   :  { %v2303_v46 = vadd.f32 %v2302_v43, %v2053_v42 }
 0x228   :  { %v2315_v47 = vpack.c.bf16 %v2303_v46, %v2303_v46 }
 0x22a   :  { %v2333_v50 = vrot.slane %v2315_v47, 4  ;;  %v2334_v51 = vrot.slane %v2315_v47, 7 }
 0x22c   :  { %v2365_v53 = vsel %vm2362_vm12, %v2332_v48, %v2333_v50 }
 0x22d   :  { %v2368_v55 = vsel %vm2366_vm14, %v2365_v53, %v2334_v51  ;;  %v2304_v56 = vpop.f32.mrf.mxu2 }
 0x22e   :  { %v2370_v57 = vsel %vm2369_vm1, %v2361_v54, %v2368_v55 }
 0x22f   :  { %2380 = vst.msk [vmem:[%s4283_s10 + $0x8] sm:$0x1f] %vm2379_vm2, %v2370_v57 }

// kernel: vae_forward.9
= control target key start
LH: loop header
LB: loop body
LE: loop exit
PB: predicated region body
PF: predicated region fallthrough
CT: control target
= control target key end

     0   :  { %vm386_vm0 = vcmask 130048   ;;  %vm1375_vm1 = vcmask 64512   ;;  %vm1458_vm2 = vcmask 25600   ;;  %vm3095_vm3 = vcmask 523264   ;;  %s6611_s1 = inlined_call_operand.vmem [shape: bf16[144,4], index: 1, kind: input, shape index: {}]   ;;  %s6612_s0 = inlined_call_operand.vmem [shape: bf16[392,144], index: 0, kind: input, shape index: {}]   ;;  %s6613_s2 = inlined_call_operand.vmem [shape: f32[1,4], index: 2, kind: input, shape index: {}]   ;;  %s6614_s7 = inlined_call_operand.vmem [shape: bf16[392,4], index: 7, kind: input, shape index: {}]   ;;  %s6615_s5 = inlined_call_operand.vmem [shape: bf16[3136,2], index: 5, kind: input, shape index: {}]   ;;  %s6616_s3 = inlined_call_operand.vmem [shape: f32[2,392], index: 3, kind: input, shape index: {}]   ;;  %s6617_s4 = inlined_call_operand.vmem [shape: bf16[2,3136], index: 4, kind: input, shape index: {}]   ;;  %s6618_s6 = inlined_call_operand.vmem [shape: f32[1,2], index: 6, kind: input, shape index: {}]   ;;  %s6619_s10 = inlined_call_operand.vmem [shape: f32[2,16], index: 10, kind: input, shape index: {}]   ;;  %s6620_s9 = inlined_call_operand.vmem [shape: f32[2,16], index: 9, kind: input, shape index: {}]   ;;  %s6621_s8 = inlined_call_operand.vmem [shape: f32[2,2], index: 8, kind: input, shape index: {}]   ;;  %s6622_s11 = inlined_call_operand.vmem [shape: f32[2,1], index: 11, kind: output, shape index: {}]  }
   0x1   :  { %v4560_v0 = vld [vmem:[%s6611_s1 + $0x38] sm:$0xff]  ;;  %v4559_v1 = vld [vmem:[%s6611_s1 + $0x30] sm:$0xff]  ;;  %v4561_v2 = vld [vmem:[%s6611_s1 + $0x40] sm:$0xff]  ;;  %vm3423_vm4 = vcmask 9216   ;;  %vm3453_vm5 = vcmask 123904   ;;  %vm3459_vm6 = vcmask 1024  }
   0x2   :  { %462 = vmatpush.bf16.msra.mxu0 %v4560_v0  ;;  %v4505_v3 = vld [vmem:[%s6612_s0 + $0x4] sm:$0xf]  ;;  %v3469_v4 = vld [vmem:[%s6612_s0 + $0x8] sm:$0xf0]  ;;  %602 = vmatpush.bf16.msra.mxu1 %v4561_v2  ;;  %v4556_v8 = vld [vmem:[%s6611_s1 + $0x18] sm:$0xff] }
   0x3   :  { %v3472_v5 = vor.u32 %v4505_v3, %v3469_v4  ;;  %v4558_v6 = vld [vmem:[%s6611_s1 + $0x28] sm:$0xff]  ;;  %v4557_v7 = vld [vmem:[%s6611_s1 + $0x20] sm:$0xff]  ;;  %v4507_v9 = vld [vmem:[%s6612_s0 + $0x14] sm:$0xf] }
   0x4   :  { %v3477_v10 = vld [vmem:[%s6612_s0 + $0x18] sm:$0xf0]  ;;  %v4555_v11 = vld [vmem:[%s6611_s1 + $0x10] sm:$0xff]  ;;  %v4554_v13 = vld [vmem:[%s6611_s1 + $0x8] sm:$0xff] }
   0x5   :  { %3693 = vmatmul.msk.bf16.vlgmr.msra.gmra.mxu1 %vm386_vm0, %v3472_v5  ;;  %v3480_v12 = vor.u32 %v4507_v9, %v3477_v10  ;;  %v4553_v14 = vld [vmem:[%s6611_s1] sm:$0xff]  ;;  %v4506_v16 = vld [vmem:[%s6612_s0 + $0x4] sm:$0xf0]  ;;  %v3485_v19 = vld [vmem:[%s6612_s0 + $0x28] sm:$0xf0] }
   0x6   :  { %463 = vmatpush.bf16.msra.mxu0 %v4559_v1  ;;  %v3467_v15 = vld [vmem:[%s6612_s0] sm:$0xf]  ;;  %v4509_v18 = vld [vmem:[%s6612_s0 + $0x24] sm:$0xf]  ;;  %v3475_v21 = vld [vmem:[%s6612_s0 + $0x10] sm:$0xf] }
   0x7   :  { %v3468_v17 = vor.u32 %v4506_v16, %v3467_v15  ;;  %v3488_v20 = vor.u32 %v4509_v18, %v3485_v19  ;;  %v4508_v22 = vld [vmem:[%s6612_s0 + $0x14] sm:$0xf0]  ;;  %v4511_v24 = vld [vmem:[%s6612_s0 + $0x34] sm:$0xf]  ;;  %v3493_v25 = vld [vmem:[%s6612_s0 + $0x38] sm:$0xf0] }
   0x8   :  { %v3476_v23 = vor.u32 %v4508_v22, %v3475_v21  ;;  %v3496_v26 = vor.u32 %v4511_v24, %v3493_v25  ;;  %v3483_v27 = vld [vmem:[%s6612_s0 + $0x20] sm:$0xf]  ;;  %v4510_v28 = vld [vmem:[%s6612_s0 + $0x24] sm:$0xf0]  ;;  %v4513_v30 = vld [vmem:[%s6612_s0 + $0x44] sm:$0xf] }
   0x9   :  { %v3484_v29 = vor.u32 %v4510_v28, %v3483_v27  ;;  %v3501_v31 = vld [vmem:[%s6612_s0 + $0x48] sm:$0xf0]  ;;  %v3491_v33 = vld [vmem:[%s6612_s0 + $0x30] sm:$0xf]  ;;  %v4512_v34 = vld [vmem:[%s6612_s0 + $0x34] sm:$0xf0] }
   0xa   :  { %464 = vmatpush.bf16.msra.mxu0 %v4558_v6  ;;  %v3504_v32 = vor.u32 %v4513_v30, %v3501_v31  ;;  %v3492_v35 = vor.u32 %v4512_v34, %v3491_v33  ;;  %v4515_v36 = vld [vmem:[%s6612_s0 + $0x54] sm:$0xf]  ;;  %v3509_v37 = vld [vmem:[%s6612_s0 + $0x58] sm:$0xf0]  ;;  %v3499_v39 = vld [vmem:[%s6612_s0 + $0x40] sm:$0xf] }
   0xb   :  { %v3512_v38 = vor.u32 %v4515_v36, %v3509_v37  ;;  %v4514_v40 = vld [vmem:[%s6612_s0 + $0x44] sm:$0xf0]  ;;  %v4517_v42 = vld [vmem:[%s6612_s0 + $0x64] sm:$0xf]  ;;  %v3517_v43 = vld [vmem:[%s6612_s0 + $0x68] sm:$0xf0] }
   0xc   :  { %v3500_v41 = vor.u32 %v4514_v40, %v3499_v39  ;;  %v3520_v44 = vor.u32 %v4517_v42, %v3517_v43  ;;  %v3507_v45 = vld [vmem:[%s6612_s0 + $0x50] sm:$0xf]  ;;  %v4516_v46 = vld [vmem:[%s6612_s0 + $0x54] sm:$0xf0]  ;;  %v4519_v48 = vld [vmem:[%s6612_s0 + $0x74] sm:$0xf] }
   0xd   :  { %v3508_v47 = vor.u32 %v4516_v46, %v3507_v45  ;;  %v3525_v49 = vld [vmem:[%s6612_s0 + $0x78] sm:$0xf0]  ;;  %v3515_v51 = vld [vmem:[%s6612_s0 + $0x60] sm:$0xf]  ;;  %v4518_v52 = vld [vmem:[%s6612_s0 + $0x64] sm:$0xf0] }
   0xe   :  { %465 = vmatpush.bf16.msra.mxu0 %v4557_v7  ;;  %v3528_v50 = vor.u32 %v4519_v48, %v3525_v49  ;;  %v3516_v53 = vor.u32 %v4518_v52, %v3515_v51  ;;  %v4521_v54 = vld [vmem:[%s6612_s0 + $0x84] sm:$0xf]  ;;  %v3533_v55 = vld [vmem:[%s6612_s0 + $0x88] sm:$0xf0]  ;;  %v3523_v58 = vld [vmem:[%s6612_s0 + $0x70] sm:$0xf] }
   0xf   :  { %v3536_v56 = vor.u32 %v4521_v54, %v3533_v55  ;;  %v4520_v59 = vld [vmem:[%s6612_s0 + $0x74] sm:$0xf0]  ;;  %v4523_v62 = vld [vmem:[%s6612_s0 + $0x94] sm:$0xf]  ;;  %v3541_v63 = vld [vmem:[%s6612_s0 + $0x98] sm:$0xf0] }
  0x10   :  { %v3524_v61 = vor.u32 %v4520_v59, %v3523_v58  ;;  %v3544_v0 = vor.u32 %v4523_v62, %v3541_v63  ;;  %v3531_v2 = vld [vmem:[%s6612_s0 + $0x80] sm:$0xf]  ;;  %v4522_v3 = vld [vmem:[%s6612_s0 + $0x84] sm:$0xf0]  ;;  %v4525_v9 = vld [vmem:[%s6612_s0 + $0xa4] sm:$0xf] }
  0x11   :  { %v5296_v4 = vld [vmem:[%s6613_s2] ss:$0 sm:$0xff]  ;;  %v3532_v6 = vor.u32 %v4522_v3, %v3531_v2  ;;  %v3549_v10 = vld [vmem:[%s6612_s0 + $0xa8] sm:$0xf0]  ;;  %v4524_v18 = vld [vmem:[%s6612_s0 + $0x94] sm:$0xf0] }
  0x12   :  { %466 = vmatpush.bf16.msra.mxu0 %v4556_v8  ;;  %v3557_v24 = vld [vmem:[%s6612_s0 + $0xb8] sm:$0xf0]  ;;  %v3547_v31 = vld [vmem:[%s6612_s0 + $0xa0] sm:$0xf]  ;;  %v4529_v37 = vld [vmem:[%s6612_s0 + $0xc4] sm:$0xf] }
  0x13   :  { %v3555_v45 = vld [vmem:[%s6612_s0 + $0xb0] sm:$0xf]  ;;  %v4528_v46 = vld [vmem:[%s6612_s0 + $0xb4] sm:$0xf0]  ;;  %v4531_v51 = vld [vmem:[%s6612_s0 + $0xd4] sm:$0xf] }
  0x14   :  { %v3556_v48 = vor.u32 %v4528_v46, %v3555_v45  ;;  %v3573_v52 = vld [vmem:[%s6612_s0 + $0xd8] sm:$0xf0]  ;;  %v3563_v59 = vld [vmem:[%s6612_s0 + $0xc0] sm:$0xf]  ;;  %v3581_v2 = vld [vmem:[%s6612_s0 + $0xe8] sm:$0xf0] }
  0x15   :  { %3694 = vmatmul.msk.bf16.gmra.mxu1 %vm386_vm0, %v3480_v12  ;;  %v3552_v12 = vor.u32 %v4525_v9, %v3549_v10  ;;  %v3576_v54 = vor.u32 %v4531_v51, %v3573_v52  ;;  %v4532_v9 = vld [vmem:[%s6612_s0 + $0xd4] sm:$0xf0] }
  0x16   :  { %467 = vmatpush.bf16.msra.mxu0 %v4555_v11 }
  0x1a   :  { %468 = vmatpush.bf16.msra.mxu0 %v4554_v13 }
  0x1e   :  { %469 = vmatpush.bf16.msra.mxu0 %v4553_v14 }
  0x21   :  { %470 = vmatmul.bf16.vlgmr.msra.gmra.mxu0 %v3468_v17  ;;  %v3539_v17 = vld [vmem:[%s6612_s0 + $0x90] sm:$0xf] }
  0x25   :  { %3695 = vmatmul.msk.bf16.gmra.mxu1 %vm386_vm0, %v3488_v20  ;;  %v3540_v20 = vor.u32 %v4524_v18, %v3539_v17 }
  0x31   :  { %475 = vmatmul.bf16.gmra.mxu0 %v3476_v23  ;;  %v4527_v23 = vld [vmem:[%s6612_s0 + $0xb4] sm:$0xf] }
  0x35   :  { %3696 = vmatmul.msk.bf16.gmra.mxu1 %vm386_vm0, %v3496_v26  ;;  %v3560_v26 = vor.u32 %v4527_v23, %v3557_v24 }
  0x41   :  { %480 = vmatmul.bf16.gmra.mxu0 %v3484_v29 }
  0x45   :  { %3697 = vmatmul.msk.bf16.gmra.mxu1 %vm386_vm0, %v3504_v32  ;;  %v4526_v32 = vld [vmem:[%s6612_s0 + $0xa4] sm:$0xf0] }
  0x46   :  { %v3548_v34 = vor.u32 %v4526_v32, %v3547_v31 }
  0x51   :  { %485 = vmatmul.bf16.gmra.mxu0 %v3492_v35 }
  0x55   :  { %3698 = vmatmul.msk.bf16.gmra.mxu1 %vm386_vm0, %v3512_v38  ;;  %v3565_v38 = vld [vmem:[%s6612_s0 + $0xc8] sm:$0xf0] }
  0x56   :  { %v3568_v40 = vor.u32 %v4529_v37, %v3565_v38 }
  0x61   :  { %490 = vmatmul.bf16.gmra.mxu0 %v3500_v41 }
  0x65   :  { %3699 = vmatmul.msk.bf16.gmra.mxu1 %vm386_vm0, %v3520_v44 }
  0x71   :  { %495 = vmatmul.bf16.gmra.mxu0 %v3508_v47 }
  0x75   :  { %3700 = vmatmul.msk.bf16.gmra.mxu1 %vm386_vm0, %v3528_v50 }
  0x81   :  { %500 = vmatmul.bf16.gmra.mxu0 %v3516_v53 }
  0x82   :  { %v604_v57 = vpop.f32.mrf.mxu1 }
  0x85   :  { %3701 = vmatmul.msk.bf16.gmra.mxu1 %vm386_vm0, %v3536_v56 }
  0x8a   :  { %v606_v60 = vpop.f32.mrf.mxu1 }
  0x91   :  { %505 = vmatmul.bf16.gmra.mxu0 %v3524_v61 }
  0x92   :  { %v609_v1 = vpop.f32.mrf.mxu1 }
  0x95   :  { %3702 = vmatmul.msk.bf16.gmra.mxu1 %vm386_vm0, %v3544_v0 }
  0x9a   :  { %v611_v5 = vpop.f32.mrf.mxu1 }
  0x9e   :  { %v471_v7 = vpop.f32.mrf.mxu0 }
  0x9f   :  { %v472_v8 = vadd.f32 %v5296_v4, %v471_v7 }
  0xa1   :  { %v5305_v11 = vadd.f32 %v604_v57, %v472_v8  ;;  %510 = vmatmul.bf16.gmra.mxu0 %v3532_v6  ;;  %v3571_v8 = vld [vmem:[%s6612_s0 + $0xd0] sm:$0xf] }
  0xa2   :  { %v614_v13 = vpop.f32.mrf.mxu1 }
  0xa5   :  { %3703 = vmatmul.msk.bf16.gmra.mxu1 %vm386_vm0, %v3552_v12  ;;  %v3572_v12 = vor.u32 %v4532_v9, %v3571_v8 }
  0xa6   :  { %v473_v14 = vpop.f32.mrf.mxu0 }
  0xa7   :  { %v474_v15 = vadd.f32 %v5296_v4, %v473_v14  ;;  %v4535_v14 = vld [vmem:[%s6612_s0 + $0xf4] sm:$0xf] }
  0xa9   :  { %v5309_v16 = vadd.f32 %v606_v60, %v474_v15  ;;  %v4530_v60 = vld [vmem:[%s6612_s0 + $0xc4] sm:$0xf0]  ;;  %v3589_v15 = vld [vmem:[%s6612_s0 + $0xf8] sm:$0xf0] }
  0xaa   :  { %v616_v19 = vpop.f32.mrf.mxu1  ;;  %v3564_v62 = vor.u32 %v4530_v60, %v3563_v59  ;;  %v3592_v17 = vor.u32 %v4535_v14, %v3589_v15  ;;  %v3605_v59 = vld [vmem:[%s6612_s0 + $0x118] sm:$0xf0] }
  0xae   :  { %v476_v21 = vpop.f32.mrf.mxu0 }
  0xaf   :  { %v477_v22 = vadd.f32 %v5296_v4, %v476_v21  ;;  %v4534_v21 = vld [vmem:[%s6612_s0 + $0xe4] sm:$0xf0] }
  0xb1   :  { %v5324_v25 = vadd.f32 %v609_v1, %v477_v22  ;;  %515 = vmatmul.bf16.gmra.mxu0 %v3540_v20  ;;  %v4533_v1 = vld [vmem:[%s6612_s0 + $0xe4] sm:$0xf]  ;;  %v3579_v20 = vld [vmem:[%s6612_s0 + $0xe0] sm:$0xf] }
  0xb2   :  { %v619_v27 = vpop.f32.mrf.mxu1  ;;  %v3580_v23 = vor.u32 %v4534_v21, %v3579_v20 }
  0xb5   :  { %3704 = vmatmul.msk.bf16.gmra.mxu1 %vm386_vm0, %v3560_v26  ;;  %v4537_v26 = vld [vmem:[%s6612_s0 + $0x104] sm:$0xf] }
  0xb6   :  { %v478_v28 = vpop.f32.mrf.mxu0 }
  0xb7   :  { %v479_v29 = vadd.f32 %v5296_v4, %v478_v28 }
  0xb9   :  { %v5328_v30 = vadd.f32 %v611_v5, %v479_v29  ;;  %v3584_v5 = vor.u32 %v4533_v1, %v3581_v2 }
  0xba   :  { %v621_v33 = vpop.f32.mrf.mxu1 }
  0xbb   :  { %v878_v46 = vand.u32 2147483647, %v5328_v30 }
  0xbe   :  { %v481_v35 = vpop.f32.mrf.mxu0 }
  0xbf   :  { %v482_v36 = vadd.f32 %v5296_v4, %v481_v35  ;;  %v4536_v35 = vld [vmem:[%s6612_s0 + $0xf4] sm:$0xf0] }
  0xc1   :  { %v5343_v39 = vadd.f32 %v614_v13, %v482_v36  ;;  %520 = vmatmul.bf16.gmra.mxu0 %v3548_v34  ;;  %v3587_v34 = vld [vmem:[%s6612_s0 + $0xf0] sm:$0xf] }
  0xc2   :  { %v624_v41 = vpop.f32.mrf.mxu1  ;;  %v3588_v45 = vor.u32 %v4536_v35, %v3587_v34 }
  0xc3   :  { %v879_v21 = vand.u32 2147483647, %v5343_v39 }
  0xc5   :  { %3705 = vmatmul.msk.bf16.gmra.mxu1 %vm386_vm0, %v3568_v40 }
  0xc6   :  { %v483_v42 = vpop.f32.mrf.mxu0 }
  0xc7   :  { %v484_v43 = vadd.f32 %v5296_v4, %v483_v42  ;;  %v875_v42 = vand.u32 2147483647, %v5305_v11 }
  0xc9   :  { %v5347_v44 = vadd.f32 %v616_v19, %v484_v43  ;;  %v876_v43 = vand.u32 2147483647, %v5309_v16  ;;  %v924_v60 = vsub.f32 0.0, %v875_v42 }
  0xca   :  { %v5355_v47 = vpop.f32.mrf.mxu1 }
  0xcb   :  { %v973_v9 = vmul.f32 1.442695, %v924_v60 }
  0xce   :  { %v486_v49 = vpop.f32.mrf.mxu0 }
  0xcf   :  { %v487_v50 = vadd.f32 %v5296_v4, %v486_v49 }
  0xd1   :  { %v5364_v53 = vadd.f32 %v619_v27, %v487_v50  ;;  %525 = vmatmul.bf16.gmra.mxu0 %v3556_v48  ;;  %v3597_v27 = vld [vmem:[%s6612_s0 + $0x108] sm:$0xf0] }
  0xd2   :  { %v629_v55 = vpop.f32.mrf.mxu1  ;;  %v3600_v28 = vor.u32 %v4537_v26, %v3597_v27 }
  0xd3   :  { %v881_v26 = vand.u32 2147483647, %v5364_v53 }
  0xd5   :  { %3706 = vmatmul.msk.bf16.gmra.mxu1 %vm386_vm0, %v3576_v54 }
  0xd6   :  { %v488_v56 = vpop.f32.mrf.mxu0 }
  0xd7   :  { %v489_v57 = vadd.f32 %v5296_v4, %v488_v56 }
  0xd9   :  { %v5368_v58 = vadd.f32 %v621_v33, %v489_v57  ;;  %v4539_v57 = vld [vmem:[%s6612_s0 + $0x114] sm:$0xf] }
  0xda   :  { %v631_v61 = vpop.f32.mrf.mxu1 }
  0xdb   :  { %v882_v14 = vand.u32 2147483647, %v5368_v58 }
  0xdd   :  { %v931_v34 = vsub.f32 0.0, %v882_v14 }
  0xde   :  { %v491_v63 = vpop.f32.mrf.mxu0 }
  0xdf   :  { %v492_v0 = vadd.f32 %v5296_v4, %v491_v63  ;;  %v927_v63 = vsub.f32 0.0, %v878_v46 }
  0xe1   :  { %v5383_v3 = vadd.f32 %v624_v41, %v492_v0  ;;  %530 = vmatmul.bf16.gmra.mxu0 %v3564_v62  ;;  %v925_v62 = vsub.f32 0.0, %v876_v43 }
  0xe2   :  { %v634_v6 = vpop.f32.mrf.mxu1 }
  0xe3   :  { %v883_v27 = vand.u32 2147483647, %v5383_v3 }
  0xe5   :  { %3707 = vmatmul.msk.bf16.gmra.mxu1 %vm386_vm0, %v3584_v5  ;;  %v3608_v5 = vor.u32 %v4539_v57, %v3605_v59  ;;  %v932_v43 = vsub.f32 0.0, %v883_v27  ;;  %v987_v57 = vmul.f32 1.442695, %v931_v34 }
  0xe6   :  { %v493_v7 = vpop.f32.mrf.mxu0 }
  0xe7   :  { %v494_v48 = vadd.f32 %v5296_v4, %v493_v7 }
  0xe9   :  { %v5452_v0 = vadd.f32 %v5355_v47, %v494_v48  ;;  %v880_v48 = vand.u32 2147483647, %v5347_v44 }
  0xea   :  { %v636_v10 = vpop.f32.mrf.mxu1 }
  0xeb   :  { %v884_v47 = vand.u32 2147483647, %v5452_v0 }
  0xee   :  { %v496_v13 = vpop.f32.mrf.mxu0 }
  0xef   :  { %v497_v38 = vadd.f32 %v5296_v4, %v496_v13  ;;  %v979_v13 = vmul.f32 1.442695, %v927_v63 }
  0xf1   :  { %535 = vmatmul.bf16.gmra.mxu0 %v3572_v12  ;;  %v5440_v54 = vadd.f32 %v629_v55, %v497_v38  ;;  %v928_v38 = vsub.f32 0.0, %v879_v21 }
  0xf2   :  { %v639_v18 = vpop.f32.mrf.mxu1 }
  0xf3   :  { %v981_v63 = vmul.f32 1.442695, %v928_v38 }
  0xf5   :  { %3708 = vmatmul.msk.bf16.gmra.mxu1 %vm386_vm0, %v3592_v17 }
  0xf6   :  { %v498_v19 = vpop.f32.mrf.mxu0 }
  0xf7   :  { %v499_v36 = vadd.f32 %v5296_v4, %v498_v19 }
  0xf9   :  { %v5436_v50 = vadd.f32 %v631_v61, %v499_v36 }
  0xfa   :  { %v5405_v22 = vpop.f32.mrf.mxu1 }
  0xfb   :  { %v886_v55 = vand.u32 2147483647, %v5436_v50 }
  0xfd   :  { %v935_v17 = vsub.f32 0.0, %v886_v55  ;;  %v4541_v55 = vld [vmem:[%s6612_s0 + $0x124] sm:$0xf] }
  0xfe   :  { %v501_v24 = vpop.f32.mrf.mxu0 }
  0xff   :  { %v502_v33 = vadd.f32 %v5296_v4, %v501_v24  ;;  %v995_v35 = vmul.f32 1.442695, %v935_v17 }
 0x101   :  { %540 = vmatmul.bf16.gmra.mxu0 %v3580_v23  ;;  %v5428_v40 = vadd.f32 %v634_v6, %v502_v33  ;;  %v885_v6 = vand.u32 2147483647, %v5440_v54  ;;  %v4538_v33 = vld [vmem:[%s6612_s0 + $0x104] sm:$0xf0] }
 0x102   :  { %v5413_v29 = vpop.f32.mrf.mxu1 }
 0x103   :  { %v887_v56 = vand.u32 2147483647, %v5428_v40  ;;  %v934_v23 = vsub.f32 0.0, %v885_v6  ;;  %v989_v6 = vmul.f32 1.442695, %v932_v43 }
 0x104   :  { %v4540_v43 = vld [vmem:[%s6612_s0 + $0x114] sm:$0xf0] }
 0x105   :  { %3709 = vmatmul.msk.bf16.gmra.mxu1 %vm386_vm0, %v3600_v28  ;;  %v936_v7 = vsub.f32 0.0, %v887_v56  ;;  %v993_v42 = vmul.f32 1.442695, %v934_v23 }
 0x106   :  { %v503_v31 = vpop.f32.mrf.mxu0 }
 0x107   :  { %v504_v32 = vadd.f32 %v5296_v4, %v503_v31  ;;  %v997_v24 = vmul.f32 1.442695, %v936_v7  ;;  %v933_v31 = vsub.f32 0.0, %v884_v47 }
 0x109   :  { %v5425_v37 = vadd.f32 %v636_v10, %v504_v32  ;;  %v975_v10 = vmul.f32 1.442695, %v925_v62  ;;  %v3595_v32 = vld [vmem:[%s6612_s0 + $0x100] sm:$0xf] }
 0x10a   :  { %v5430_v41 = vpop.f32.mrf.mxu1  ;;  %v3596_v46 = vor.u32 %v4538_v33, %v3595_v32 }
 0x10b   :  { %v888_v51 = vand.u32 2147483647, %v5425_v37 }
 0x10d   :  { %v937_v1 = vsub.f32 0.0, %v888_v51  ;;  %v991_v51 = vmul.f32 1.442695, %v933_v31 }
 0x10e   :  { %v506_v49 = vpop.f32.mrf.mxu0 }
 0x10f   :  { %v507_v52 = vadd.f32 %v5296_v4, %v506_v49  ;;  %v930_v49 = vsub.f32 0.0, %v881_v26 }
 0x111   :  { %v5449_v61 = vadd.f32 %v639_v18, %v507_v52  ;;  %545 = vmatmul.bf16.gmra.mxu0 %v3588_v45  ;;  %v999_v18 = vmul.f32 1.442695, %v937_v1  ;;  %v3613_v1 = vld [vmem:[%s6612_s0 + $0x128] sm:$0xf0]  ;;  %v985_v14 = vmul.f32 1.442695, %v930_v49 }
 0x112   :  { %v5457_v8 = vpop.f32.mrf.mxu1  ;;  %v3616_v47 = vor.u32 %v4541_v55, %v3613_v1 }
 0x113   :  { %v889_v2 = vand.u32 2147483647, %v5449_v61 }
 0x115   :  { %v938_v12 = vsub.f32 0.0, %v889_v2  ;;  %3710 = vmatmul.msk.bf16.gmra.mxu1 %vm386_vm0, %v3608_v5  ;;  %v877_v5 = vand.u32 2147483647, %v5324_v25 }
 0x116   :  { %v508_v15 = vpop.f32.mrf.mxu0 }
 0x117   :  { %v1001_v19 = vmul.f32 1.442695, %v938_v12  ;;  %v509_v20 = vadd.f32 %v5296_v4, %v508_v15 }
 0x119   :  { %4879 = vpow2.f32 %v1001_v19  ;;  %v5467_v28 = vadd.f32 %v5405_v22, %v509_v20  ;;  %v926_v20 = vsub.f32 0.0, %v877_v5 }
 0x11a   :  { %4881 = vpow2.f32 %v973_v9  ;;  %v5476_v22 = vpop.f32.mrf.mxu1 }
 0x11b   :  { %v890_v36 = vand.u32 2147483647, %v5467_v28  ;;  %4883 = vpow2.f32 %v999_v18 }
 0x11c   :  { %4885 = vpow2.f32 %v997_v24 }
 0x11d   :  { %v939_v45 = vsub.f32 0.0, %v890_v36  ;;  %4887 = vpow2.f32 %v975_v10 }
 0x11e   :  { %v511_v52 = vpop.f32.mrf.mxu0  ;;  %4889 = vpow2.f32 %v979_v13  ;;  %v929_v13 = vsub.f32 0.0, %v880_v48 }
 0x11f   :  { %v4880_v56 = vpop.eup %4879  ;;  %v512_v59 = vadd.f32 %v5296_v4, %v511_v52  ;;  %v1003_v60 = vmul.f32 1.442695, %v939_v45  ;;  %4891 = vpow2.f32 %v995_v35  ;;  %v977_v35 = vmul.f32 1.442695, %v926_v20 }
 0x120   :  { %v4882_v62 = vpop.eup %4881  ;;  %4893 = vpow2.f32 %v993_v42  ;;  %v1085_v10 = vadd.f32 1.0, %v4880_v56  ;;  %v983_v26 = vmul.f32 1.442695, %v929_v13  ;;  %v3603_v42 = vld [vmem:[%s6612_s0 + $0x110] sm:$0xf] }
 0x121   :  { %v4884_v2 = vpop.eup %4883  ;;  %v5488_v7 = vadd.f32 %v5413_v29, %v512_v59  ;;  %550 = vmatmul.bf16.gmra.mxu0 %v3596_v46  ;;  %4895 = vpow2.f32 %v1003_v60  ;;  %v3604_v56 = vor.u32 %v4540_v43, %v3603_v42  ;;  %v5510_v60 = vadd.f32 1.0, %v4882_v62 }
 0x122   :  { %v4886_v9 = vpop.eup %4885  ;;  %4897 = vpow2.f32 %v991_v51  ;;  %v5490_v17 = vpop.f32.mrf.mxu1  ;;  %v1084_v18 = vadd.f32 1.0, %v4884_v2 }
 0x123   :  { %v4888_v12 = vpop.eup %4887  ;;  %4899 = vpow2.f32 %v987_v57  ;;  %v1083_v29 = vadd.f32 1.0, %v4886_v9  ;;  %v4860_v57 = vld [vmem:[%s6614_s7 + $0x38] sm:$0xff]  }
 0x124   :  { %v4890_v15 = vpop.eup %4889  ;;  %4901 = vpow2.f32 %v981_v63  ;;  %v5508_v59 = vadd.f32 1.0, %v4888_v12  ;;  %v840_v12 = vmax.f32 %v5449_v61, 0.0 }
 0x125   :  { %v4892_v19 = vpop.eup %4891  ;;  %4903 = vpow2.f32 %v989_v6  ;;  %3711 = vmatmul.msk.bf16.gmra.mxu1 %vm386_vm0, %v3616_v47  ;;  %v5512_v5 = vadd.f32 1.0, %v4890_v15  ;;  %v4788_v47 = vunpack.c.l.bf16 %v4860_v57  ;;  %v3621_v15 = vld [vmem:[%s6612_s0 + $0x138] sm:$0xf0] }
 0x126   :  { %v4894_v21 = vpop.eup %4893  ;;  %v513_v23 = vpop.f32.mrf.mxu0  ;;  %4905 = vlog2.f32 %v1085_v10  ;;  %v1082_v33 = vadd.f32 1.0, %v4892_v19  ;;  %v4789_v10 = vunpack.c.h.bf16 %v4860_v57  ;;  %v4858_v57 = vld [vmem:[%s6614_s7 + $0x28] sm:$0xff]  }
 0x127   :  { %v4896_v24 = vpop.eup %4895  ;;  %4907 = vpow2.f32 %v985_v14  ;;  %v514_v27 = vadd.f32 %v5296_v4, %v513_v23  ;;  %v1081_v45 = vadd.f32 1.0, %v4894_v21  ;;  %v4859_v23 = vld [vmem:[%s6614_s7 + $0x30] sm:$0xff]  }
 0x128   :  { %v4898_v31 = vpop.eup %4897  ;;  %v1086_v32 = vadd.f32 1.0, %v4896_v24  ;;  %4909 = vlog2.f32 %v1084_v18  ;;  %v4543_v18 = vld [vmem:[%s6612_s0 + $0x134] sm:$0xf]  ;;  %v4784_v43 = vunpack.c.l.bf16 %v4859_v23 }
 0x129   :  { %v4900_v34 = vpop.eup %4899  ;;  %v5495_v36 = vadd.f32 %v5430_v41, %v514_v27  ;;  %4911 = vlog2.f32 %v1083_v29  ;;  %v1080_v48 = vadd.f32 1.0, %v4898_v31  ;;  %v841_v29 = vmax.f32 %v5467_v28, 0.0 }
 0x12a   :  { %v4902_v38 = vpop.eup %4901  ;;  %4913 = vlog2.f32 %v1086_v32  ;;  %v5503_v51 = vpop.f32.mrf.mxu1  ;;  %v1078_v41 = vadd.f32 1.0, %v4900_v34  ;;  %v4785_v27 = vunpack.c.h.bf16 %v4859_v23  ;;  %v839_v31 = vmax.f32 %v5425_v37, 0.0  ;;  %v3611_v23 = vld [vmem:[%s6612_s0 + $0x120] sm:$0xf] }
 0x12b   :  { %v4904_v46 = vpop.eup %4903  ;;  %4915 = vpow2.f32 %v983_v26  ;;  %v1075_v2 = vadd.f32 1.0, %v4902_v38  ;;  %v3624_v38 = vor.u32 %v4543_v18, %v3621_v15 }
 0x12c   :  { %v4906_v49 = vpop.eup %4905  ;;  %4917 = vlog2.f32 %v1082_v33  ;;  %v1079_v1 = vadd.f32 1.0, %v4904_v46 }
 0x12d   :  { %v4908_v52 = vpop.eup %4907  ;;  %4919 = vpow2.f32 %v977_v35  ;;  %v1149_v13 = vmul.f32 0.6931472, %v4906_v49 }
 0x12e   :  { %v4910_v63 = vpop.eup %4909  ;;  %v516_v55 = vpop.f32.mrf.mxu0  ;;  %4921 = vlog2.f32 %v1081_v45  ;;  %v1077_v62 = vadd.f32 1.0, %v4908_v52  ;;  %v838_v45 = vmax.f32 %v5428_v40, 0.0  ;;  %v1281_v52 = vmul.f32 %v4788_v47, %v5449_v61 }
 0x12f   :  { %v4912_v6 = vpop.eup %4911  ;;  %v517_v9 = vadd.f32 %v5296_v4, %v516_v55  ;;  %4923 = vlog2.f32 %v1080_v48  ;;  %v1147_v24 = vmul.f32 0.6931472, %v4910_v63  ;;  %v1232_v35 = vadd.f32 %v1149_v13, %v840_v12 }
 0x130   :  { %v4914_v14 = vpop.eup %4913  ;;  %4925 = vlog2.f32 %v1078_v41  ;;  %v1145_v32 = vmul.f32 0.6931472, %v4912_v6  ;;  %v4781_v6 = vunpack.c.h.bf16 %v4858_v57  ;;  %v4780_v12 = vunpack.c.l.bf16 %v4858_v57 }
 0x131   :  { %v4916_v19 = vpop.eup %4915  ;;  %v5523_v20 = vadd.f32 %v5457_v8, %v517_v9  ;;  %555 = vmatmul.bf16.gmra.mxu0 %v3604_v56  ;;  %v1151_v21 = vmul.f32 0.6931472, %v4914_v14  ;;  %4927 = vlog2.f32 %v1079_v1  ;;  %v1282_v8 = vmul.f32 %v4789_v10, %v5467_v28 }
 0x132   :  { %v4918_v26 = vpop.eup %4917  ;;  %v5532_v46 = vpop.f32.mrf.mxu1  ;;  %4929 = vlog2.f32 %v1077_v62  ;;  %v1076_v48 = vadd.f32 1.0, %v4916_v19  ;;  %v1231_v56 = vadd.f32 %v1147_v24, %v839_v31  ;;  %v1280_v1 = vmul.f32 %v4785_v27, %v5425_v37  ;;  %v4542_v24 = vld [vmem:[%s6612_s0 + $0x124] sm:$0xf0] }
 0x133   :  { %v4920_v33 = vpop.eup %4919  ;;  %v1233_v34 = vadd.f32 %v1151_v21, %v841_v29  ;;  %v1143_v28 = vmul.f32 0.6931472, %v4918_v26  ;;  %v837_v9 = vmax.f32 %v5436_v50, 0.0  ;;  %4931 = vlog2.f32 %v1075_v2  ;;  %v4857_v29 = vld [vmem:[%s6614_s7 + $0x20] sm:$0xff]  }
 0x134   :  { %v4922_v42 = vpop.eup %4921  ;;  %v1330_v13 = vsub.f32 %v1281_v52, %v1232_v35  ;;  %v1230_v14 = vadd.f32 %v1145_v32, %v838_v45  ;;  %v836_v62 = vmax.f32 %v5440_v54, 0.0  ;;  %4933 = vlog2.f32 %v1076_v48 }
 0x135   :  { %v4924_v49 = vpop.eup %4923  ;;  %v1331_v41 = vsub.f32 %v1282_v8, %v1233_v34  ;;  %v1141_v61 = vmul.f32 0.6931472, %v4922_v42  ;;  %3712 = vmatmul.msk.bf16.gmra.mxu1 %vm386_vm0, %v3624_v38  ;;  %v1329_v15 = vsub.f32 %v1280_v1, %v1231_v56  ;;  %v1279_v2 = vmul.f32 %v4784_v43, %v5428_v40 }
 0x136   :  { %v4926_v63 = vpop.eup %4925  ;;  %v518_v55 = vpop.f32.mrf.mxu0  ;;  %v1139_v18 = vmul.f32 0.6931472, %v4924_v49  ;;  %v1229_v19 = vadd.f32 %v1143_v28, %v837_v9  ;;  %v835_v26 = vmax.f32 %v5452_v0, 0.0  ;;  %v1073_v27 = vadd.f32 1.0, %v4920_v33 }
 0x137   :  { %v519_v10 = vadd.f32 %v5296_v4, %v518_v55  ;;  %1378 = vmatpush.msra.mxu2 %v1331_v41  ;;  %v4928_v47 = vpop.eup %4927  ;;  %4935 = vlog2.f32 %v5508_v59  ;;  %v1328_v40 = vsub.f32 %v1279_v2, %v1230_v14  ;;  %v1278_v31 = vmul.f32 %v4781_v6, %v5436_v50  ;;  %v4856_v50 = vld [vmem:[%s6614_s7 + $0x18] sm:$0xff]  }
 0x138   :  { %v4930_v21 = vpop.eup %4929  ;;  %v1228_v32 = vadd.f32 %v1141_v61, %v836_v62  ;;  %v1137_v34 = vmul.f32 0.6931472, %v4928_v47  ;;  %v4776_v35 = vunpack.c.l.bf16 %v4857_v29  ;;  %v834_v38 = vmax.f32 %v5383_v3, 0.0 }
 0x139   :  { %v5544_v37 = vadd.f32 %v5476_v22, %v519_v10  ;;  %1379 = vmatpush.msra.mxu2 %v1330_v13  ;;  %v4777_v22 = vunpack.c.h.bf16 %v4857_v29  ;;  %v4932_v8 = vpop.eup %4931  ;;  %v1135_v42 = vmul.f32 0.6931472, %v4926_v63  ;;  %4937 = vlog2.f32 %v5512_v5  ;;  %v4545_v10 = vld [vmem:[%s6612_s0 + $0x144] sm:$0xf]  ;;  %v3629_v13 = vld [vmem:[%s6612_s0 + $0x148] sm:$0xf0] }
 0x13a   :  { %v5561_v43 = vpop.f32.mrf.mxu1  ;;  %v1327_v45 = vsub.f32 %v1278_v31, %v1229_v19  ;;  %v3612_v33 = vor.u32 %v4542_v24, %v3611_v23  ;;  %v1277_v59 = vmul.f32 %v4780_v12, %v5440_v54  ;;  %v1227_v48 = vadd.f32 %v1139_v18, %v835_v26  ;;  %v4934_v49 = vpop.eup %4933 }
 0x13b   :  { %1380 = vmatpush.msra.mxu2 %v1329_v15  ;;  %v4773_v52 = vunpack.c.h.bf16 %v4856_v50  ;;  %v833_v56 = vmax.f32 %v5368_v58, 0.0  ;;  %v1133_v57 = vmul.f32 0.6931472, %v4930_v21  ;;  %4939 = vlog2.f32 %v1073_v27 }
 0x13c   :  { %v1326_v28 = vsub.f32 %v1277_v59, %v1228_v32  ;;  %v1276_v63 = vmul.f32 %v4777_v22, %v5452_v0  ;;  %v1226_v55 = vadd.f32 %v1137_v34, %v834_v38  ;;  %v1275_v1 = vmul.f32 %v4776_v35, %v5383_v3  ;;  %v4855_v3 = vld [vmem:[%s6614_s7 + $0x10] sm:$0xff]  }
 0x13d   :  { %1381 = vmatpush.msra.mxu2 %v1328_v40  ;;  %v4936_v54 = vpop.eup %4935  ;;  %v4772_v6 = vunpack.c.l.bf16 %v4856_v50  ;;  %v832_v9 = vmax.f32 %v5364_v53, 0.0  ;;  %v1225_v61 = vadd.f32 %v1135_v42, %v833_v56  ;;  %v1131_v47 = vmul.f32 0.6931472, %v4934_v49  ;;  %v3619_v56 = vld [vmem:[%s6612_s0 + $0x130] sm:$0xf] }
 0x13e   :  { %v521_v41 = vpop.f32.mrf.mxu0  ;;  %v1325_v0 = vsub.f32 %v1276_v63, %v1227_v48  ;;  %v4769_v62 = vunpack.c.h.bf16 %v4855_v3  ;;  %v831_v18 = vmax.f32 %v5347_v44, 0.0  ;;  %v1129_v15 = vmul.f32 0.6931472, %v4932_v8 }
 0x13f   :  { %v522_v5 = vadd.f32 %v5296_v4, %v521_v41  ;;  %1382 = vmatpush.msra.mxu2 %v1327_v45  ;;  %v4938_v12 = vpop.eup %4937  ;;  %4941 = vlog2.f32 %v5510_v60  ;;  %v1324_v2 = vsub.f32 %v1275_v1, %v1226_v55  ;;  %v1224_v19 = vadd.f32 %v1133_v57, %v832_v9  ;;  %v4854_v60 = vld [vmem:[%s6614_s7 + $0x8] sm:$0xff]   ;;  %v4544_v57 = vld [vmem:[%s6612_s0 + $0x134] sm:$0xf0] }
 0x140   :  { %v3632_v29 = vor.u32 %v4545_v10, %v3629_v13  ;;  %v4768_v23 = vunpack.c.l.bf16 %v4855_v3  ;;  %v830_v24 = vmax.f32 %v5343_v39, 0.0  ;;  %v1273_v27 = vmul.f32 %v4772_v6, %v5364_v53 }
 0x141   :  { %v5579_v14 = vadd.f32 %v5490_v17, %v522_v5  ;;  %560 = vmatmul.bf16.gmra.mxu0 %v3612_v33  ;;  %1383 = vmatpush.msra.mxu2 %v1326_v28  ;;  %v1274_v17 = vmul.f32 %v4773_v52, %v5368_v58  ;;  %v4940_v21 = vpop.eup %4939  ;;  %v1223_v40 = vadd.f32 %v1131_v47, %v831_v18  ;;  %v1127_v31 = vmul.f32 0.6931472, %v4938_v12  ;;  %v4759_v52 = vld [vmem:[%s6614_s7] sm:$0xff]   ;;  %v3637_v18 = vld [vmem:[%s6612_s0 + $0x158] sm:$0xf0] }
 0x142   :  { %v5588_v22 = vpop.f32.mrf.mxu1  ;;  %v1272_v58 = vmul.f32 %v4769_v62, %v5347_v44  ;;  %v4765_v34 = vunpack.c.h.bf16 %v4854_v60  ;;  %v829_v8 = vmax.f32 %v5328_v30, 0.0  ;;  %v1322_v38 = vsub.f32 %v1273_v27, %v1224_v19  ;;  %v4547_v62 = vld [vmem:[%s6612_s0 + $0x154] sm:$0xf] }
 0x143   :  { %1384 = vmatpush.msra.mxu2 %v1325_v0  ;;  %v1323_v26 = vsub.f32 %v1274_v17, %v1225_v61  ;;  %v1222_v42 = vadd.f32 %v1129_v15, %v830_v24  ;;  %v1125_v45 = vmul.f32 0.6931472, %v4940_v21  ;;  %v4764_v33 = vunpack.c.l.bf16 %v4854_v60  ;;  %v4549_v60 = vld [vmem:[%s6612_s0 + $0x164] sm:$0xf] }
 0x144   :  { %v828_v59 = vmax.f32 %v5324_v25, 0.0  ;;  %v1123_v48 = vmul.f32 0.6931472, %v4936_v54  ;;  %v1321_v44 = vsub.f32 %v1272_v58, %v1223_v40  ;;  %v1271_v49 = vmul.f32 %v4768_v23, %v5343_v39 }
 0x145   :  { %1385 = vmatpush.msra.mxu2 %v1324_v2  ;;  %3713 = vmatmul.msk.bf16.gmra.mxu1 %vm386_vm0, %v3632_v29  ;;  %v4942_v53 = vpop.eup %4941  ;;  %v1221_v41 = vadd.f32 %v1127_v31, %v829_v8  ;;  %v4761_v5 = vunpack.c.h.bf16 %v4759_v52  ;;  %v1270_v39 = vmul.f32 %v4765_v34, %v5328_v30  ;;  %v4760_v54 = vunpack.c.l.bf16 %v4759_v52  ;;  %v3635_v8 = vld [vmem:[%s6612_s0 + $0x150] sm:$0xf]  ;;  %v5676_v52 = vld [vmem:[%s6612_s0 + $0x180] sm:$0xff] }
 0x146   :  { %v523_v32 = vpop.f32.mrf.mxu0  ;;  %v1320_v28 = vsub.f32 %v1271_v49, %v1222_v42  ;;  %v1220_v63 = vadd.f32 %v1125_v45, %v828_v59  ;;  %v1121_v55 = vmul.f32 0.6931472, %v4942_v53  ;;  %v826_v1 = vmax.f32 %v5305_v11, 0.0  ;;  %v3653_v53 = vld [vmem:[%s6612_s0 + $0x178] sm:$0xf0] }
 0x147   :  { %v524_v35 = vadd.f32 %v5296_v4, %v523_v32  ;;  %1386 = vmatpush.msra.mxu2 %v1323_v26  ;;  %v1319_v9 = vsub.f32 %v1270_v39, %v1221_v41  ;;  %v3620_v10 = vor.u32 %v4544_v57, %v3619_v56  ;;  %v1269_v13 = vmul.f32 %v4764_v33, %v5324_v25  ;;  %v4550_v49 = vld [vmem:[%s6612_s0 + $0x164] sm:$0xf0] }
 0x148   :  { %v1268_v30 = vmul.f32 %v4761_v5, %v5309_v16  ;;  %v1218_v12 = vadd.f32 %v1121_v55, %v826_v1  ;;  %v1267_v2 = vmul.f32 %v4760_v54, %v5305_v11  ;;  %v4546_v11 = vld [vmem:[%s6612_s0 + $0x144] sm:$0xf0]  ;;  %v256_v5 = vunpack.c.h.b16 %v5676_v52  ;;  %v3651_v54 = vld [vmem:[%s6612_s0 + $0x170] sm:$0xf]  ;;  %v4552_v1 = vld [vmem:[%s6612_s0 + $0x174] sm:$0xf0] }
 0x149   :  { %v5600_v50 = vadd.f32 %v5503_v51, %v524_v35  ;;  %1387 = vmatpush.msra.mxu2 %v1322_v38  ;;  %v827_v51 = vmax.f32 %v5309_v16, 0.0  ;;  %v1318_v47 = vsub.f32 %v1269_v13, %v1220_v63  ;;  %v3640_v16 = vor.u32 %v4547_v62, %v3637_v18  ;;  %v4548_v35 = vld [vmem:[%s6612_s0 + $0x154] sm:$0xf0] }
 0x14a   :  { %v5615_v6 = vpop.f32.mrf.mxu1  ;;  %v1316_v17 = vsub.f32 %v1267_v2, %v1218_v12  ;;  %v3636_v42 = vor.u32 %v4548_v35, %v3635_v8  ;;  %v891_v13 = vand.u32 2147483647, %v5488_v7  ;;  %v3652_v12 = vor.u32 %v4552_v1, %v3651_v54 }
 0x14b   :  { %1388 = vmatpush.msra.mxu2 %v1321_v44  ;;  %v1219_v0 = vadd.f32 %v1123_v48, %v827_v51  ;;  %v3643_v44 = vld [vmem:[%s6612_s0 + $0x160] sm:$0xf]  ;;  %v306_v51 = vpack.c.b16 %v256_v5, %v256_v5 }
 0x14c   :  { %v3644_v56 = vor.u32 %v4550_v49, %v3643_v44  ;;  %v896_v44 = vand.u32 2147483647, %v5600_v50 }
 0x14d   :  { %1389 = vmatpush.msra.mxu2 %v1320_v28  ;;  %v1317_v25 = vsub.f32 %v1268_v30, %v1219_v0  ;;  %v893_v30 = vand.u32 2147483647, %v5523_v20 }
 0x14e   :  { %v526_v61 = vpop.f32.mrf.mxu0 }
 0x14f   :  { %v527_v3 = vadd.f32 %v5296_v4, %v526_v61  ;;  %1390 = vmatpush.msra.mxu2 %v1319_v9 }
 0x151   :  { %v5627_v15 = vadd.f32 %v5532_v46, %v527_v3  ;;  %565 = vmatmul.bf16.gmra.mxu0 %v3620_v10  ;;  %1391 = vmatpush.msra.mxu2 %v1318_v47  ;;  %v3627_v46 = vld [vmem:[%s6612_s0 + $0x140] sm:$0xf]  ;;  %v892_v47 = vand.u32 2147483647, %v5495_v36 }
 0x152   :  { %v5630_v19 = vpop.f32.mrf.mxu1  ;;  %v3628_v26 = vor.u32 %v4546_v11, %v3627_v46  ;;  %v942_v11 = vsub.f32 0.0, %v893_v30 }
 0x153   :  { %1392 = vmatpush.msra.mxu2 %v1317_v25  ;;  %v941_v46 = vsub.f32 0.0, %v892_v47 }
 0x154   :  { %v1009_v8 = vmul.f32 1.442695, %v942_v11 }
 0x155   :  { %1393 = vmatpush.msra.mxu2 %v1316_v17  ;;  %3714 = vmatmul.msk.bf16.gmra.mxu1 %vm386_vm0, %v3640_v16  ;;  %v940_v16 = vsub.f32 0.0, %v891_v13  ;;  %v945_v13 = vsub.f32 0.0, %v896_v44 }
 0x156   :  { %v528_v29 = vpop.f32.mrf.mxu0 }
 0x157   :  { %v529_v21 = vadd.f32 %v5296_v4, %v528_v29 }
 0x159   :  { %v5635_v23 = vadd.f32 %v5561_v43, %v529_v21  ;;  %v3645_v43 = vld [vmem:[%s6612_s0 + $0x168] sm:$0xf0] }
 0x15a   :  { %v671_v24 = vpop.f32.mrf.mxu1  ;;  %v3648_v32 = vor.u32 %v4549_v60, %v3645_v43  ;;  %v1005_v43 = vmul.f32 1.442695, %v940_v16 }
 0x15b   :  { %v898_v54 = vand.u32 2147483647, %v5635_v23 }
 0x15c   :  { %4943 = vpow2.f32 %v1005_v43 }
 0x15e   :  { %v531_v27 = vpop.f32.mrf.mxu0 }
 0x15f   :  { %v532_v40 = vadd.f32 %v5296_v4, %v531_v27  ;;  %v894_v27 = vand.u32 2147483647, %v5544_v37 }
 0x161   :  { %v5651_v31 = vadd.f32 %v5588_v22, %v532_v40  ;;  %570 = vmatmul.bf16.gmra.mxu0 %v3628_v26  ;;  %v4551_v22 = vld [vmem:[%s6612_s0 + $0x174] sm:$0xf] }
 0x162   :  { %v674_v58 = vpop.f32.mrf.mxu1  ;;  %v3656_v33 = vor.u32 %v4551_v22, %v3653_v53 }
 0x165   :  { %3715 = vmatmul.msk.bf16.gmra.mxu1 %vm386_vm0, %v3648_v32 }
 0x166   :  { %v533_v34 = vpop.f32.mrf.mxu0 }
 0x167   :  { %v534_v62 = vadd.f32 %v5296_v4, %v533_v34  ;;  %v1007_v34 = vmul.f32 1.442695, %v941_v46 }
 0x16a   :  { %v676_v38 = vpop.f32.mrf.mxu1 }
 0x16e   :  { %v536_v45 = vpop.f32.mrf.mxu0 }
 0x16f   :  { %v537_v0 = vadd.f32 %v5296_v4, %v536_v45 }
 0x171   :  { %575 = vmatmul.bf16.gmra.mxu0 %v3636_v42  ;;  %v5707_v29 = vadd.f32 %v5630_v19, %v537_v0  ;;  %v897_v42 = vand.u32 2147483647, %v5627_v15 }
 0x172   :  { %v679_v59 = vpop.f32.mrf.mxu1 }
 0x173   :  { %v901_v19 = vand.u32 2147483647, %v5707_v29 }
 0x175   :  { %3716 = vmatmul.msk.bf16.gmra.mxu1 %vm386_vm0, %v3656_v33  ;;  %v950_v49 = vsub.f32 0.0, %v901_v19 }
 0x176   :  { %v538_v48 = vpop.f32.mrf.mxu0 }
 0x177   :  { %v539_v9 = vadd.f32 %v5296_v4, %v538_v48  ;;  %v1025_v0 = vmul.f32 1.442695, %v950_v49 }
 0x179   :  { %v5702_v25 = vadd.f32 %v671_v24, %v539_v9  ;;  %v5714_v24 = vadd.f32 %v5615_v6, %v534_v62  ;;  %v895_v62 = vand.u32 2147483647, %v5579_v14 }
 0x17a   :  { %v681_v41 = vpop.f32.mrf.mxu1 }
 0x17b   :  { %v902_v40 = vand.u32 2147483647, %v5702_v25  ;;  %v900_v6 = vand.u32 2147483647, %v5714_v24 }
 0x17d   :  { %v951_v22 = vsub.f32 0.0, %v902_v40  ;;  %v1015_v40 = vmul.f32 1.442695, %v945_v13 }
 0x17e   :  { %v541_v57 = vpop.f32.mrf.mxu0 }
 0x17f   :  { %v542_v55 = vadd.f32 %v5296_v4, %v541_v57  ;;  %v899_v57 = vand.u32 2147483647, %v5651_v31  ;;  %v1027_v1 = vmul.f32 1.442695, %v951_v22 }
 0x181   :  { %580 = vmatmul.bf16.gmra.mxu0 %v3644_v56  ;;  %v5695_v61 = vadd.f32 %v674_v58, %v542_v55  ;;  %v949_v55 = vsub.f32 0.0, %v900_v6 }
 0x182   :  { %v5679_v28 = vpop.f32.mrf.mxu1 }
 0x183   :  { %v903_v21 = vand.u32 2147483647, %v5695_v61 }
 0x185   :  { %3717 = vmatmul.msk.bf16.gmra.mxu1 %vm386_vm0, %v306_v51  ;;  %v952_v32 = vsub.f32 0.0, %v903_v21  ;;  %v255_v51 = vunpack.c.l.b16 %v5676_v52  ;;  %v5738_v52 = vpop.eup %4943  ;;  %v947_v21 = vsub.f32 0.0, %v898_v54 }
 0x186   :  { %v543_v39 = vpop.f32.mrf.mxu0 }
 0x187   :  { %v544_v63 = vadd.f32 %v5296_v4, %v543_v39  ;;  %v1029_v56 = vmul.f32 1.442695, %v952_v32 }
 0x189   :  { %v5691_v10 = vadd.f32 %v676_v38, %v544_v63  ;;  %v943_v38 = vsub.f32 0.0, %v894_v27  ;;  %v946_v63 = vsub.f32 0.0, %v897_v42 }
 0x18a   :  { %v5697_v3 = vpop.f32.mrf.mxu1 }
 0x18b   :  { %v904_v2 = vand.u32 2147483647, %v5691_v10  ;;  %v1011_v39 = vmul.f32 1.442695, %v943_v38 }
 0x18d   :  { %v953_v60 = vsub.f32 0.0, %v904_v2  ;;  %v1023_v2 = vmul.f32 1.442695, %v949_v55 }
 0x18e   :  { %v546_v18 = vpop.f32.mrf.mxu0 }
 0x18f   :  { %v547_v17 = vadd.f32 %v5296_v4, %v546_v18  ;;  %v1031_v53 = vmul.f32 1.442695, %v953_v60  ;;  %v1017_v18 = vmul.f32 1.442695, %v946_v63 }
 0x191   :  { %v5710_v26 = vadd.f32 %v679_v59, %v547_v17  ;;  %585 = vmatmul.bf16.gmra.mxu0 %v3652_v12  ;;  %v5726_v59 = vld [vmem:[%s6613_s2] ss:$0 sm:$0xff]  ;;  %v305_v12 = vpack.c.b16 %v255_v51, %v255_v51 }
 0x192   :  { %v5719_v58 = vpop.f32.mrf.mxu1 }
 0x193   :  { %v905_v4 = vand.u32 2147483647, %v5710_v26 }
 0x195   :  { %v954_v35 = vsub.f32 0.0, %v905_v4 }
 0x196   :  { %v548_v45 = vpop.f32.mrf.mxu0 }
 0x197   :  { %v1033_v33 = vmul.f32 1.442695, %v954_v35  ;;  %v549_v48 = vadd.f32 %v5726_v59, %v548_v45  ;;  %v1019_v35 = vmul.f32 1.442695, %v947_v21 }
 0x199   :  { %4945 = vpow2.f32 %v1033_v33  ;;  %v5731_v5 = vadd.f32 %v681_v41, %v549_v48  ;;  %v948_v41 = vsub.f32 0.0, %v899_v57 }
 0x19a   :  { %4947 = vpow2.f32 %v1007_v34  ;;  %v5736_v47 = vpop.f32.mrf.mxu1 }
 0x19b   :  { %4949 = vpow2.f32 %v1031_v53  ;;  %v906_v9 = vand.u32 2147483647, %v5731_v5  ;;  %v1021_v4 = vmul.f32 1.442695, %v948_v41 }
 0x19c   :  { %4951 = vpow2.f32 %v1029_v56 }
 0x19d   :  { %4953 = vpow2.f32 %v1009_v8  ;;  %v955_v30 = vsub.f32 0.0, %v906_v9  ;;  %v944_v8 = vsub.f32 0.0, %v895_v62 }
 0x19e   :  { %v551_v17 = vpop.f32.mrf.mxu0  ;;  %4955 = vpow2.f32 %v1011_v39 }
 0x19f   :  { %v4946_v16 = vpop.eup %4945  ;;  %4957 = vpow2.f32 %v1027_v1  ;;  %v1035_v46 = vmul.f32 1.442695, %v955_v30  ;;  %v552_v11 = vadd.f32 %v5726_v59, %v551_v17  ;;  %v1013_v48 = vmul.f32 1.442695, %v944_v8  ;;  %v4867_v8 = vld [vmem:[%s6614_s7 + $0x70] sm:$0xff]  }
 0x1a0   :  { %v5742_v27 = vpop.eup %4947  ;;  %4959 = vpow2.f32 %v1025_v0  ;;  %v1101_v32 = vadd.f32 1.0, %v4946_v16 }
 0x1a1   :  { %v4950_v60 = vpop.eup %4949  ;;  %v5745_v43 = vadd.f32 %v5679_v28, %v552_v11  ;;  %590 = vmatmul.bf16.gmra.mxu0 %v305_v12  ;;  %4961 = vpow2.f32 %v1035_v46  ;;  %v4868_v12 = vld [vmem:[%s6614_s7 + $0x78] sm:$0xff]  }
 0x1a2   :  { %v4952_v19 = vpop.eup %4951  ;;  %4963 = vpow2.f32 %v1023_v2  ;;  %v5749_v42 = vpop.f32.mrf.mxu1  ;;  %v1100_v6 = vadd.f32 1.0, %v4950_v60  ;;  %v4821_v16 = vunpack.c.h.bf16 %v4868_v12  ;;  %v4820_v11 = vunpack.c.l.bf16 %v4868_v12 }
 0x1a3   :  { %v4954_v34 = vpop.eup %4953  ;;  %4965 = vpow2.f32 %v1017_v18  ;;  %v1099_v22 = vadd.f32 1.0, %v4952_v19 }
 0x1a4   :  { %v5747_v38 = vpop.eup %4955  ;;  %4967 = vpow2.f32 %v1015_v40  ;;  %v1089_v54 = vadd.f32 1.0, %v4954_v34  ;;  %v856_v40 = vmax.f32 %v5710_v26, 0.0 }
 0x1a5   :  { %v4958_v45 = vpop.eup %4957  ;;  %4969 = vpow2.f32 %v1021_v4 }
 0x1a6   :  { %v4960_v28 = vpop.eup %4959  ;;  %v553_v53 = vpop.f32.mrf.mxu0  ;;  %4971 = vlog2.f32 %v1101_v32  ;;  %v1098_v57 = vadd.f32 1.0, %v4958_v45  ;;  %v857_v32 = vmax.f32 %v5731_v5, 0.0  ;;  %v4817_v45 = vunpack.c.h.bf16 %v4867_v8 }
 0x1a7   :  { %v4962_v33 = vpop.eup %4961  ;;  %v554_v44 = vadd.f32 %v5726_v59, %v553_v53  ;;  %4973 = vpow2.f32 %v1019_v35  ;;  %v1097_v63 = vadd.f32 1.0, %v4960_v28 }
 0x1a8   :  { %v4964_v49 = vpop.eup %4963  ;;  %v1102_v56 = vadd.f32 1.0, %v4962_v33  ;;  %4975 = vlog2.f32 %v1100_v6 }
 0x1a9   :  { %v4966_v51 = vpop.eup %4965  ;;  %v5753_v39 = vadd.f32 %v5697_v3, %v554_v44  ;;  %4977 = vlog2.f32 %v1099_v22  ;;  %v1096_v9 = vadd.f32 1.0, %v4964_v49  ;;  %v855_v22 = vmax.f32 %v5691_v10, 0.0 }
 0x1aa   :  { %v4968_v55 = vpop.eup %4967  ;;  %4979 = vlog2.f32 %v1102_v56  ;;  %v5755_v0 = vpop.f32.mrf.mxu1  ;;  %v1093_v41 = vadd.f32 1.0, %v4966_v51  ;;  %v4816_v56 = vunpack.c.l.bf16 %v4867_v8 }
 0x1ab   :  { %v4970_v1 = vpop.eup %4969  ;;  %4981 = vpow2.f32 %v1013_v48  ;;  %v1092_v28 = vadd.f32 1.0, %v4968_v55  ;;  %v1298_v48 = vmul.f32 %v4821_v16, %v5731_v5  ;;  %v4866_v5 = vld [vmem:[%s6614_s7 + $0x68] sm:$0xff]  }
 0x1ac   :  { %v4972_v13 = vpop.eup %4971  ;;  %4983 = vlog2.f32 %v1098_v57  ;;  %v1095_v18 = vadd.f32 1.0, %v4970_v1  ;;  %v854_v57 = vmax.f32 %v5695_v61, 0.0  ;;  %v4813_v12 = vunpack.c.h.bf16 %v4866_v5 }
 0x1ad   :  { %v4974_v30 = vpop.eup %4973  ;;  %4985 = vlog2.f32 %v1097_v63  ;;  %v1181_v21 = vmul.f32 0.6931472, %v4972_v13 }
 0x1ae   :  { %v4976_v3 = vpop.eup %4975  ;;  %v556_v62 = vpop.f32.mrf.mxu0  ;;  %4987 = vlog2.f32 %v1089_v54  ;;  %v1094_v60 = vadd.f32 1.0, %v4974_v30 }
 0x1af   :  { %v4978_v2 = vpop.eup %4977  ;;  %v557_v17 = vadd.f32 %v5726_v59, %v556_v62  ;;  %4989 = vlog2.f32 %v1096_v9  ;;  %v1179_v35 = vmul.f32 0.6931472, %v4976_v3  ;;  %v1297_v9 = vmul.f32 %v4820_v11, %v5710_v26 }
 0x1b0   :  { %v4980_v46 = vpop.eup %4979  ;;  %4991 = vlog2.f32 %v1093_v41  ;;  %v1177_v44 = vmul.f32 0.6931472, %v4978_v2  ;;  %v853_v3 = vmax.f32 %v5702_v25, 0.0 }
 0x1b1   :  { %v4982_v4 = vpop.eup %4981  ;;  %v5763_v19 = vadd.f32 %v5719_v58, %v557_v17  ;;  %v1183_v34 = vmul.f32 0.6931472, %v4980_v46  ;;  %4993 = vlog2.f32 %v1095_v18  ;;  %v1248_v58 = vadd.f32 %v1181_v21, %v856_v40 }
 0x1b2   :  { %v4984_v6 = vpop.eup %4983  ;;  %4995 = vlog2.f32 %v1094_v60  ;;  %v5774_v51 = vpop.f32.mrf.mxu1  ;;  %v1091_v63 = vadd.f32 1.0, %v4982_v4  ;;  %v1247_v55 = vadd.f32 %v1179_v35, %v855_v22  ;;  %v1296_v17 = vmul.f32 %v4817_v45, %v5691_v10  ;;  %v4865_v10 = vld [vmem:[%s6614_s7 + $0x60] sm:$0xff]  }
 0x1b3   :  { %v4986_v53 = vpop.eup %4985  ;;  %v1249_v33 = vadd.f32 %v1183_v34, %v857_v32  ;;  %v1175_v13 = vmul.f32 0.6931472, %v4984_v6  ;;  %4997 = vlog2.f32 %v1092_v28  ;;  %v1346_v2 = vsub.f32 %v1297_v9, %v1248_v58 }
 0x1b4   :  { %v5771_v49 = vpop.eup %4987  ;;  %v1173_v62 = vmul.f32 0.6931472, %v4986_v53  ;;  %v1246_v26 = vadd.f32 %v1177_v44, %v854_v57  ;;  %v4812_v21 = vunpack.c.l.bf16 %v4866_v5  ;;  %v852_v46 = vmax.f32 %v5707_v29, 0.0 }
 0x1b5   :  { %v4990_v54 = vpop.eup %4989  ;;  %v1347_v1 = vsub.f32 %v1298_v48, %v1249_v33  ;;  %v1090_v40 = vadd.f32 1.0, %v5747_v38  ;;  %v1345_v4 = vsub.f32 %v1296_v17, %v1247_v55  ;;  %v1295_v32 = vmul.f32 %v4816_v56, %v5695_v61  ;;  %v4863_v17 = vld [vmem:[%s6614_s7 + $0x50] sm:$0xff]  }
 0x1b6   :  { %v4992_v41 = vpop.eup %4991  ;;  %v558_v30 = vpop.f32.mrf.mxu0  ;;  %v1171_v11 = vmul.f32 0.6931472, %v4990_v54  ;;  %v1245_v34 = vadd.f32 %v1175_v13, %v853_v3  ;;  %v4809_v35 = vunpack.c.h.bf16 %v4865_v10  ;;  %v851_v6 = vmax.f32 %v5714_v24, 0.0 }
 0x1b7   :  { %v559_v18 = vadd.f32 %v5726_v59, %v558_v30  ;;  %1398 = vmatpush.msra.mxu3 %v1347_v1  ;;  %v4994_v16 = vpop.eup %4993  ;;  %4999 = vlog2.f32 %v1091_v63  ;;  %v1088_v45 = vadd.f32 1.0, %v5742_v27  ;;  %v1344_v38 = vsub.f32 %v1295_v32, %v1246_v26 }
 0x1b8   :  { %v4996_v8 = vpop.eup %4995  ;;  %v1244_v22 = vadd.f32 %v1173_v62, %v852_v46  ;;  %v1169_v28 = vmul.f32 0.6931472, %v4994_v16  ;;  %v4808_v61 = vunpack.c.l.bf16 %v4865_v10  ;;  %v850_v33 = vmax.f32 %v5651_v31, 0.0 }
 0x1b9   :  { %v5786_v60 = vadd.f32 %v5736_v47, %v559_v18  ;;  %1399 = vmatpush.msra.mxu3 %v1346_v2  ;;  %v1294_v47 = vmul.f32 %v4813_v12, %v5702_v25  ;;  %v4998_v53 = vpop.eup %4997  ;;  %5001 = vlog2.f32 %v1090_v40  ;;  %v1087_v58 = vadd.f32 1.0, %v5738_v52  ;;  %v4864_v25 = vld [vmem:[%s6614_s7 + $0x58] sm:$0xff]  }
 0x1ba   :  { %v5796_v48 = vpop.f32.mrf.mxu1  ;;  %v1293_v56 = vmul.f32 %v4812_v21, %v5707_v29  ;;  %v1243_v27 = vadd.f32 %v1171_v11, %v851_v6  ;;  %v1167_v57 = vmul.f32 0.6931472, %v4996_v8  ;;  %v4805_v54 = vunpack.c.h.bf16 %v4864_v25 }
 0x1bb   :  { %1400 = vmatpush.msra.mxu3 %v1345_v4  ;;  %v1343_v44 = vsub.f32 %v1294_v47, %v1245_v34  ;;  %v849_v1 = vmax.f32 %v5635_v23, 0.0  ;;  %v1165_v9 = vmul.f32 0.6931472, %v4992_v41  ;;  %5003 = vlog2.f32 %v1088_v45 }
 0x1bc   :  { %v1342_v52 = vsub.f32 %v1293_v56, %v1244_v22  ;;  %v1292_v5 = vmul.f32 %v4809_v35, %v5714_v24  ;;  %v1242_v13 = vadd.f32 %v1169_v28, %v850_v33  ;;  %v4804_v30 = vunpack.c.l.bf16 %v4864_v25  ;;  %v4862_v35 = vld [vmem:[%s6614_s7 + $0x48] sm:$0xff]  }
 0x1bd   :  { %1401 = vmatpush.msra.mxu3 %v1344_v38  ;;  %v5000_v29 = vpop.eup %4999  ;;  %v848_v12 = vmax.f32 %v5627_v15, 0.0  ;;  %v1163_v3 = vmul.f32 0.6931472, %v4998_v53  ;;  %v1291_v41 = vmul.f32 %v4808_v61, %v5651_v31  ;;  %v1241_v2 = vadd.f32 %v1167_v57, %v849_v1  ;;  %v4861_v57 = vld [vmem:[%s6614_s7 + $0x40] sm:$0xff]  }
 0x1be   :  { %v561_v63 = vpop.f32.mrf.mxu0  ;;  %v1341_v18 = vsub.f32 %v1292_v5, %v1243_v27  ;;  %v4801_v24 = vunpack.c.h.bf16 %v4863_v17  ;;  %v847_v16 = vmax.f32 %v5600_v50, 0.0  ;;  %5005 = vlog2.f32 %v1087_v58 }
 0x1bf   :  { %v562_v55 = vadd.f32 %v5726_v59, %v561_v63  ;;  %1402 = vmatpush.msra.mxu3 %v1343_v44  ;;  %v5002_v26 = vpop.eup %5001  ;;  %v1340_v21 = vsub.f32 %v1291_v41, %v1242_v13  ;;  %v1290_v46 = vmul.f32 %v4805_v54, %v5635_v23  ;;  %v1161_v11 = vmul.f32 0.6931472, %v5000_v29 }
 0x1c0   :  { %v4800_v4 = vunpack.c.l.bf16 %v4863_v17  ;;  %v846_v31 = vmax.f32 %v5579_v14, 0.0  ;;  %v1289_v10 = vmul.f32 %v4804_v30, %v5627_v15  ;;  %v1239_v8 = vadd.f32 %v1163_v3, %v847_v16 }
 0x1c1   :  { %v5808_v62 = vadd.f32 %v5749_v42, %v562_v55  ;;  %1403 = vmatpush.msra.mxu3 %v1342_v52  ;;  %v1240_v42 = vadd.f32 %v1165_v9, %v848_v12  ;;  %v5004_v40 = vpop.eup %5003  ;;  %v1339_v34 = vsub.f32 %v1290_v46, %v1241_v2  ;;  %v1159_v6 = vmul.f32 0.6931472, %v5002_v26 }
 0x1c2   :  { %v704_v32 = vpop.f32.mrf.mxu1  ;;  %v4797_v38 = vunpack.c.h.bf16 %v4862_v35  ;;  %v845_v23 = vmax.f32 %v5544_v37, 0.0  ;;  %v1157_v47 = vmul.f32 0.6931472, %v5771_v49  ;;  %v1288_v53 = vmul.f32 %v4801_v24, %v5600_v50 }
 0x1c3   :  { %1404 = vmatpush.msra.mxu3 %v1341_v18  ;;  %v1338_v28 = vsub.f32 %v1289_v10, %v1240_v42  ;;  %v1238_v61 = vadd.f32 %v1161_v11, %v846_v31  ;;  %v4796_v33 = vunpack.c.l.bf16 %v4862_v35  ;;  %v844_v58 = vmax.f32 %v5523_v20, 0.0  ;;  %v4737_v31 = vld [vmem:[%s6615_s5 + $0x578] sm:$0xff] }
 0x1c4   :  { %v5006_v15 = vpop.eup %5005  ;;  %v1155_v44 = vmul.f32 0.6931472, %v5004_v40  ;;  %v1337_v27 = vsub.f32 %v1288_v53, %v1239_v8  ;;  %v1287_v25 = vmul.f32 %v4800_v4, %v5579_v14  ;;  %v1237_v49 = vadd.f32 %v1159_v6, %v845_v23  ;;  %3371 = vmatpush.bf16.msrb.mxu1 %v4737_v31 }
 0x1c5   :  { %1405 = vmatpush.msra.mxu3 %v1340_v21  ;;  %v4793_v63 = vunpack.c.h.bf16 %v4861_v57  ;;  %v843_v50 = vmax.f32 %v5495_v36, 0.0  ;;  %v1286_v1 = vmul.f32 %v4797_v38, %v5544_v37  ;;  %v1236_v9 = vadd.f32 %v1157_v47, %v844_v58 }
 0x1c6   :  { %v563_v45 = vpop.f32.mrf.mxu0  ;;  %v1336_v54 = vsub.f32 %v1287_v25, %v1238_v61  ;;  %v1153_v55 = vmul.f32 0.6931472, %v5006_v15  ;;  %v1285_v14 = vmul.f32 %v4796_v33, %v5523_v20  ;;  %v842_v29 = vmax.f32 %v5488_v7, 0.0 }
 0x1c7   :  { %v564_v22 = vadd.f32 %v5726_v59, %v563_v45  ;;  %1406 = vmatpush.msra.mxu3 %v1339_v34  ;;  %v1335_v5 = vsub.f32 %v1286_v1, %v1237_v49  ;;  %v1235_v13 = vadd.f32 %v1155_v44, %v843_v50  ;;  %v1284_v18 = vmul.f32 %v4793_v63, %v5495_v36 }
 0x1c8   :  { %v1334_v3 = vsub.f32 %v1285_v14, %v1236_v9  ;;  %v1234_v37 = vadd.f32 %v1153_v55, %v842_v29  ;;  %v907_v38 = vand.u32 2147483647, %v5745_v43  ;;  %v909_v63 = vand.u32 2147483647, %v5763_v19 }
 0x1c9   :  { %v5827_v56 = vadd.f32 %v5755_v0, %v564_v22  ;;  %1407 = vmatpush.msra.mxu3 %v1338_v28  ;;  %v4792_v0 = vunpack.c.l.bf16 %v4861_v57  ;;  %v1333_v2 = vsub.f32 %v1284_v18, %v1235_v13  ;;  %v908_v28 = vand.u32 2147483647, %v5753_v39 }
 0x1ca   :  { %v5835_v52 = vpop.f32.mrf.mxu1  ;;  %v956_v15 = vsub.f32 0.0, %v907_v38 }
 0x1cb   :  { %1408 = vmatpush.msra.mxu3 %v1337_v27  ;;  %v1283_v17 = vmul.f32 %v4792_v0, %v5488_v7  ;;  %v957_v57 = vsub.f32 0.0, %v908_v28 }
 0x1cc   :  { %v1037_v55 = vmul.f32 1.442695, %v956_v15 }
 0x1cd   :  { %1409 = vmatpush.msra.mxu3 %v1336_v54  ;;  %v1332_v20 = vsub.f32 %v1283_v17, %v1234_v37  ;;  %v910_v54 = vand.u32 2147483647, %v5786_v60 }
 0x1ce   :  { %v566_v30 = vpop.f32.mrf.mxu0  ;;  %5007 = vpow2.f32 %v1037_v55 }
 0x1cf   :  { %v567_v12 = vadd.f32 %v5726_v59, %v566_v30  ;;  %1410 = vmatpush.msra.mxu3 %v1335_v5  ;;  %v1039_v30 = vmul.f32 1.442695, %v957_v57  ;;  %v959_v18 = vsub.f32 0.0, %v910_v54 }
 0x1d1   :  { %v5842_v41 = vadd.f32 %v5774_v51, %v567_v12  ;;  %1411 = vmatpush.msra.mxu3 %v1334_v3  ;;  %v958_v12 = vsub.f32 0.0, %v909_v63  ;;  %5009 = vpow2.f32 %v1039_v30  ;;  %v1043_v31 = vmul.f32 1.442695, %v959_v18 }
 0x1d2   :  { %v709_v26 = vpop.f32.mrf.mxu1 }
 0x1d3   :  { %1412 = vmatpush.msra.mxu3 %v1333_v2 }
 0x1d5   :  { %1413 = vmatpush.msra.mxu3 %v1332_v20 }
 0x1d6   :  { %v568_v24 = vpop.f32.mrf.mxu0 }
 0x1d7   :  { %v569_v16 = vadd.f32 %v5726_v59, %v568_v24 }
 0x1d9   :  { %v5847_v21 = vadd.f32 %v5796_v48, %v569_v16 }
 0x1da   :  { %v711_v46 = vpop.f32.mrf.mxu1 }
 0x1db   :  { %v914_v1 = vand.u32 2147483647, %v5847_v21 }
 0x1dd   :  { %v963_v37 = vsub.f32 0.0, %v914_v1 }
 0x1de   :  { %v571_v36 = vpop.f32.mrf.mxu0 }
 0x1df   :  { %v572_v42 = vadd.f32 %v5726_v59, %v571_v36 }
 0x1e1   :  { %v5850_v51 = vadd.f32 %v704_v32, %v572_v42  ;;  %v4736_v42 = vld [vmem:[%s6615_s5 + $0x570] sm:$0xff] }
 0x1e2   :  { %v714_v11 = vpop.f32.mrf.mxu1  ;;  %3372 = vmatpush.bf16.msrb.mxu1 %v4736_v42 }
 0x1e3   :  { %v915_v17 = vand.u32 2147483647, %v5850_v51 }
 0x1e6   :  { %v573_v40 = vpop.f32.mrf.mxu0 }
 0x1e7   :  { %v574_v33 = vadd.f32 %v5726_v59, %v573_v40  ;;  %v911_v40 = vand.u32 2147483647, %v5808_v62 }
 0x1e9   :  { %v5881_v0 = vadd.f32 %v5835_v52, %v574_v33  ;;  %v960_v28 = vsub.f32 0.0, %v911_v40  ;;  %v912_v33 = vand.u32 2147483647, %v5827_v56 }
 0x1ea   :  { %v716_v4 = vpop.f32.mrf.mxu1 }
 0x1eb   :  { %v916_v20 = vand.u32 2147483647, %v5881_v0  ;;  %v1045_v1 = vmul.f32 1.442695, %v960_v28  ;;  %v961_v18 = vsub.f32 0.0, %v912_v33 }
 0x1ee   :  { %v576_v7 = vpop.f32.mrf.mxu0 }
 0x1ef   :  { %v577_v53 = vadd.f32 %v5726_v59, %v576_v7  ;;  %v1365_v7 = vld [vmem:[%s6616_s3] sm:$0xff] }
 0x1f0   :  { %1367 = vst [vmem:[#allocation1] ss:$4 sm:$0xff] %v1365_v7 }
 0x1f1   :  { %v5874_v50 = vadd.f32 %v709_v26, %v577_v53 }
 0x1f2   :  { %v719_v34 = vpop.f32.mrf.mxu1 }
 0x1f3   :  { %v917_v3 = vand.u32 2147483647, %v5874_v50 }
 0x1f6   :  { %v578_v10 = vpop.f32.mrf.mxu0 }
 0x1f7   :  { %v579_v47 = vadd.f32 %v5726_v59, %v578_v10  ;;  %v1368_v55 = vld.sshfl [vmem:[#allocation1] sm:$0xff pattern:$0x73625140] }
 0x1f8   :  { %1394 = vmatmul.f32.vlgmr.msra.gmra.mxu2 %v1368_v55 }
 0x1f9   :  { %v5869_v27 = vadd.f32 %v711_v46, %v579_v47  ;;  %v5900_v47 = vpop.eup %5007 }
 0x1fa   :  { %v721_v8 = vpop.f32.mrf.mxu1  ;;  %v5914_v28 = vadd.f32 1.0, %v5900_v47 }
 0x1fb   :  { %v918_v14 = vand.u32 2147483647, %v5869_v27 }
 0x1fd   :  { %v967_v24 = vsub.f32 0.0, %v918_v14 }
 0x1fe   :  { %v581_v48 = vpop.f32.mrf.mxu0 }
 0x1ff   :  { %v582_v6 = vadd.f32 %v5726_v59, %v581_v48  ;;  %v1051_v48 = vmul.f32 1.442695, %v963_v37 }
 0x201   :  { %v5860_v23 = vadd.f32 %v714_v11, %v582_v6  ;;  %v1041_v11 = vmul.f32 1.442695, %v958_v12  ;;  %v965_v6 = vsub.f32 0.0, %v916_v20 }
 0x202   :  { %v5855_v35 = vpop.f32.mrf.mxu1 }
 0x203   :  { %v919_v58 = vand.u32 2147483647, %v5860_v23 }
 0x205   :  { %v968_v5 = vsub.f32 0.0, %v919_v58  ;;  %v1055_v58 = vmul.f32 1.442695, %v965_v6 }
 0x206   :  { %v583_v45 = vpop.f32.mrf.mxu0 }
 0x207   :  { %v584_v32 = vadd.f32 %v5726_v59, %v583_v45  ;;  %v1061_v52 = vmul.f32 1.442695, %v968_v5  ;;  %v964_v45 = vsub.f32 0.0, %v915_v17 }
 0x209   :  { %v5863_v22 = vadd.f32 %v716_v4, %v584_v32  ;;  %v966_v4 = vsub.f32 0.0, %v917_v3  ;;  %v1059_v32 = vmul.f32 1.442695, %v967_v24 }
 0x20a   :  { %v726_v61 = vpop.f32.mrf.mxu1 }
 0x20b   :  { %v920_v25 = vand.u32 2147483647, %v5863_v22  ;;  %v1057_v53 = vmul.f32 1.442695, %v966_v4 }
 0x20d   :  { %v969_v13 = vsub.f32 0.0, %v920_v25 }
 0x20e   :  { %v586_v44 = vpop.f32.mrf.mxu0 }
 0x20f   :  { %v587_v49 = vadd.f32 %v5726_v59, %v586_v44  ;;  %v1063_v16 = vmul.f32 1.442695, %v969_v13 }
 0x211   :  { %v5878_v9 = vadd.f32 %v719_v34, %v587_v49  ;;  %v913_v34 = vand.u32 2147483647, %v5842_v41  ;;  %v1053_v49 = vmul.f32 1.442695, %v964_v45 }
 0x213   :  { %v921_v29 = vand.u32 2147483647, %v5878_v9  ;;  %v962_v61 = vsub.f32 0.0, %v913_v34 }
 0x215   :  { %v970_v2 = vsub.f32 0.0, %v921_v29  ;;  %v1049_v14 = vmul.f32 1.442695, %v962_v61  ;;  %v1369_v29 = vld.sshfl [vmem:[#allocation1 + $0x8] sm:$0xff pattern:$0x73625140] }
 0x216   :  { %v588_v26 = vpop.f32.mrf.mxu0  ;;  %1414 = vmatmul.f32.vlgmr.msra.gmra.mxu3 %v1369_v29  ;;  %v5919_v61 = vld [vmem:[%s6614_s7 + $0xa0] sm:$0xff]  }
 0x217   :  { %v1065_v46 = vmul.f32 1.442695, %v970_v2  ;;  %v589_v36 = vadd.f32 %v5726_v59, %v588_v26  ;;  %v4841_v47 = vunpack.c.h.bf16 %v5919_v61 }
 0x219   :  { %5011 = vpow2.f32 %v1065_v46  ;;  %v5897_v10 = vadd.f32 %v721_v8, %v589_v36  ;;  %v5902_v8 = vpop.eup %5009 }
 0x21a   :  { %5013 = vpow2.f32 %v1061_v52 }
 0x21b   :  { %5015 = vpow2.f32 %v1063_v16  ;;  %v922_v38 = vand.u32 2147483647, %v5897_v10  ;;  %v1047_v16 = vmul.f32 1.442695, %v961_v18 }
 0x21c   :  { %5017 = vpow2.f32 %v1041_v11 }
 0x21d   :  { %5019 = vpow2.f32 %v1043_v31  ;;  %v971_v15 = vsub.f32 0.0, %v922_v38  ;;  %v4876_v38 = vld [vmem:[%s6614_s7 + $0xb8] sm:$0xff]  }
 0x21e   :  { %5021 = vpow2.f32 %v1051_v48  ;;  %v591_v44 = vpop.f32.mrf.mxu0 }
 0x21f   :  { %v5012_v25 = vpop.eup %5011  ;;  %5023 = vpow2.f32 %v1059_v32  ;;  %v1067_v57 = vmul.f32 1.442695, %v971_v15  ;;  %v592_v63 = vadd.f32 %v5726_v59, %v591_v44 }
 0x220   :  { %v5014_v54 = vpop.eup %5013  ;;  %5025 = vpow2.f32 %v1057_v53  ;;  %v1117_v12 = vadd.f32 1.0, %v5012_v25  ;;  %v4853_v25 = vunpack.c.h.bf16 %v4876_v38 }
 0x221   :  { %v5016_v5 = vpop.eup %5015  ;;  %5027 = vpow2.f32 %v1067_v57  ;;  %v5907_v13 = vadd.f32 %v5855_v35, %v592_v63  ;;  %v1115_v37 = vadd.f32 1.0, %v5014_v54  ;;  %v4852_v63 = vunpack.c.l.bf16 %v4876_v38  ;;  %v4875_v54 = vld [vmem:[%s6614_s7 + $0xb0] sm:$0xff]  }
 0x222   :  { %v5018_v30 = vpop.eup %5017  ;;  %5029 = vpow2.f32 %v1055_v58  ;;  %v1116_v17 = vadd.f32 1.0, %v5016_v5  ;;  %v5926_v58 = vadd.f32 1.0, %v5902_v8  ;;  %v4849_v18 = vunpack.c.h.bf16 %v4875_v54 }
 0x223   :  { %v5020_v3 = vpop.eup %5019  ;;  %5031 = vpow2.f32 %v1053_v49  ;;  %v923_v59 = vand.u32 2147483647, %v5907_v13  ;;  %v5923_v33 = vadd.f32 1.0, %v5018_v30  ;;  %v872_v30 = vmax.f32 %v5878_v9, 0.0 }
 0x224   :  { %v5022_v2 = vpop.eup %5021  ;;  %5033 = vpow2.f32 %v1045_v1  ;;  %v5921_v15 = vadd.f32 1.0, %v5020_v3  ;;  %v5935_v1 = vld [vmem:[%s6614_s7 + $0xa8] sm:$0xff]   ;;  %v1312_v38 = vmul.f32 %v4849_v18, %v5863_v22 }
 0x225   :  { %v5024_v20 = vpop.eup %5023  ;;  %5035 = vpow2.f32 %v1049_v14  ;;  %v972_v52 = vsub.f32 0.0, %v923_v59  ;;  %v1110_v4 = vadd.f32 1.0, %v5022_v2  ;;  %v873_v14 = vmax.f32 %v5897_v10, 0.0 }
 0x226   :  { %v5026_v35 = vpop.eup %5025  ;;  %v593_v26 = vpop.f32.mrf.mxu0  ;;  %5037 = vlog2.f32 %v1117_v12  ;;  %v1114_v11 = vadd.f32 1.0, %v5024_v20  ;;  %v871_v59 = vmax.f32 %v5863_v22, 0.0  ;;  %v1314_v20 = vmul.f32 %v4853_v25, %v5897_v10  ;;  %v1371_v25 = vld.sshfl [vmem:[#allocation1 + $0x18] sm:$0xff pattern:$0x73625140] }
 0x227   :  { %v5028_v24 = vpop.eup %5027  ;;  %v1069_v46 = vmul.f32 1.442695, %v972_v52  ;;  %5039 = vlog2.f32 %v1115_v37  ;;  %v1113_v31 = vadd.f32 1.0, %v5026_v35  ;;  %v776_v26 = vld [vmem:[%s6614_s7 + $0xc0] sm:$0xf]  ;;  %v874_v22 = vmax.f32 %v5907_v13, 0.0 }
 0x228   :  { %v5030_v36 = vpop.eup %5029  ;;  %v1118_v42 = vadd.f32 1.0, %v5028_v24  ;;  %5041 = vlog2.f32 %v1116_v17 }
 0x229   :  { %v5032_v40 = vpop.eup %5031  ;;  %5043 = vpow2.f32 %v1069_v46  ;;  %v1112_v48 = vadd.f32 1.0, %v5030_v36  ;;  %v870_v46 = vmax.f32 %v5860_v23, 0.0  ;;  %v4844_v36 = vunpack.c.l.bf16 %v5935_v1 }
 0x22a   :  { %v5034_v7 = vpop.eup %5033  ;;  %5045 = vlog2.f32 %v1118_v42  ;;  %v1111_v45 = vadd.f32 1.0, %v5032_v40 }
 0x22b   :  { %v5036_v34 = vpop.eup %5035  ;;  %5047 = vpow2.f32 %v1047_v16  ;;  %v1107_v8 = vadd.f32 1.0, %v5034_v7  ;;  %v4848_v16 = vunpack.c.l.bf16 %v4875_v54 }
 0x22c   :  { %v5038_v6 = vpop.eup %5037  ;;  %5049 = vlog2.f32 %v1114_v11  ;;  %v1109_v37 = vadd.f32 1.0, %v5036_v34  ;;  %v4845_v34 = vunpack.c.h.bf16 %v5935_v1 }
 0x22d   :  { %v5040_v32 = vpop.eup %5039  ;;  %5051 = vlog2.f32 %v1110_v4  ;;  %v1213_v49 = vmul.f32 0.6931472, %v5038_v6  ;;  %v1313_v4 = vmul.f32 %v4852_v63, %v5878_v9  ;;  %v825_v6 = vunpack.c.l.bf16 %v776_v26  ;;  %v1462_v9 = vld [vmem:[%s6617_s4] sm:$0xff] }
 0x22e   :  { %v5042_v53 = vpop.eup %5041  ;;  %5053 = vlog2.f32 %v1113_v31  ;;  %v1209_v35 = vmul.f32 0.6931472, %v5040_v32  ;;  %v868_v63 = vmax.f32 %v5874_v50, 0.0 }
 0x22f   :  { %v5044_v44 = vpop.eup %5043  ;;  %5055 = vlog2.f32 %v1112_v48  ;;  %v1211_v12 = vmul.f32 0.6931472, %v5042_v53  ;;  %v1264_v52 = vadd.f32 %v1213_v49, %v872_v30  ;;  %v869_v48 = vmax.f32 %v5869_v27, 0.0 }
 0x230   :  { %v5046_v57 = vpop.eup %5045  ;;  %v1119_v55 = vadd.f32 1.0, %v5044_v44  ;;  %5057 = vlog2.f32 %v1111_v45  ;;  %v5949_v45 = vld.sshfl [vmem:[#allocation1 + $0x10] sm:$0xff pattern:$0x73625140]  ;;  %v1262_v53 = vadd.f32 %v1209_v35, %v870_v46  ;;  %v1309_v35 = vmul.f32 %v4844_v36, %v5874_v50 }
 0x231   :  { %v5048_v5 = vpop.eup %5047  ;;  %v1215_v29 = vmul.f32 0.6931472, %v5046_v57  ;;  %v1263_v7 = vadd.f32 %v1211_v12, %v871_v59  ;;  %v1362_v32 = vsub.f32 %v1313_v4, %v1264_v52  ;;  %v1311_v57 = vmul.f32 %v4848_v16, %v5860_v23  ;;  %1863 = vst [vmem:[#allocation1] ss:$9 sm:$0xff] %v1462_v9 }
 0x232   :  { %v5050_v3 = vpop.eup %5049  ;;  %5059 = vlog2.f32 %v1119_v55  ;;  %v1108_v42 = vadd.f32 1.0, %v5048_v5  ;;  %v865_v46 = vmax.f32 %v5847_v21, 0.0  ;;  %v864_v4 = vmax.f32 %v5842_v41, 0.0 }
 0x233   :  { %v5052_v2 = vpop.eup %5051  ;;  %v1265_v17 = vadd.f32 %v1215_v29, %v873_v14  ;;  %v1207_v31 = vmul.f32 0.6931472, %v5050_v3  ;;  %5061 = vlog2.f32 %v1109_v37  ;;  %v1361_v1 = vsub.f32 %v1312_v38, %v1263_v7  ;;  %v4569_v37 = vld [vmem:[%s6615_s5 + $0x38] sm:$0xff]  ;;  %v4567_v38 = vld [vmem:[%s6615_s5 + $0x28] sm:$0xff] }
 0x234   :  { %v5054_v24 = vpop.eup %5053  ;;  %5063 = vlog2.f32 %v1108_v42  ;;  %v1310_v14 = vmul.f32 %v4845_v34, %v5869_v27  ;;  %v867_v29 = vmax.f32 %v5881_v0, 0.0  ;;  %v1360_v12 = vsub.f32 %v1311_v57, %v1262_v53 }
 0x235   :  { %v5056_v11 = vpop.eup %5055  ;;  %v1363_v40 = vsub.f32 %v1314_v20, %v1265_v17  ;;  %v1205_v44 = vmul.f32 0.6931472, %v5054_v24  ;;  %v1261_v55 = vadd.f32 %v1207_v31, %v869_v48  ;;  %5065 = vlog2.f32 %v1107_v8 }
 0x236   :  { %v5058_v10 = vpop.eup %5057  ;;  %v1203_v54 = vmul.f32 0.6931472, %v5056_v11  ;;  %v1315_v3 = vmul.f32 %v825_v6, %v5907_v13  ;;  %v4840_v17 = vunpack.c.l.bf16 %v5919_v61  ;;  %v866_v20 = vmax.f32 %v5850_v51, 0.0  ;;  %v4872_v13 = vld [vmem:[%s6614_s7 + $0x98] sm:$0xff]   ;;  %v4568_v11 = vld [vmem:[%s6615_s5 + $0x30] sm:$0xff] }
 0x237   :  { %1418 = vmatpush.msrb.mxu2 %v1363_v40  ;;  %v1201_v30 = vmul.f32 0.6931472, %v5058_v10  ;;  %v1260_v18 = vadd.f32 %v1205_v44, %v868_v63  ;;  %v1199_v27 = vmul.f32 0.6931472, %v5052_v2  ;;  %5067 = vlog2.f32 %v5921_v15 }
 0x238   :  { %v5060_v49 = vpop.eup %5059  ;;  %v1359_v8 = vsub.f32 %v1310_v14, %v1261_v55  ;;  %v1259_v26 = vadd.f32 %v1203_v54, %v867_v29  ;;  %v4837_v16 = vunpack.c.h.bf16 %v4872_v13  ;;  %5069 = vlog2.f32 %v5923_v33 }
 0x239   :  { %1419 = vmatpush.msrb.mxu2 %v1362_v32  ;;  %v1217_v5 = vmul.f32 0.6931472, %v5060_v49  ;;  %v5062_v59 = vpop.eup %5061  ;;  %v1358_v15 = vsub.f32 %v1309_v35, %v1260_v18  ;;  %v1308_v2 = vmul.f32 %v4841_v47, %v5881_v0  ;;  %v1258_v50 = vadd.f32 %v1201_v30, %v866_v20  ;;  %v4871_v0 = vld [vmem:[%s6614_s7 + $0x90] sm:$0xff]  }
 0x23a   :  { %v5064_v24 = vpop.eup %5063  ;;  %v1197_v36 = vmul.f32 0.6931472, %v5062_v59  ;;  %v4836_v40 = vunpack.c.l.bf16 %v4872_v13  ;;  %5071 = vlog2.f32 %v5926_v58  ;;  %v1307_v7 = vmul.f32 %v4840_v17, %v5850_v51 }
 0x23b   :  { %1420 = vmatpush.msrb.mxu2 %v1361_v1  ;;  %v1266_v23 = vadd.f32 %v1217_v5, %v874_v22  ;;  %v5066_v42 = vpop.eup %5065  ;;  %v1357_v33 = vsub.f32 %v1308_v2, %v1259_v26  ;;  %v1257_v31 = vadd.f32 %v1199_v27, %v865_v46  ;;  %v1195_v61 = vmul.f32 0.6931472, %v5064_v24  ;;  %v4564_v2 = vld [vmem:[%s6615_s5 + $0x10] sm:$0xff] }
 0x23c   :  { %v4833_v10 = vunpack.c.h.bf16 %v4871_v0  ;;  %v863_v34 = vmax.f32 %v5827_v56, 0.0  ;;  %5073 = vlog2.f32 %v5914_v28  ;;  %v1356_v58 = vsub.f32 %v1307_v7, %v1258_v50  ;;  %v4574_v7 = vld [vmem:[%s6615_s5 + $0x60] sm:$0xff] }
 0x23d   :  { %1421 = vmatpush.msrb.mxu2 %v1360_v12  ;;  %v1364_v52 = vsub.f32 %v1315_v3, %v1266_v23  ;;  %v5068_v47 = vpop.eup %5067  ;;  %v1306_v48 = vmul.f32 %v4837_v16, %v5847_v21  ;;  %v1256_v6 = vadd.f32 %v1197_v36, %v864_v4  ;;  %v1193_v51 = vmul.f32 0.6931472, %v5066_v42  ;;  %v4870_v21 = vld [vmem:[%s6614_s7 + $0x88] sm:$0xff]   ;;  %v4577_v42 = vld [vmem:[%s6615_s5 + $0x78] sm:$0xff] }
 0x23e   :  { %v5070_v32 = vpop.eup %5069  ;;  %v4832_v53 = vunpack.c.l.bf16 %v4871_v0  ;;  %v862_v44 = vmax.f32 %v5808_v62, 0.0  ;;  %v1305_v9 = vmul.f32 %v4836_v40, %v5842_v41  ;;  %v1255_v28 = vadd.f32 %v1195_v61, %v863_v34  ;;  %v4566_v41 = vld [vmem:[%s6615_s5 + $0x20] sm:$0xff]  ;;  %v4585_v40 = vld [vmem:[%s6615_s5 + $0xb8] sm:$0xff]  ;;  %v4575_v4 = vld [vmem:[%s6615_s5 + $0x68] sm:$0xff] }
 0x23f   :  { %1422 = vmatpush.msrb.mxu2 %v1359_v8  ;;  %1453 = vmatpush.msrb.mxu3 %v1364_v52  ;;  %v1191_v49 = vmul.f32 0.6931472, %v5068_v47  ;;  %v4829_v63 = vunpack.c.h.bf16 %v4870_v21  ;;  %v861_v54 = vmax.f32 %v5786_v60, 0.0  ;;  %v1304_v55 = vmul.f32 %v4833_v10, %v5827_v56  ;;  %v4869_v56 = vld [vmem:[%s6614_s7 + $0x80] sm:$0xff]   ;;  %v4735_v52 = vld [vmem:[%s6615_s5 + $0x568] sm:$0xff]  ;;  %v4573_v0 = vld [vmem:[%s6615_s5 + $0x58] sm:$0xff] }
 0x240   :  { %3718 = vmatmul.msk.f32.vlgmr.msrb.gmra.mxu3 %vm1375_vm1, %v1371_v25  ;;  %v1355_v25 = vsub.f32 %v1306_v48, %v1257_v31  ;;  %v5072_v57 = vpop.eup %5071  ;;  %v1354_v1 = vsub.f32 %v1305_v9, %v1256_v6  ;;  %v1254_v22 = vadd.f32 %v1193_v51, %v862_v44  ;;  %v1189_v5 = vmul.f32 0.6931472, %v5070_v32  ;;  %3373 = vmatpush.bf16.msrb.mxu1 %v4735_v52  ;;  %v4583_v31 = vld [vmem:[%s6615_s5 + $0xa8] sm:$0xff]  ;;  %v4582_v61 = vld [vmem:[%s6615_s5 + $0xa0] sm:$0xff]  ;;  %v4572_v47 = vld [vmem:[%s6615_s5 + $0x50] sm:$0xff] }
 0x241   :  { %3098 = vmatpush.bf16.msra.mxu3 %v4569_v37  ;;  %1423 = vmatpush.msrb.mxu2 %v1358_v15  ;;  %v4828_v29 = vunpack.c.l.bf16 %v4870_v21  ;;  %v860_v30 = vmax.f32 %v5763_v19, 0.0  ;;  %v1353_v12 = vsub.f32 %v1304_v55, %v1255_v28  ;;  %v1303_v23 = vmul.f32 %v4832_v53, %v5808_v62  ;;  %v4565_v62 = vld [vmem:[%s6615_s5 + $0x18] sm:$0xff]  ;;  %v4571_v34 = vld [vmem:[%s6615_s5 + $0x48] sm:$0xff]  ;;  %v4570_v48 = vld [vmem:[%s6615_s5 + $0x40] sm:$0xff] }
 0x242   :  { %v5074_v14 = vpop.eup %5073  ;;  %v1253_v3 = vadd.f32 %v1191_v49, %v861_v54  ;;  %v1187_v18 = vmul.f32 0.6931472, %v5072_v57  ;;  %v4825_v59 = vunpack.c.h.bf16 %v4869_v56  ;;  %v859_v37 = vmax.f32 %v5753_v39, 0.0  ;;  %v4581_v10 = vld [vmem:[%s6615_s5 + $0x98] sm:$0xff]  ;;  %v4579_v51 = vld [vmem:[%s6615_s5 + $0x88] sm:$0xff]  ;;  %v4578_v53 = vld [vmem:[%s6615_s5 + $0x80] sm:$0xff] }
 0x243   :  { %1424 = vmatpush.msrb.mxu2 %v1357_v33  ;;  %v1352_v17 = vsub.f32 %v1303_v23, %v1254_v22  ;;  %v1302_v20 = vmul.f32 %v4829_v63, %v5786_v60  ;;  %v1252_v27 = vadd.f32 %v1189_v5, %v860_v30  ;;  %v1185_v8 = vmul.f32 0.6931472, %v5074_v14  ;;  %v4584_v33 = vld [vmem:[%s6615_s5 + $0xb0] sm:$0xff]  ;;  %v4593_v6 = vld [vmem:[%s6615_s5 + $0xf8] sm:$0xff]  ;;  %v4590_v21 = vld [vmem:[%s6615_s5 + $0xe0] sm:$0xff] }
 0x244   :  { %v4824_v35 = vunpack.c.l.bf16 %v4869_v56  ;;  %v1301_v13 = vmul.f32 %v4828_v29, %v5763_v19  ;;  %v1251_v24 = vadd.f32 %v1187_v18, %v859_v37  ;;  %v858_v16 = vmax.f32 %v5745_v43, 0.0  ;;  %v1865_v32 = vld [vmem:[#allocation1 + $0x9] sm:$0xff]  ;;  %v4601_v44 = vld [vmem:[%s6615_s5 + $0x138] sm:$0xff]  ;;  %v4734_v49 = vld [vmem:[%s6615_s5 + $0x560] sm:$0xff] }
 0x245   :  { %3099 = vmatpush.bf16.msra.mxu3 %v4568_v11  ;;  %1425 = vmatpush.msrb.mxu2 %v1356_v58  ;;  %v1351_v26 = vsub.f32 %v1302_v20, %v1253_v3  ;;  %v1300_v46 = vmul.f32 %v4825_v59, %v5753_v39  ;;  %v4563_v39 = vld [vmem:[%s6615_s5 + $0x8] sm:$0xff]  ;;  %v4576_v11 = vld [vmem:[%s6615_s5 + $0x70] sm:$0xff]  ;;  %v4589_v63 = vld [vmem:[%s6615_s5 + $0xd8] sm:$0xff] }
 0x246   :  { %v1350_v60 = vsub.f32 %v1301_v13, %v1252_v27  ;;  %v1250_v15 = vadd.f32 %v1185_v8, %v858_v16  ;;  %v1299_v36 = vmul.f32 %v4824_v35, %v5745_v43  ;;  %v4562_v43 = vld [vmem:[%s6615_s5] sm:$0xff]  ;;  %v4580_v58 = vld [vmem:[%s6615_s5 + $0x90] sm:$0xff]  ;;  %v4599_v57 = vld [vmem:[%s6615_s5 + $0x128] sm:$0xff]  ;;  %3374 = vmatpush.bf16.msrb.mxu1 %v4734_v49 }
 0x247   :  { %1426 = vmatpush.msrb.mxu2 %v1355_v25  ;;  %v1349_v50 = vsub.f32 %v1300_v46, %v1251_v24  ;;  %v4591_v25 = vld [vmem:[%s6615_s5 + $0xe8] sm:$0xff]  ;;  %v1866_v9 = vld [vmem:[#allocation1 + $0x12] sm:$0xff]  ;;  %v4598_v54 = vld [vmem:[%s6615_s5 + $0x120] sm:$0xff] }
 0x248   :  { %v1348_v19 = vsub.f32 %v1299_v36, %v1250_v15  ;;  %v4600_v28 = vld [vmem:[%s6615_s5 + $0x130] sm:$0xff]  ;;  %v4597_v55 = vld [vmem:[%s6615_s5 + $0x118] sm:$0xff]  ;;  %v4587_v22 = vld [vmem:[%s6615_s5 + $0xc8] sm:$0xff] }
 0x249   :  { %3100 = vmatpush.bf16.msra.mxu3 %v4567_v38  ;;  %1427 = vmatpush.msrb.mxu2 %v1354_v1  ;;  %v4592_v38 = vld [vmem:[%s6615_s5 + $0xf0] sm:$0xff]  ;;  %v4586_v14 = vld [vmem:[%s6615_s5 + $0xc0] sm:$0xff]  ;;  %v4595_v29 = vld [vmem:[%s6615_s5 + $0x108] sm:$0xff] }
 0x24a   :  { %v4588_v1 = vld [vmem:[%s6615_s5 + $0xd0] sm:$0xff]  ;;  %v1867_v30 = vld [vmem:[#allocation1 + $0x1b] sm:$0xff]  ;;  %v4607_v56 = vld [vmem:[%s6615_s5 + $0x168] sm:$0xff] }
 0x24b   :  { %1428 = vmatpush.msrb.mxu2 %v1353_v12  ;;  %v4596_v5 = vld [vmem:[%s6615_s5 + $0x110] sm:$0xff]  ;;  %v4594_v23 = vld [vmem:[%s6615_s5 + $0x100] sm:$0xff]  ;;  %v4617_v3 = vld [vmem:[%s6615_s5 + $0x1b8] sm:$0xff] }
 0x24c   :  { %v4608_v12 = vld [vmem:[%s6615_s5 + $0x170] sm:$0xff]  ;;  %v1868_v18 = vld [vmem:[#allocation1 + $0x24] sm:$0xff]  ;;  %v4605_v20 = vld [vmem:[%s6615_s5 + $0x158] sm:$0xff] }
 0x24d   :  { %3101 = vmatpush.bf16.msra.mxu3 %v4566_v41  ;;  %1429 = vmatpush.msrb.mxu2 %v1352_v17  ;;  %v4609_v41 = vld [vmem:[%s6615_s5 + $0x178] sm:$0xff]  ;;  %v4616_v59 = vld [vmem:[%s6615_s5 + $0x1b0] sm:$0xff]  ;;  %v4606_v37 = vld [vmem:[%s6615_s5 + $0x160] sm:$0xff] }
 0x24e   :  { %v4615_v17 = vld [vmem:[%s6615_s5 + $0x1a8] sm:$0xff]  ;;  %v4614_v27 = vld [vmem:[%s6615_s5 + $0x1a0] sm:$0xff]  ;;  %v4604_v8 = vld [vmem:[%s6615_s5 + $0x150] sm:$0xff] }
 0x24f   :  { %1430 = vmatpush.msrb.mxu2 %v1351_v26  ;;  %v4613_v52 = vld [vmem:[%s6615_s5 + $0x198] sm:$0xff]  ;;  %v4612_v35 = vld [vmem:[%s6615_s5 + $0x190] sm:$0xff]  ;;  %v1463_v26 = vld [vmem:[%s6617_s4 + $0x8] sm:$0xff] }
 0x250   :  { %v4602_v13 = vld [vmem:[%s6615_s5 + $0x140] sm:$0xff]  ;;  %v4625_v24 = vld [vmem:[%s6615_s5 + $0x1f8] sm:$0xff]  ;;  %v1869_v16 = vld [vmem:[#allocation1 + $0x2d] sm:$0xff] }
 0x251   :  { %3102 = vmatpush.bf16.msra.mxu3 %v4565_v62  ;;  %1431 = vmatpush.msrb.mxu2 %v1350_v60  ;;  %v4603_v62 = vld [vmem:[%s6615_s5 + $0x148] sm:$0xff]  ;;  %v1870_v46 = vld [vmem:[#allocation1 + $0x36] sm:$0xff]  ;;  %v1871_v15 = vld [vmem:[#allocation1 + $0x3f] sm:$0xff] }
 0x252   :  { %v4611_v60 = vld [vmem:[%s6615_s5 + $0x188] sm:$0xff]  ;;  %v4733_v36 = vld [vmem:[%s6615_s5 + $0x558] sm:$0xff]  ;;  %v4646_v49 = vld [vmem:[%s6615_s5 + $0x2a0] sm:$0xff] }
 0x253   :  { %1432 = vmatpush.msrb.mxu2 %v1349_v50  ;;  %v4610_v50 = vld [vmem:[%s6615_s5 + $0x180] sm:$0xff]  ;;  %3375 = vmatpush.bf16.msrb.mxu1 %v4733_v36 }
 0x254   :  { %v4650_v36 = vld [vmem:[%s6615_s5 + $0x2c0] sm:$0xff] }
 0x255   :  { %3103 = vmatpush.bf16.msra.mxu3 %v4564_v2  ;;  %1433 = vmatpush.msrb.mxu2 %v1348_v19  ;;  %v4624_v2 = vld [vmem:[%s6615_s5 + $0x1f0] sm:$0xff]  ;;  %v4633_v19 = vld [vmem:[%s6615_s5 + $0x238] sm:$0xff] }
 0x256   :  { %1434 = vmatmul.f32.vlgmr.msrb.gmra.mxu2 %v5949_v45  ;;  %v1864_v45 = vld [vmem:[#allocation1] sm:$0xff] }
 0x257   :  { %3111 = vmatpush.bf16.msra.mxu2 %v4577_v42  ;;  %1873 = vst [vmem:[#allocation1] ss:$9 sm:$0xff] %v1463_v26  ;;  %v4623_v42 = vld [vmem:[%s6615_s5 + $0x1e8] sm:$0xff]  ;;  %v4662_v26 = vld [vmem:[%s6615_s5 + $0x320] sm:$0xff] }
 0x259   :  { %3104 = vmatpush.bf16.msra.mxu3 %v4563_v39  ;;  %v4632_v39 = vld [vmem:[%s6615_s5 + $0x230] sm:$0xff] }
 0x25b   :  { %3112 = vmatpush.bf16.msra.mxu2 %v4576_v11  ;;  %v4622_v11 = vld [vmem:[%s6615_s5 + $0x1e0] sm:$0xff] }
 0x25d   :  { %3105 = vmatpush.bf16.msra.mxu3 %v4562_v43  ;;  %v4631_v43 = vld [vmem:[%s6615_s5 + $0x228] sm:$0xff] }
 0x25f   :  { %3113 = vmatpush.bf16.msra.mxu2 %v4575_v4  ;;  %v4630_v4 = vld [vmem:[%s6615_s5 + $0x220] sm:$0xff] }
 0x260   :  { %3106 = vmatmul.bf16.vlgmr.msra.gmra.mxu3 %v1864_v45  ;;  %v4620_v45 = vld [vmem:[%s6615_s5 + $0x1d0] sm:$0xff] }
 0x261   :  { %3124 = vmatpush.bf16.msrb.mxu3 %v4585_v40  ;;  %v4621_v40 = vld [vmem:[%s6615_s5 + $0x1d8] sm:$0xff] }
 0x263   :  { %3114 = vmatpush.bf16.msra.mxu2 %v4574_v7  ;;  %v4619_v7 = vld [vmem:[%s6615_s5 + $0x1c8] sm:$0xff] }
 0x265   :  { %3125 = vmatpush.bf16.msrb.mxu3 %v4584_v33  ;;  %v4629_v33 = vld [vmem:[%s6615_s5 + $0x218] sm:$0xff] }
 0x267   :  { %3115 = vmatpush.bf16.msra.mxu2 %v4573_v0  ;;  %v4618_v0 = vld [vmem:[%s6615_s5 + $0x1c0] sm:$0xff] }
 0x269   :  { %3126 = vmatpush.bf16.msrb.mxu3 %v4583_v31  ;;  %v4628_v31 = vld [vmem:[%s6615_s5 + $0x210] sm:$0xff] }
 0x26b   :  { %3116 = vmatpush.bf16.msra.mxu2 %v4572_v47  ;;  %v4627_v47 = vld [vmem:[%s6615_s5 + $0x208] sm:$0xff] }
 0x26d   :  { %3127 = vmatpush.bf16.msrb.mxu3 %v4582_v61  ;;  %v4641_v61 = vld [vmem:[%s6615_s5 + $0x278] sm:$0xff] }
 0x26f   :  { %3117 = vmatpush.bf16.msra.mxu2 %v4571_v34  ;;  %v4626_v34 = vld [vmem:[%s6615_s5 + $0x200] sm:$0xff] }
 0x271   :  { %3128 = vmatpush.bf16.msrb.mxu3 %v4581_v10  ;;  %v4640_v10 = vld [vmem:[%s6615_s5 + $0x270] sm:$0xff] }
 0x273   :  { %3118 = vmatpush.bf16.msra.mxu2 %v4570_v48  ;;  %v4639_v48 = vld [vmem:[%s6615_s5 + $0x268] sm:$0xff] }
 0x275   :  { %3129 = vmatpush.bf16.msrb.mxu3 %v4580_v58  ;;  %v4649_v58 = vld [vmem:[%s6615_s5 + $0x2b8] sm:$0xff] }
 0x276   :  { %3119 = vmatmul.bf16.vlgmr.msra.gmra.mxu2 %v1865_v32 }
 0x277   :  { %3137 = vmatpush.bf16.msrb.mxu2 %v4593_v6  ;;  %v1874_v6 = vld [vmem:[#allocation1] sm:$0xff] }
 0x279   :  { %3130 = vmatpush.bf16.msrb.mxu3 %v4579_v51 }
 0x27b   :  { %3138 = vmatpush.bf16.msrb.mxu2 %v4592_v38  ;;  %v1395_v51 = vpop.f32.mrf.mxu2  ;;  %v4648_v38 = vld [vmem:[%s6615_s5 + $0x2b0] sm:$0xff] }
 0x27d   :  { %3131 = vmatpush.bf16.msrb.mxu3 %v4578_v53  ;;  %v4638_v53 = vld [vmem:[%s6615_s5 + $0x260] sm:$0xff] }
 0x27f   :  { %3139 = vmatpush.bf16.msrb.mxu2 %v4591_v25  ;;  %v4637_v25 = vld [vmem:[%s6615_s5 + $0x258] sm:$0xff] }
 0x280   :  { %3132 = vmatmul.bf16.vlgmr.msrb.gmra.mxu3 %v1866_v9 }
 0x281   :  { %3150 = vmatpush.bf16.msra.mxu3 %v4601_v44  ;;  %v4647_v44 = vld [vmem:[%s6615_s5 + $0x2a8] sm:$0xff] }
 0x283   :  { %3140 = vmatpush.bf16.msrb.mxu2 %v4590_v21 }
 0x285   :  { %3151 = vmatpush.bf16.msra.mxu3 %v4600_v28 }
 0x287   :  { %3141 = vmatpush.bf16.msrb.mxu2 %v4589_v63  ;;  %v4636_v63 = vld [vmem:[%s6615_s5 + $0x250] sm:$0xff] }
 0x289   :  { %3152 = vmatpush.bf16.msra.mxu3 %v4599_v57 }
 0x28b   :  { %3142 = vmatpush.bf16.msrb.mxu2 %v4588_v1  ;;  %v4645_v1 = vld [vmem:[%s6615_s5 + $0x298] sm:$0xff] }
 0x28d   :  { %3153 = vmatpush.bf16.msra.mxu3 %v4598_v54 }
 0x28f   :  { %3143 = vmatpush.bf16.msrb.mxu2 %v4587_v22  ;;  %v4635_v22 = vld [vmem:[%s6615_s5 + $0x248] sm:$0xff] }
 0x291   :  { %3154 = vmatpush.bf16.msra.mxu3 %v4597_v55 }
 0x293   :  { %3144 = vmatpush.bf16.msrb.mxu2 %v4586_v14  ;;  %v4644_v14 = vld [vmem:[%s6615_s5 + $0x290] sm:$0xff] }
 0x295   :  { %3155 = vmatpush.bf16.msra.mxu3 %v4596_v5  ;;  %v4732_v5 = vld [vmem:[%s6615_s5 + $0x550] sm:$0xff] }
 0x296   :  { %3145 = vmatmul.bf16.vlgmr.msrb.gmra.mxu2 %v1867_v30  ;;  %3376 = vmatpush.bf16.msrb.mxu1 %v4732_v5  ;;  %v4657_v30 = vld [vmem:[%s6615_s5 + $0x2f8] sm:$0xff] }
 0x297   :  { %3163 = vmatpush.bf16.msra.mxu2 %v4609_v41 }
 0x299   :  { %3156 = vmatpush.bf16.msra.mxu3 %v4595_v29  ;;  %v1415_v32 = vpop.f32.mrf.mxu3  ;;  %v4634_v29 = vld [vmem:[%s6615_s5 + $0x240] sm:$0xff] }
 0x29a   :  { %v1416_v9 = vadd.f32 %v1415_v32, %v1395_v51  ;;  %v4677_v51 = vld [vmem:[%s6615_s5 + $0x398] sm:$0xff]  ;;  %v4667_v32 = vld [vmem:[%s6615_s5 + $0x348] sm:$0xff] }
 0x29b   :  { %3164 = vmatpush.bf16.msra.mxu2 %v4608_v12  ;;  %v4643_v12 = vld [vmem:[%s6615_s5 + $0x288] sm:$0xff] }
 0x29d   :  { %3157 = vmatpush.bf16.msra.mxu3 %v4594_v23  ;;  %v1875_v23 = vld [vmem:[#allocation1 + $0x9] sm:$0xff] }
 0x29f   :  { %3165 = vmatpush.bf16.msra.mxu2 %v4607_v56  ;;  %v4642_v56 = vld [vmem:[%s6615_s5 + $0x280] sm:$0xff] }
 0x2a0   :  { %3158 = vmatmul.bf16.vlgmr.msra.gmra.mxu3 %v1868_v18  ;;  %v4665_v18 = vld [vmem:[%s6615_s5 + $0x338] sm:$0xff] }
 0x2a1   :  { %3176 = vmatpush.bf16.msrb.mxu3 %v4617_v3  ;;  %v4656_v3 = vld [vmem:[%s6615_s5 + $0x2f0] sm:$0xff] }
 0x2a3   :  { %3166 = vmatpush.bf16.msra.mxu2 %v4606_v37  ;;  %v4655_v37 = vld [vmem:[%s6615_s5 + $0x2e8] sm:$0xff] }
 0x2a5   :  { %3177 = vmatpush.bf16.msrb.mxu3 %v4616_v59 }
 0x2a7   :  { %3167 = vmatpush.bf16.msra.mxu2 %v4605_v20  ;;  %v4664_v20 = vld [vmem:[%s6615_s5 + $0x330] sm:$0xff] }
 0x2a9   :  { %3178 = vmatpush.bf16.msrb.mxu3 %v4615_v17  ;;  %v1876_v17 = vld [vmem:[#allocation1 + $0x12] sm:$0xff] }
 0x2ab   :  { %3168 = vmatpush.bf16.msra.mxu2 %v4604_v8  ;;  %v4878_v8 = vld [vmem:[%s6618_s6] ss:$0 sm:$0xff] }
 0x2ad   :  { %3179 = vmatpush.bf16.msrb.mxu3 %v4614_v27  ;;  %v4654_v27 = vld [vmem:[%s6615_s5 + $0x2e0] sm:$0xff] }
 0x2af   :  { %3169 = vmatpush.bf16.msra.mxu2 %v4603_v62  ;;  %v4653_v62 = vld [vmem:[%s6615_s5 + $0x2d8] sm:$0xff] }
 0x2b1   :  { %3180 = vmatpush.bf16.msrb.mxu3 %v4613_v52  ;;  %v4663_v52 = vld [vmem:[%s6615_s5 + $0x328] sm:$0xff] }
 0x2b3   :  { %3170 = vmatpush.bf16.msra.mxu2 %v4602_v13  ;;  %v4652_v13 = vld [vmem:[%s6615_s5 + $0x2d0] sm:$0xff] }
 0x2b5   :  { %3181 = vmatpush.bf16.msrb.mxu3 %v4612_v35 }
 0x2b6   :  { %3171 = vmatmul.bf16.vlgmr.msra.gmra.mxu2 %v1869_v16  ;;  %v4661_v16 = vld [vmem:[%s6615_s5 + $0x318] sm:$0xff] }
 0x2b7   :  { %3189 = vmatpush.bf16.msrb.mxu2 %v4625_v24 }
 0x2b9   :  { %3182 = vmatpush.bf16.msrb.mxu3 %v4611_v60 }
 0x2bb   :  { %3190 = vmatpush.bf16.msrb.mxu2 %v4624_v2 }
 0x2bd   :  { %3183 = vmatpush.bf16.msrb.mxu3 %v4610_v50 }
 0x2bf   :  { %3191 = vmatpush.bf16.msrb.mxu2 %v4623_v42 }
 0x2c0   :  { %3184 = vmatmul.bf16.vlgmr.msrb.gmra.mxu3 %v1870_v46  ;;  %v4651_v46 = vld [vmem:[%s6615_s5 + $0x2c8] sm:$0xff] }
 0x2c1   :  { %3202 = vmatpush.bf16.msra.mxu3 %v4633_v19  ;;  %v4673_v19 = vld [vmem:[%s6615_s5 + $0x378] sm:$0xff] }
 0x2c3   :  { %3192 = vmatpush.bf16.msrb.mxu2 %v4622_v11  ;;  %v1455_v21 = vpop.f32.mrf.mxu3  ;;  %v1877_v11 = vld [vmem:[#allocation1 + $0x1b] sm:$0xff] }
 0x2c5   :  { %3203 = vmatpush.bf16.msra.mxu3 %v4632_v39  ;;  %v4659_v39 = vld [vmem:[%s6615_s5 + $0x308] sm:$0xff] }
 0x2c7   :  { %3193 = vmatpush.bf16.msrb.mxu2 %v4621_v40  ;;  %v4658_v40 = vld [vmem:[%s6615_s5 + $0x300] sm:$0xff] }
 0x2c9   :  { %3204 = vmatpush.bf16.msra.mxu3 %v4631_v43  ;;  %v4672_v43 = vld [vmem:[%s6615_s5 + $0x370] sm:$0xff] }
 0x2cb   :  { %3194 = vmatpush.bf16.msrb.mxu2 %v4620_v45 }
 0x2cd   :  { %3205 = vmatpush.bf16.msra.mxu3 %v4630_v4  ;;  %v4681_v4 = vld [vmem:[%s6615_s5 + $0x3b8] sm:$0xff] }
 0x2cf   :  { %3195 = vmatpush.bf16.msrb.mxu2 %v4619_v7  ;;  %v1878_v7 = vld [vmem:[#allocation1 + $0x24] sm:$0xff] }
 0x2d1   :  { %3206 = vmatpush.bf16.msra.mxu3 %v4629_v33  ;;  %v4671_v33 = vld [vmem:[%s6615_s5 + $0x368] sm:$0xff] }
 0x2d3   :  { %3196 = vmatpush.bf16.msrb.mxu2 %v4618_v0  ;;  %v4670_v0 = vld [vmem:[%s6615_s5 + $0x360] sm:$0xff] }
 0x2d5   :  { %3207 = vmatpush.bf16.msra.mxu3 %v4628_v31  ;;  %v4680_v31 = vld [vmem:[%s6615_s5 + $0x3b0] sm:$0xff] }
 0x2d6   :  { %3197 = vmatmul.bf16.vlgmr.msrb.gmra.mxu2 %v1871_v15  ;;  %v4660_v15 = vld [vmem:[%s6615_s5 + $0x310] sm:$0xff] }
 0x2d7   :  { %3215 = vmatpush.bf16.msra.mxu2 %v4641_v61  ;;  %v4679_v61 = vld [vmem:[%s6615_s5 + $0x3a8] sm:$0xff] }
 0x2d9   :  { %3208 = vmatpush.bf16.msra.mxu3 %v4627_v47  ;;  %v1435_v28 = vpop.f32.mrf.mxu2  ;;  %v4669_v47 = vld [vmem:[%s6615_s5 + $0x358] sm:$0xff] }
 0x2da   :  { %v1436_v57 = vadd.f32 %v1435_v28, %v1416_v9  ;;  %v4666_v9 = vld [vmem:[%s6615_s5 + $0x340] sm:$0xff]  ;;  %v4689_v28 = vld [vmem:[%s6615_s5 + $0x3f8] sm:$0xff] }
 0x2db   :  { %3216 = vmatpush.bf16.msra.mxu2 %v4640_v10  ;;  %v4678_v10 = vld [vmem:[%s6615_s5 + $0x3a0] sm:$0xff] }
 0x2dc   :  { %v1456_v54 = vadd.f32 %v1455_v21, %v1436_v57  ;;  %v1879_v21 = vld [vmem:[#allocation1 + $0x2d] sm:$0xff] }
 0x2dd   :  { %3209 = vmatpush.bf16.msra.mxu3 %v4626_v34  ;;  %v4731_v34 = vld [vmem:[%s6615_s5 + $0x548] sm:$0xff] }
 0x2de   :  { %v1459_v55 = vsel %vm1458_vm2, %v1456_v54, 0.0  ;;  %3377 = vmatpush.bf16.msrb.mxu1 %v4731_v34  ;;  %v4675_v57 = vld [vmem:[%s6615_s5 + $0x388] sm:$0xff]  ;;  %v1881_v54 = vld [vmem:[#allocation1 + $0x3f] sm:$0xff]  ;;  %v4720_v34 = vld [vmem:[%s6615_s5 + $0x4f0] sm:$0xff] }
 0x2df   :  { %3217 = vmatpush.bf16.msra.mxu2 %v4639_v48  ;;  %1460 = vadd.xlane.f32.xlu1 %v1459_v55  ;;  %v4674_v55 = vld [vmem:[%s6615_s5 + $0x380] sm:$0xff] }
 0x2e0   :  { %3210 = vmatmul.bf16.vlgmr.msra.gmra.mxu3 %v1874_v6 }
 0x2e1   :  { %3228 = vmatpush.bf16.msrb.mxu3 %v4649_v58  ;;  %v4668_v58 = vld [vmem:[%s6615_s5 + $0x350] sm:$0xff] }
 0x2e3   :  { %3218 = vmatpush.bf16.msra.mxu2 %v4638_v53  ;;  %v3107_v41 = vpop.f32.mrf.mxu3 }
 0x2e4   :  { %v3108_v35 = vadd.f32 %v4878_v8, %v3107_v41  ;;  %v4696_v41 = vld [vmem:[%s6615_s5 + $0x430] sm:$0xff]  ;;  %v4682_v8 = vld [vmem:[%s6615_s5 + $0x3c0] sm:$0xff] }
 0x2e5   :  { %3229 = vmatpush.bf16.msrb.mxu3 %v4648_v38  ;;  %v4676_v38 = vld [vmem:[%s6615_s5 + $0x390] sm:$0xff] }
 0x2e7   :  { %3219 = vmatpush.bf16.msra.mxu2 %v4637_v25 }
 0x2e9   :  { %3230 = vmatpush.bf16.msrb.mxu3 %v4647_v44  ;;  %v1464_v44 = vld [vmem:[%s6617_s4 + $0x10] sm:$0xff] }
 0x2eb   :  { %3220 = vmatpush.bf16.msra.mxu2 %v4636_v63  ;;  %v3109_v59 = vpop.f32.mrf.mxu3  ;;  %v1880_v63 = vld [vmem:[#allocation1 + $0x36] sm:$0xff] }
 0x2ec   :  { %1883 = vst [vmem:[#allocation1] ss:$9 sm:$0xff] %v1464_v44  ;;  %v4693_v59 = vld [vmem:[%s6615_s5 + $0x418] sm:$0xff]  ;;  %v4727_v44 = vld [vmem:[%s6615_s5 + $0x528] sm:$0xff] }
 0x2ed   :  { %3231 = vmatpush.bf16.msrb.mxu3 %v4646_v49 }
 0x2ef   :  { %3221 = vmatpush.bf16.msra.mxu2 %v4635_v22  ;;  %v4697_v22 = vld [vmem:[%s6615_s5 + $0x438] sm:$0xff] }
 0x2f1   :  { %3232 = vmatpush.bf16.msrb.mxu3 %v4645_v1  ;;  %v4688_v1 = vld [vmem:[%s6615_s5 + $0x3f0] sm:$0xff] }
 0x2f3   :  { %3222 = vmatpush.bf16.msra.mxu2 %v4634_v29  ;;  %v4686_v29 = vld [vmem:[%s6615_s5 + $0x3e0] sm:$0xff] }
 0x2f5   :  { %3233 = vmatpush.bf16.msrb.mxu3 %v4644_v14  ;;  %v4687_v14 = vld [vmem:[%s6615_s5 + $0x3e8] sm:$0xff] }
 0x2f6   :  { %3223 = vmatmul.bf16.vlgmr.msra.gmra.mxu2 %v1875_v23  ;;  %v4694_v23 = vld [vmem:[%s6615_s5 + $0x420] sm:$0xff] }
 0x2f7   :  { %3241 = vmatpush.bf16.msrb.mxu2 %v4657_v30  ;;  %v4695_v30 = vld [vmem:[%s6615_s5 + $0x428] sm:$0xff] }
 0x2f9   :  { %3234 = vmatpush.bf16.msrb.mxu3 %v4643_v12  ;;  %v3120_v24 = vpop.f32.mrf.mxu2  ;;  %v4685_v12 = vld [vmem:[%s6615_s5 + $0x3d8] sm:$0xff] }
 0x2fa   :  { %v3121_v60 = vadd.f32 %v3120_v24, %v3108_v35  ;;  %v4691_v35 = vld [vmem:[%s6615_s5 + $0x408] sm:$0xff]  ;;  %v4713_v24 = vld [vmem:[%s6615_s5 + $0x4b8] sm:$0xff] }
 0x2fb   :  { %3242 = vmatpush.bf16.msrb.mxu2 %v4656_v3  ;;  %v4684_v3 = vld [vmem:[%s6615_s5 + $0x3d0] sm:$0xff] }
 0x2fd   :  { %3235 = vmatpush.bf16.msrb.mxu3 %v4642_v56 }
 0x2ff   :  { %3243 = vmatpush.bf16.msrb.mxu2 %v4655_v37  ;;  %v4683_v37 = vld [vmem:[%s6615_s5 + $0x3c8] sm:$0xff] }
 0x300   :  { %3236 = vmatmul.bf16.vlgmr.msrb.gmra.mxu3 %v1876_v17  ;;  %v4692_v17 = vld [vmem:[%s6615_s5 + $0x410] sm:$0xff] }
 0x301   :  { %3254 = vmatpush.bf16.msra.mxu3 %v4665_v18  ;;  %v3122_v42 = vpop.f32.mrf.mxu2 }
 0x302   :  { %v4710_v42 = vld [vmem:[%s6615_s5 + $0x4a0] sm:$0xff] }
 0x303   :  { %3244 = vmatpush.bf16.msrb.mxu2 %v4654_v27  ;;  %v3133_v2 = vpop.f32.mrf.mxu3 }
 0x304   :  { %v3134_v50 = vadd.f32 %v3133_v2, %v3121_v60  ;;  %v4703_v60 = vld [vmem:[%s6615_s5 + $0x468] sm:$0xff]  ;;  %v4712_v2 = vld [vmem:[%s6615_s5 + $0x4b0] sm:$0xff] }
 0x305   :  { %3255 = vmatpush.bf16.msra.mxu3 %v4664_v20 }
 0x307   :  { %3245 = vmatpush.bf16.msrb.mxu2 %v4653_v62 }
 0x309   :  { %3256 = vmatpush.bf16.msra.mxu3 %v4663_v52  ;;  %v4705_v52 = vld [vmem:[%s6615_s5 + $0x478] sm:$0xff] }
 0x30b   :  { %3246 = vmatpush.bf16.msrb.mxu2 %v4652_v13  ;;  %v3135_v45 = vpop.f32.mrf.mxu3  ;;  %v4690_v13 = vld [vmem:[%s6615_s5 + $0x400] sm:$0xff] }
 0x30c   :  { %v4708_v45 = vld [vmem:[%s6615_s5 + $0x490] sm:$0xff] }
 0x30d   :  { %3257 = vmatpush.bf16.msra.mxu3 %v4662_v26  ;;  %v4704_v26 = vld [vmem:[%s6615_s5 + $0x470] sm:$0xff] }
 0x30f   :  { %3247 = vmatpush.bf16.msrb.mxu2 %v4651_v46  ;;  %v1884_v46 = vld [vmem:[#allocation1] sm:$0xff] }
 0x311   :  { %3258 = vmatpush.bf16.msra.mxu3 %v4661_v16 }
 0x313   :  { %3248 = vmatpush.bf16.msrb.mxu2 %v4650_v36  ;;  %v4711_v36 = vld [vmem:[%s6615_s5 + $0x4a8] sm:$0xff] }
 0x315   :  { %3259 = vmatpush.bf16.msra.mxu3 %v4660_v15  ;;  %v4730_v15 = vld [vmem:[%s6615_s5 + $0x540] sm:$0xff] }
 0x316   :  { %3249 = vmatmul.bf16.vlgmr.msrb.gmra.mxu2 %v1877_v11  ;;  %3378 = vmatpush.bf16.msrb.mxu1 %v4730_v15 }
 0x317   :  { %3267 = vmatpush.bf16.msra.mxu2 %v4673_v19  ;;  %v4701_v19 = vld [vmem:[%s6615_s5 + $0x458] sm:$0xff] }
 0x319   :  { %3260 = vmatpush.bf16.msra.mxu3 %v4659_v39  ;;  %v3146_v48 = vpop.f32.mrf.mxu2  ;;  %v4700_v39 = vld [vmem:[%s6615_s5 + $0x450] sm:$0xff] }
 0x31a   :  { %v3147_v6 = vadd.f32 %v3146_v48, %v3134_v50  ;;  %v4702_v50 = vld [vmem:[%s6615_s5 + $0x460] sm:$0xff]  ;;  %v4729_v48 = vld [vmem:[%s6615_s5 + $0x538] sm:$0xff] }
 0x31b   :  { %3268 = vmatpush.bf16.msra.mxu2 %v4672_v43 }
 0x31d   :  { %3261 = vmatpush.bf16.msra.mxu3 %v4658_v40  ;;  %v4709_v40 = vld [vmem:[%s6615_s5 + $0x498] sm:$0xff] }
 0x31f   :  { %3269 = vmatpush.bf16.msra.mxu2 %v4671_v33 }
 0x320   :  { %3262 = vmatmul.bf16.vlgmr.msra.gmra.mxu3 %v1878_v7 }
 0x321   :  { %3280 = vmatpush.bf16.msrb.mxu3 %v4681_v4  ;;  %v3148_v49 = vpop.f32.mrf.mxu2  ;;  %v4699_v4 = vld [vmem:[%s6615_s5 + $0x448] sm:$0xff] }
 0x323   :  { %3270 = vmatpush.bf16.msra.mxu2 %v4670_v0  ;;  %v3159_v53 = vpop.f32.mrf.mxu3  ;;  %v4721_v0 = vld [vmem:[%s6615_s5 + $0x4f8] sm:$0xff] }
 0x324   :  { %v3160_v25 = vadd.f32 %v3159_v53, %v3147_v6  ;;  %v4718_v53 = vld [vmem:[%s6615_s5 + $0x4e0] sm:$0xff] }
 0x325   :  { %3281 = vmatpush.bf16.msrb.mxu3 %v4680_v31  ;;  %v4698_v31 = vld [vmem:[%s6615_s5 + $0x440] sm:$0xff] }
 0x327   :  { %3271 = vmatpush.bf16.msra.mxu2 %v4669_v47  ;;  %v4707_v47 = vld [vmem:[%s6615_s5 + $0x488] sm:$0xff] }
 0x329   :  { %3282 = vmatpush.bf16.msrb.mxu3 %v4679_v61 }
 0x32b   :  { %3272 = vmatpush.bf16.msra.mxu2 %v4668_v58  ;;  %v3161_v5 = vpop.f32.mrf.mxu3  ;;  %v4706_v58 = vld [vmem:[%s6615_s5 + $0x480] sm:$0xff] }
 0x32d   :  { %3283 = vmatpush.bf16.msrb.mxu3 %v4678_v10  ;;  %v1885_v10 = vld [vmem:[#allocation1 + $0x9] sm:$0xff] }
 0x32f   :  { %3273 = vmatpush.bf16.msra.mxu2 %v4667_v32  ;;  %v1886_v32 = vld [vmem:[#allocation1 + $0x12] sm:$0xff] }
 0x331   :  { %3284 = vmatpush.bf16.msrb.mxu3 %v4677_v51  ;;  %v4719_v51 = vld [vmem:[%s6615_s5 + $0x4e8] sm:$0xff] }
 0x333   :  { %3274 = vmatpush.bf16.msra.mxu2 %v4666_v9  ;;  %v1889_v9 = vld [vmem:[#allocation1 + $0x2d] sm:$0xff] }
 0x334   :  { %3379 = vmatmul.bf16.vlgmr.msrb.gmra.mxu1 %v1889_v9 }
 0x335   :  { %3285 = vmatpush.bf16.msrb.mxu3 %v4676_v38  ;;  %v4728_v38 = vld [vmem:[%s6615_s5 + $0x530] sm:$0xff] }
 0x336   :  { %3275 = vmatmul.bf16.vlgmr.msra.gmra.mxu2 %v1879_v21  ;;  %v4716_v21 = vld [vmem:[%s6615_s5 + $0x4d0] sm:$0xff] }
 0x337   :  { %3293 = vmatpush.bf16.msrb.mxu2 %v4689_v28  ;;  %v4726_v28 = vld [vmem:[%s6615_s5 + $0x520] sm:$0xff] }
 0x339   :  { %3286 = vmatpush.bf16.msrb.mxu3 %v4675_v57  ;;  %v3172_v56 = vpop.f32.mrf.mxu2 }
 0x33a   :  { %v3173_v18 = vadd.f32 %v3172_v56, %v3160_v25  ;;  %v4717_v25 = vld [vmem:[%s6615_s5 + $0x4d8] sm:$0xff] }
 0x33b   :  { %3294 = vmatpush.bf16.msrb.mxu2 %v4688_v1  ;;  %v4715_v1 = vld [vmem:[%s6615_s5 + $0x4c8] sm:$0xff]  ;;  %v1890_v56 = vld [vmem:[#allocation1 + $0x36] sm:$0xff] }
 0x33d   :  { %3287 = vmatpush.bf16.msrb.mxu3 %v4674_v55  ;;  %v4724_v55 = vld [vmem:[%s6615_s5 + $0x510] sm:$0xff] }
 0x33f   :  { %3295 = vmatpush.bf16.msrb.mxu2 %v4687_v14  ;;  %v1465_v14 = vld [vmem:[%s6617_s4 + $0x18] sm:$0x1] }
 0x340   :  { %3288 = vmatmul.bf16.vlgmr.msrb.gmra.mxu3 %v1880_v63  ;;  %v4725_v63 = vld [vmem:[%s6615_s5 + $0x518] sm:$0xff] }
 0x341   :  { %3306 = vmatpush.bf16.msra.mxu3 %v4697_v22  ;;  %v3174_v62 = vpop.f32.mrf.mxu2  ;;  %v4756_v22 = vld [vmem:[%s6615_s5 + $0x610] sm:$0xff] }
 0x342   :  { %v4743_v62 = vld [vmem:[%s6615_s5 + $0x5a8] sm:$0xff] }
 0x343   :  { %3296 = vmatpush.bf16.msrb.mxu2 %v4686_v29  ;;  %v3185_v20 = vpop.f32.mrf.mxu3  ;;  %v4714_v29 = vld [vmem:[%s6615_s5 + $0x4c0] sm:$0xff] }
 0x344   :  { %v3186_v27 = vadd.f32 %v3185_v20, %v3173_v18  ;;  %v1888_v18 = vld [vmem:[#allocation1 + $0x24] sm:$0xff] }
 0x345   :  { %3307 = vmatpush.bf16.msra.mxu3 %v4696_v41  ;;  %v4722_v20 = vld [vmem:[%s6615_s5 + $0x500] sm:$0xff] }
 0x347   :  { %3297 = vmatpush.bf16.msrb.mxu2 %v4685_v12  ;;  %v1887_v12 = vld [vmem:[#allocation1 + $0x1b] sm:$0xff] }
 0x349   :  { %3308 = vmatpush.bf16.msra.mxu3 %v4695_v30  ;;  %v4745_v30 = vld [vmem:[%s6615_s5 + $0x5b8] sm:$0xff] }
 0x34b   :  { %3298 = vmatpush.bf16.msrb.mxu2 %v4684_v3  ;;  %v3187_v16 = vpop.f32.mrf.mxu3 }
 0x34c   :  { %v4741_v16 = vld [vmem:[%s6615_s5 + $0x598] sm:$0xff] }
 0x34d   :  { %3309 = vmatpush.bf16.msra.mxu3 %v4694_v23  ;;  %v4723_v23 = vld [vmem:[%s6615_s5 + $0x508] sm:$0xff] }
 0x34f   :  { %3299 = vmatpush.bf16.msrb.mxu2 %v4683_v37  ;;  %v1891_v37 = vld [vmem:[#allocation1 + $0x3f] sm:$0xff] }
 0x350   :  { %1893 = vst [vmem:[#allocation1] ss:$9 sm:$0xff] %v1465_v14 }
 0x351   :  { %3310 = vmatpush.bf16.msra.mxu3 %v4693_v59  ;;  %v4755_v59 = vld [vmem:[%s6615_s5 + $0x608] sm:$0xff] }
 0x353   :  { %3300 = vmatpush.bf16.msrb.mxu2 %v4682_v8  ;;  %v4753_v8 = vld [vmem:[%s6615_s5 + $0x5f8] sm:$0xff] }
 0x355   :  { %3311 = vmatpush.bf16.msra.mxu3 %v4692_v17  ;;  %v4744_v17 = vld [vmem:[%s6615_s5 + $0x5b0] sm:$0xff] }
 0x356   :  { %3301 = vmatmul.bf16.vlgmr.msrb.gmra.mxu2 %v1881_v54  ;;  %v4757_v54 = vld [vmem:[%s6615_s5 + $0x618] sm:$0xff] }
 0x357   :  { %3319 = vmatpush.bf16.msra.mxu2 %v4705_v52  ;;  %3414 = vmatpush.bf16.msra.mxu1 %v4757_v54 }
 0x359   :  { %3312 = vmatpush.bf16.msra.mxu3 %v4691_v35  ;;  %v3198_v11 = vpop.f32.mrf.mxu2  ;;  %v1894_v35 = vld [vmem:[#allocation1] sm:$0xff] }
 0x35a   :  { %v3199_v43 = vadd.f32 %v3198_v11, %v3186_v27  ;;  %v4754_v27 = vld [vmem:[%s6615_s5 + $0x600] sm:$0xff] }
 0x35b   :  { %3320 = vmatpush.bf16.msra.mxu2 %v4704_v26  ;;  %3415 = vmatpush.bf16.msra.mxu1 %v4756_v22  ;;  %v4752_v26 = vld [vmem:[%s6615_s5 + $0x5f0] sm:$0xff]  ;;  %v4738_v11 = vld [vmem:[%s6615_s5 + $0x580] sm:$0xff] }
 0x35d   :  { %3313 = vmatpush.bf16.msra.mxu3 %v4690_v13  ;;  %v4742_v13 = vld [vmem:[%s6615_s5 + $0x5a0] sm:$0xff] }
 0x35f   :  { %3321 = vmatpush.bf16.msra.mxu2 %v4703_v60  ;;  %3416 = vmatpush.bf16.msra.mxu1 %v4755_v59  ;;  %v4750_v60 = vld [vmem:[%s6615_s5 + $0x5e0] sm:$0xff] }
 0x360   :  { %3314 = vmatmul.bf16.vlgmr.msra.gmra.mxu3 %v1884_v46  ;;  %v4740_v46 = vld [vmem:[%s6615_s5 + $0x590] sm:$0xff] }
 0x361   :  { %3332 = vmatpush.bf16.msrb.mxu3 %v4713_v24  ;;  %v3200_v61 = vpop.f32.mrf.mxu2  ;;  %v4751_v24 = vld [vmem:[%s6615_s5 + $0x5e8] sm:$0xff] }
 0x363   :  { %3322 = vmatpush.bf16.msra.mxu2 %v4702_v50  ;;  %v3211_v33 = vpop.f32.mrf.mxu3  ;;  %3417 = vmatpush.bf16.msra.mxu1 %v4754_v27  ;;  %v4749_v50 = vld [vmem:[%s6615_s5 + $0x5d8] sm:$0xff] }
 0x364   :  { %v3212_v7 = vadd.f32 %v3211_v33, %v3199_v43 }
 0x365   :  { %3333 = vmatpush.bf16.msrb.mxu3 %v4712_v2 }
 0x366   :  { %4503 = vmatmul.msk.bf16.vlgmr.msra.gmra.mxu1 %vm3095_vm3, %v1894_v35 }
 0x367   :  { %3323 = vmatpush.bf16.msra.mxu2 %v4701_v19  ;;  %v4748_v19 = vld [vmem:[%s6615_s5 + $0x5d0] sm:$0xff] }
 0x369   :  { %3334 = vmatpush.bf16.msrb.mxu3 %v4711_v36  ;;  %v4739_v36 = vld [vmem:[%s6615_s5 + $0x588] sm:$0xff] }
 0x36b   :  { %3324 = vmatpush.bf16.msra.mxu2 %v4700_v39  ;;  %v3213_v6 = vpop.f32.mrf.mxu3 }
 0x36d   :  { %3335 = vmatpush.bf16.msrb.mxu3 %v4710_v42 }
 0x36f   :  { %3325 = vmatpush.bf16.msra.mxu2 %v4699_v4  ;;  %v4746_v4 = vld [vmem:[%s6615_s5 + $0x5c0] sm:$0xff] }
 0x371   :  { %3336 = vmatpush.bf16.msrb.mxu3 %v4709_v40  ;;  %v4747_v40 = vld [vmem:[%s6615_s5 + $0x5c8] sm:$0xff] }
 0x373   :  { %3326 = vmatpush.bf16.msra.mxu2 %v4698_v31 }
 0x375   :  { %3337 = vmatpush.bf16.msrb.mxu3 %v4708_v45 }
 0x376   :  { %3327 = vmatmul.bf16.vlgmr.msra.gmra.mxu2 %v1885_v10 }
 0x377   :  { %3345 = vmatpush.bf16.msrb.mxu2 %v4721_v0 }
 0x379   :  { %3338 = vmatpush.bf16.msrb.mxu3 %v4707_v47  ;;  %v3224_v49 = vpop.f32.mrf.mxu2 }
 0x37a   :  { %v3225_v57 = vadd.f32 %v3224_v49, %v3212_v7 }
 0x37b   :  { %3346 = vmatpush.bf16.msrb.mxu2 %v4720_v34 }
 0x37d   :  { %3339 = vmatpush.bf16.msrb.mxu3 %v4706_v58 }
 0x37f   :  { %3347 = vmatpush.bf16.msrb.mxu2 %v4719_v51 }
 0x380   :  { %3340 = vmatmul.bf16.vlgmr.msrb.gmra.mxu3 %v1886_v32 }
 0x381   :  { %3358 = vmatpush.bf16.msra.mxu3 %v4729_v48  ;;  %v3226_v3 = vpop.f32.mrf.mxu2 }
 0x383   :  { %3348 = vmatpush.bf16.msrb.mxu2 %v4718_v53  ;;  %v3237_v5 = vpop.f32.mrf.mxu3 }
 0x384   :  { %v3238_v41 = vadd.f32 %v3237_v5, %v3225_v57 }
 0x385   :  { %3359 = vmatpush.bf16.msra.mxu3 %v4728_v38 }
 0x387   :  { %3349 = vmatpush.bf16.msrb.mxu2 %v4717_v25 }
 0x389   :  { %3360 = vmatpush.bf16.msra.mxu3 %v4727_v44 }
 0x38b   :  { %3350 = vmatpush.bf16.msrb.mxu2 %v4716_v21  ;;  %v3239_v52 = vpop.f32.mrf.mxu3 }
 0x38c   :  { %v3442_v52 = vld [vmem:[%s6620_s9] sm:$0x3] }
 0x38d   :  { %3361 = vmatpush.bf16.msra.mxu3 %v4726_v28  ;;  %v3448_v35 = vmul.f32 %v3442_v52, %v3442_v52 }
 0x38f   :  { %3351 = vmatpush.bf16.msrb.mxu2 %v4715_v1 }
 0x391   :  { %3362 = vmatpush.bf16.msra.mxu3 %v4725_v63 }
 0x393   :  { %3352 = vmatpush.bf16.msrb.mxu2 %v4714_v29 }
 0x395   :  { %3363 = vmatpush.bf16.msra.mxu3 %v4724_v55 }
 0x396   :  { %3353 = vmatmul.bf16.vlgmr.msrb.gmra.mxu2 %v1887_v12 }
 0x397   :  { %3384 = vmatpush.bf16.msra.mxu2 %v4745_v30 }
 0x399   :  { %3364 = vmatpush.bf16.msra.mxu3 %v4723_v23  ;;  %v3250_v15 = vpop.f32.mrf.mxu2 }
 0x39a   :  { %v3251_v2 = vadd.f32 %v3250_v15, %v3238_v41 }
 0x39b   :  { %3385 = vmatpush.bf16.msra.mxu2 %v4744_v17 }
 0x39d   :  { %3365 = vmatpush.bf16.msra.mxu3 %v4722_v20 }
 0x39f   :  { %3386 = vmatpush.bf16.msra.mxu2 %v4743_v62 }
 0x3a0   :  { %3366 = vmatmul.bf16.vlgmr.msra.gmra.mxu3 %v1888_v18 }
 0x3a1   :  { %3397 = vmatpush.bf16.msrb.mxu3 %v4753_v8  ;;  %v3252_v43 = vpop.f32.mrf.mxu2  ;;  %v3443_v8 = vld [vmem:[%s6619_s10] sm:$0x3] }
 0x3a2   :  { %v3447_v62 = vmul.f32 %v3443_v8, %v3443_v8 }
 0x3a3   :  { %3387 = vmatpush.bf16.msra.mxu2 %v4742_v13  ;;  %v3263_v42 = vpop.f32.mrf.mxu3 }
 0x3a4   :  { %v3264_v39 = vadd.f32 %v3263_v42, %v3251_v2 }
 0x3a5   :  { %3398 = vmatpush.bf16.msrb.mxu3 %v4752_v26 }
 0x3a7   :  { %3388 = vmatpush.bf16.msra.mxu2 %v4741_v16 }
 0x3a9   :  { %3399 = vmatpush.bf16.msrb.mxu3 %v4751_v24  ;;  %v3449_v24 = vadd.f32 %v3448_v35, %v3447_v62 }
 0x3ab   :  { %3389 = vmatpush.bf16.msra.mxu2 %v4740_v46  ;;  %v3265_v45 = vpop.f32.mrf.mxu3 }
 0x3ad   :  { %3400 = vmatpush.bf16.msrb.mxu3 %v4750_v60  ;;  %v3450_v60 = vmul.f32 0.5, %v3449_v24 }
 0x3af   :  { %3390 = vmatpush.bf16.msra.mxu2 %v4739_v36 }
 0x3b1   :  { %3401 = vmatpush.bf16.msrb.mxu3 %v4749_v50  ;;  %v3380_v53 = vpop.f32.mrf.mxu1 }
 0x3b3   :  { %3391 = vmatpush.bf16.msra.mxu2 %v4738_v11 }
 0x3b5   :  { %3402 = vmatpush.bf16.msrb.mxu3 %v4748_v19 }
 0x3b6   :  { %3392 = vmatmul.bf16.vlgmr.msra.gmra.mxu2 %v1890_v56 }
 0x3b9   :  { %3403 = vmatpush.bf16.msrb.mxu3 %v4747_v40  ;;  %v3276_v33 = vpop.f32.mrf.mxu2  ;;  %v3382_v9 = vpop.f32.mrf.mxu1 }
 0x3ba   :  { %v3277_v7 = vadd.f32 %v3276_v33, %v3264_v39  ;;  %v3436_v39 = vld [vmem:[%s6621_s8] sm:$0x3] }
 0x3bd   :  { %3404 = vmatpush.bf16.msrb.mxu3 %v4746_v4  ;;  %v1461_v4 = vpop.xlane.xlu1 %1460 }
 0x3c0   :  { %3405 = vmatmul.bf16.vlgmr.msrb.gmra.mxu3 %v1891_v37 }
 0x3c1   :  { %v3278_v61 = vpop.f32.mrf.mxu2 }
 0x3c3   :  { %v3289_v31 = vpop.f32.mrf.mxu3 }
 0x3c4   :  { %v3290_v0 = vadd.f32 %v3289_v31, %v3277_v7 }
 0x3cb   :  { %v3291_v47 = vpop.f32.mrf.mxu3 }
 0x3d9   :  { %v3302_v10 = vpop.f32.mrf.mxu2 }
 0x3da   :  { %v3303_v34 = vadd.f32 %v3302_v10, %v3290_v0 }
 0x3e1   :  { %v3304_v6 = vpop.f32.mrf.mxu2 }
 0x3e3   :  { %v3315_v58 = vpop.f32.mrf.mxu3  ;;  %v3419_v28 = vpop.f32.mrf.mxu1 }
 0x3e4   :  { %v3316_v48 = vadd.f32 %v3315_v58, %v3303_v34 }
 0x3eb   :  { %v3317_v51 = vpop.f32.mrf.mxu3  ;;  %v3421_v57 = vpop.f32.mrf.mxu1 }
 0x3f9   :  { %v3328_v32 = vpop.f32.mrf.mxu2 }
 0x3fa   :  { %v3329_v1 = vadd.f32 %v3328_v32, %v3316_v48 }
 0x401   :  { %v3330_v44 = vpop.f32.mrf.mxu2 }
 0x403   :  { %v3341_v38 = vpop.f32.mrf.mxu3 }
 0x404   :  { %v3342_v55 = vadd.f32 %v3341_v38, %v3329_v1 }
 0x40b   :  { %v3343_v25 = vpop.f32.mrf.mxu3 }
 0x419   :  { %v3354_v21 = vpop.f32.mrf.mxu2 }
 0x41a   :  { %v3355_v22 = vadd.f32 %v3354_v21, %v3342_v55 }
 0x421   :  { %v3356_v63 = vpop.f32.mrf.mxu2 }
 0x423   :  { %v3367_v49 = vpop.f32.mrf.mxu3 }
 0x424   :  { %v3368_v5 = vadd.f32 %v3367_v49, %v3355_v22 }
 0x426   :  { %v3381_v41 = vadd.f32 %v3380_v53, %v3368_v5 }
 0x42b   :  { %v3369_v54 = vpop.f32.mrf.mxu3 }
 0x439   :  { %v3393_v14 = vpop.f32.mrf.mxu2 }
 0x43a   :  { %v3394_v29 = vadd.f32 %v3393_v14, %v3381_v41 }
 0x441   :  { %v3395_v23 = vpop.f32.mrf.mxu2 }
 0x443   :  { %v3406_v30 = vpop.f32.mrf.mxu3 }
 0x444   :  { %v3407_v12 = vadd.f32 %v3406_v30, %v3394_v29 }
 0x446   :  { %v3420_v3 = vadd.f32 %v3419_v28, %v3407_v12 }
 0x448   :  { %v3424_v56 = vsel %vm3423_vm4, %v3420_v3, -inf }
 0x449   :  { %3425 = vmax.xlane.f32.xlu0 %v3424_v56 }
 0x44b   :  { %v3408_v18 = vpop.f32.mrf.mxu3 }
 0x4bc   :  { %v3426_v59 = vpop.xlane.xlu0 %3425 }
 0x4bd   :  { %v3427_v37 = vsub.f32 %v3420_v3, %v3426_v59 }
 0x4bf   :  { %v3428_v17 = vmul.f32 1.442695, %v3427_v37 }
 0x4c1   :  { %5075 = vpow2.f32 %v3428_v17 }
 0x4c2   :  { %5077 = vlog2.f32 %v3443_v8 }
 0x4c7   :  { %v5076_v20 = vpop.eup %5075 }
 0x4c8   :  { %v3430_v27 = vsel %vm3423_vm4, %v5076_v20, 0.0  ;;  %v5078_v26 = vpop.eup %5077 }
 0x4c9   :  { %3431 = vadd.xlane.f32.xlu0 %v3430_v27  ;;  %v3445_v13 = vmul.f32 0.6931472, %v5078_v26 }
 0x4cb   :  { %v3446_v16 = vsub.f32 0.0, %v3445_v13 }
 0x4cd   :  { %v3451_v46 = vadd.f32 %v3450_v60, %v3446_v16 }
 0x4cf   :  { %v4504_v15 = vadd.f32 -0.5, %v3451_v46 }
 0x4d1   :  { %v3454_v2 = vsel %vm3453_vm5, %v4504_v15, 0.0 }
 0x4d2   :  { %3455 = vadd.xlane.f32.xlu2 %v3454_v2 }
 0x53c   :  { %v3432_v50 = vpop.xlane.xlu0 %3431 }
 0x53d   :  { %5079 = vlog2.f32 %v3432_v50 }
 0x543   :  { %v5080_v36 = vpop.eup %5079 }
 0x544   :  { %v3434_v19 = vmul.f32 0.6931472, %v5080_v36 }
 0x545   :  { %v3456_v33 = vpop.xlane.xlu2 %3455 }
 0x546   :  { %v3435_v42 = vadd.f32 %v3434_v19, %v3426_v59 }
 0x548   :  { %v3437_v11 = vsub.f32 %v3420_v3, %v3435_v42 }
 0x54a   :  { %v3438_v43 = vmul.f32 %v3437_v11, %v3436_v39 }
 0x54c   :  { %v3439_v40 = vsel %vm3423_vm4, %v3438_v43, 0.0 }
 0x54d   :  { %3440 = vadd.xlane.f32.xlu1 %v3439_v40 }
 0x5c0   :  { %v3441_v45 = vpop.xlane.xlu1 %3440 }
 0x5c1   :  { %v3457_v7 = vadd.f32 %v3441_v45, %v1461_v4 }
 0x5c3   :  { %v3458_v31 = vsub.f32 %v3457_v7, %v3456_v33 }
 0x5c5   :  { %3460 = vst.msk [vmem:[%s6622_s11] sm:$0x3] %vm3459_vm6, %v3458_v31 }

</bundles_post_ra>
